<compile_context>
chip_gen: v5e
topology: v5e:2x2
jax: 0.10.0
libtpu: 0.0.40
codegen_flags: <defaults>
</compile_context>

<pallas_src>
import functools

import jax
import jax.numpy as jnp
from jax.experimental import pallas as pl
from jax.experimental.pallas import tpu as pltpu


def _fused_kernel(scale_ref, x45_ref, w_ref, gb_ref, x39_ref, o_ref, *, inv_p):
    # scale_ref : (1, C)   per-input-channel scale (x50)
    # x45_ref   : (C, P)   input activations
    # w_ref     : (C, C)   1x1 conv weight (out_ch, in_ch)
    # gb_ref    : (C, 2)   column 0 = gamma, column 1 = beta
    # x39_ref   : (C, P)   residual input
    # o_ref     : (C, P)   output
    eps = 1e-5

    # Fold the per-channel input scale into the weight: (C,C) * (1,C) broadcast.
    w_scaled = w_ref[...] * scale_ref[...]

    # 1x1 conv == channel-mixing matmul on the MXU (f32, exact).
    x52 = jnp.dot(w_scaled, x45_ref[...], preferred_element_type=jnp.float32)

    # BatchNorm2d (training mode) batch statistics in one sweep over pixels.
    ssum = jnp.sum(x52, axis=1, keepdims=True)
    sqsum = jnp.sum(x52 * x52, axis=1, keepdims=True)
    mean = ssum * inv_p
    var = jnp.maximum(sqsum * inv_p - mean * mean, 0.0)

    gb = gb_ref[...]
    gamma = gb[:, 0:1]
    beta = gb[:, 1:2]

    # Fused BN affine + residual + ReLU:  out = max(x39 + s*x52 + b, 0)
    s = gamma * jax.lax.rsqrt(var + eps)
    b = beta - s * mean
    o_ref[...] = jnp.maximum(x39_ref[...] + s * x52 + b, 0.0)


def fused_mul_conv1x1_bn_add_relu(x50, x45, x39, weight, gamma, beta):
    """All args f32.
       x50: (1, C, 1, 1)   x45, x39: (1, C, H, W)
       weight: (C, C, 1, 1)  gamma, beta: (C,)
       Returns (1, C, H, W).
    """
    n, c, h, w = x45.shape
    assert n == 1, "module is defined for batch size 1"
    p = n * h * w

    # Pure reshapes / tiny packs only -- no HBM-sized pads or slices.
    x45_m = x45.reshape(c, p)
    x39_m = x39.reshape(c, p)
    scale = x50.reshape(1, c)
    w_m = weight.reshape(c, c)
    gb = jnp.stack([gamma, beta], axis=1)          # (C, 2)

    kernel = functools.partial(_fused_kernel, inv_p=1.0 / p)

    out = pl.pallas_call(
        kernel,
        out_shape=jax.ShapeDtypeStruct((c, p), jnp.float32),
        grid_spec=pltpu.PrefetchScalarGridSpec(
            num_scalar_prefetch=0,
            grid=(1,),                              # single step: no per-step overhead
            in_specs=[
                pl.BlockSpec((1, c), lambda i: (0, 0)),   # scale  (full array)
                pl.BlockSpec((c, p), lambda i: (0, 0)),   # x45    (full array)
                pl.BlockSpec((c, c), lambda i: (0, 0)),   # weight (full array)
                pl.BlockSpec((c, 2), lambda i: (0, 0)),   # gamma|beta (full array)
                pl.BlockSpec((c, p), lambda i: (0, 0)),   # x39    (full array)
            ],
            out_specs=pl.BlockSpec((c, p), lambda i: (0, 0)),
        ),
        compiler_params=pltpu.CompilerParams(
            dimension_semantics=("arbitrary",)),
        cost_estimate=pl.CostEstimate(
            flops=2 * c * c * p,
            transcendentals=c,
            bytes_accessed=(3 * c * p + c * c + 3 * c) * 4),
    )(scale, x45_m, w_m, gb, x39_m)

    return out.reshape(n, c, h, w)


def _reference(x50, x45, x39, weight, gamma, beta):
    """Pure-JAX reference (NCHW), training-mode batchnorm."""
    eps = 1e-5
    x51 = x50 * x45
    n, c, h, w = x51.shape
    x52 = jnp.einsum("oc,ncp->nop", weight.reshape(c, c),
                     x51.reshape(n, c, h * w)).reshape(n, c, h, w)
    mean = jnp.mean(x52, axis=(0, 2, 3), keepdims=True)
    var = jnp.mean((x52 - mean) ** 2, axis=(0, 2, 3), keepdims=True)
    xhat = (x52 - mean) / jnp.sqrt(var + eps)
    x53 = gamma.reshape(1, c, 1, 1) * xhat + beta.reshape(1, c, 1, 1)
    return jnp.maximum(x39 + x53, 0.0)


if __name__ == "__main__":
    C, H, W = 120, 28, 28
    key = jax.random.PRNGKey(0)
    k1, k2, k3, k4 = jax.random.split(key, 4)

    x39 = jax.random.normal(k1, (1, C, H, W), dtype=jnp.float32)
    x45 = jax.random.normal(k2, (1, C, H, W), dtype=jnp.float32)
    x50 = jax.random.normal(k3, (1, C, 1, 1), dtype=jnp.float32)

    # Deterministic parameter init (Conv2d weight; BatchNorm default gamma=1, beta=0)
    weight = 0.1 * jax.random.normal(k4, (C, C, 1, 1), dtype=jnp.float32)
    gamma = jnp.ones((C,), dtype=jnp.float32)
    beta = jnp.zeros((C,), dtype=jnp.float32)

    out = fused_mul_conv1x1_bn_add_relu(x50, x45, x39, weight, gamma, beta)
    out = jax.block_until_ready(out)

    ref = _reference(x50, x45, x39, weight, gamma, beta)
    assert out.shape == (1, C, H, W)
    assert jnp.allclose(out, ref, atol=1e-4, rtol=1e-4)

    print("KERNEL_OK")
</pallas_src>

<mosaic_0001>
module attributes {stable_mosaic.version = 11 : i64} {
  func.func @_fused_kernel(%arg0: i32, %arg1: memref<1x120xf32, #tpu.memory_space<vmem>>, %arg2: memref<120x784xf32, #tpu.memory_space<vmem>>, %arg3: memref<120x120xf32, #tpu.memory_space<vmem>>, %arg4: memref<120x2xf32, #tpu.memory_space<vmem>>, %arg5: memref<120x784xf32, #tpu.memory_space<vmem>>, %arg6: memref<120x784xf32, #tpu.memory_space<vmem>>) attributes {dimension_semantics = [#tpu.dimension_semantics<arbitrary>], iteration_bounds = array<i64: 1>, scalar_prefetch = 0 : i64, scratch_operands = 0 : i64, tpu.core_type = #tpu.core_type<tc>, window_params = [{pipeline_mode = #tpu.pipeline_mode<synchronous>, transform_indices = @transform_0, window_bounds = array<i64: 1, 120>}, {pipeline_mode = #tpu.pipeline_mode<synchronous>, transform_indices = @transform_1, window_bounds = array<i64: 120, 784>}, {pipeline_mode = #tpu.pipeline_mode<synchronous>, transform_indices = @transform_2, window_bounds = array<i64: 120, 120>}, {pipeline_mode = #tpu.pipeline_mode<synchronous>, transform_indices = @transform_3, window_bounds = array<i64: 120, 2>}, {pipeline_mode = #tpu.pipeline_mode<synchronous>, transform_indices = @transform_4, window_bounds = array<i64: 120, 784>}, {pipeline_mode = #tpu.pipeline_mode<synchronous>, transform_indices = @transform_5, window_bounds = array<i64: 120, 784>}]} {
    %c0 = arith.constant 0 : index
    %c0_0 = arith.constant 0 : index
    %0 = vector.load %arg3[%c0, %c0_0] : memref<120x120xf32, #tpu.memory_space<vmem>>, vector<120x120xf32>
    %c0_1 = arith.constant 0 : index
    %c0_2 = arith.constant 0 : index
    %1 = vector.load %arg1[%c0_1, %c0_2] : memref<1x120xf32, #tpu.memory_space<vmem>>, vector<1x120xf32>
    %2 = vector.broadcast %1 : vector<1x120xf32> to vector<120x120xf32>
    %3 = arith.mulf %0, %2 : vector<120x120xf32>
    %c0_3 = arith.constant 0 : index
    %c0_4 = arith.constant 0 : index
    %4 = vector.load %arg2[%c0_3, %c0_4] : memref<120x784xf32, #tpu.memory_space<vmem>>, vector<120x784xf32>
    %cst = arith.constant dense<0.000000e+00> : vector<120x784xf32>
    %5 = tpu.matmul %3, %4, %cst {dimension_numbers = #tpu.dot_dimension_numbers<[1], [0], [0], [1], [0, 0, 1, 1], [], []>} : vector<120x120xf32>, vector<120x784xf32>, vector<120x784xf32> -> vector<120x784xf32>
    %cst_5 = arith.constant dense<0.000000e+00> : vector<120xf32>
    %6 = vector.multi_reduction <add>, %5, %cst_5 [1] : vector<120x784xf32> to vector<120xf32>
    %7 = vector.shape_cast %6 : vector<120xf32> to vector<120x1xf32>
    %8 = arith.mulf %5, %5 : vector<120x784xf32>
    %cst_6 = arith.constant dense<0.000000e+00> : vector<120xf32>
    %9 = vector.multi_reduction <add>, %8, %cst_6 [1] : vector<120x784xf32> to vector<120xf32>
    %10 = vector.shape_cast %9 : vector<120xf32> to vector<120x1xf32>
    %cst_7 = arith.constant 0.00127551018 : f32
    %11 = vector.broadcast %cst_7 : f32 to vector<120x1xf32>
    %12 = arith.mulf %7, %11 : vector<120x1xf32>
    %cst_8 = arith.constant 0.00127551018 : f32
    %13 = vector.broadcast %cst_8 : f32 to vector<120x1xf32>
    %14 = arith.mulf %10, %13 : vector<120x1xf32>
    %15 = arith.mulf %12, %12 : vector<120x1xf32>
    %16 = arith.subf %14, %15 : vector<120x1xf32>
    %cst_9 = arith.constant 0.000000e+00 : f32
    %17 = vector.broadcast %cst_9 : f32 to vector<120x1xf32>
    %18 = arith.maximumf %16, %17 : vector<120x1xf32>
    %c0_10 = arith.constant 0 : index
    %c0_11 = arith.constant 0 : index
    %19 = vector.load %arg4[%c0_10, %c0_11] : memref<120x2xf32, #tpu.memory_space<vmem>>, vector<120x2xf32>
    %20 = vector.extract_strided_slice %19 {offsets = [0, 0], sizes = [120, 1], strides = [1, 1]} : vector<120x2xf32> to vector<120x1xf32>
    %21 = vector.extract_strided_slice %19 {offsets = [0, 1], sizes = [120, 1], strides = [1, 1]} : vector<120x2xf32> to vector<120x1xf32>
    %cst_12 = arith.constant 9.99999974E-6 : f32
    %22 = vector.broadcast %cst_12 : f32 to vector<120x1xf32>
    %23 = arith.addf %18, %22 : vector<120x1xf32>
    %24 = math.rsqrt %23 : vector<120x1xf32>
    %25 = arith.mulf %20, %24 : vector<120x1xf32>
    %26 = arith.mulf %25, %12 : vector<120x1xf32>
    %27 = arith.subf %21, %26 : vector<120x1xf32>
    %c0_13 = arith.constant 0 : index
    %c0_14 = arith.constant 0 : index
    %28 = vector.load %arg5[%c0_13, %c0_14] : memref<120x784xf32, #tpu.memory_space<vmem>>, vector<120x784xf32>
    %29 = vector.broadcast %25 : vector<120x1xf32> to vector<120x784xf32>
    %30 = arith.mulf %29, %5 : vector<120x784xf32>
    %31 = arith.addf %28, %30 : vector<120x784xf32>
    %32 = vector.broadcast %27 : vector<120x1xf32> to vector<120x784xf32>
    %33 = arith.addf %31, %32 : vector<120x784xf32>
    %cst_15 = arith.constant 0.000000e+00 : f32
    %34 = vector.broadcast %cst_15 : f32 to vector<120x784xf32>
    %35 = arith.maximumf %33, %34 : vector<120x784xf32>
    %c0_16 = arith.constant 0 : index
    %c0_17 = arith.constant 0 : index
    %36 = vector.load %arg6[%c0_16, %c0_17] : memref<120x784xf32, #tpu.memory_space<vmem>>, vector<120x784xf32>
    tpu.vector_store %arg6[%c0_16, %c0_17], %35 {strides = array<i32>} : memref<120x784xf32, #tpu.memory_space<vmem>>, vector<120x784xf32>,
    return
  }
  func.func @transform_0(%arg0: i32) -> (i32, i32) {
    %c0_i32 = arith.constant 0 : i32
    %c0_i32_0 = arith.constant 0 : i32
    %c0_i32_1 = arith.constant 0 : i32
    return %c0_i32, %c0_i32_0 : i32, i32
  }
  func.func @transform_1(%arg0: i32) -> (i32, i32) {
    %c0_i32 = arith.constant 0 : i32
    %c0_i32_0 = arith.constant 0 : i32
    %c0_i32_1 = arith.constant 0 : i32
    return %c0_i32, %c0_i32_0 : i32, i32
  }
  func.func @transform_2(%arg0: i32) -> (i32, i32) {
    %c0_i32 = arith.constant 0 : i32
    %c0_i32_0 = arith.constant 0 : i32
    %c0_i32_1 = arith.constant 0 : i32
    return %c0_i32, %c0_i32_0 : i32, i32
  }
  func.func @transform_3(%arg0: i32) -> (i32, i32) {
    %c0_i32 = arith.constant 0 : i32
    %c0_i32_0 = arith.constant 0 : i32
    %c0_i32_1 = arith.constant 0 : i32
    return %c0_i32, %c0_i32_0 : i32, i32
  }
  func.func @transform_4(%arg0: i32) -> (i32, i32) {
    %c0_i32 = arith.constant 0 : i32
    %c0_i32_0 = arith.constant 0 : i32
    %c0_i32_1 = arith.constant 0 : i32
    return %c0_i32, %c0_i32_0 : i32, i32
  }
  func.func @transform_5(%arg0: i32) -> (i32, i32) {
    %c0_i32 = arith.constant 0 : i32
    %c0_i32_0 = arith.constant 0 : i32
    %c0_i32_1 = arith.constant 0 : i32
    return %c0_i32, %c0_i32_0 : i32, i32
  }
}

</mosaic_0001>

<bundles_post_ra>
// kernel: tpu_custom_call.1
= control target key start
LH: loop header
LB: loop body
LE: loop exit
PB: predicated region body
PF: predicated region fallthrough
CT: control target
= control target key end

     0   :  { %vm159_vm0 = vcmask 982016   ;;  %vm644_vm1 = vcmask 130048   ;;  %s2350_s28 = smov 1   ;;  %s4794_s1 = inlined_call_operand.vmem [shape: f32[120,784], index: 1, kind: input, shape index: {}]   ;;  %s4795_s0 = inlined_call_operand.vmem [shape: f32[1,120], index: 0, kind: input, shape index: {}]   ;;  %s4796_s2 = inlined_call_operand.vmem [shape: f32[120,120], index: 2, kind: input, shape index: {}]   ;;  %s4797_s3 = inlined_call_operand.vmem [shape: f32[120,2], index: 3, kind: input, shape index: {}]   ;;  %s4798_s4 = inlined_call_operand.vmem [shape: f32[120,784], index: 4, kind: input, shape index: {}]   ;;  %s4799_s5 = inlined_call_operand.vmem [shape: f32[120,784], index: 5, kind: output, shape index: {}]  }
   0x1   :  { %v152_v0 = vld [vmem:[%s4794_s1 + $0x310] sm:$0xff]  ;;  %v154_v1 = vld [vmem:[%s4794_s1 + $0x320] sm:$0xff]  ;;  %v2391_v2 = vld [vmem:[%s4794_s1 + $0x318] sm:$0xff] }
   0x2   :  { %206 = vmatpush.msra.mxu0 %v152_v0  ;;  %2264 = vmatpush.msra.mxu3 %v152_v0  ;;  %v145_v3 = vld [vmem:[%s4794_s1 + $0x2d8] sm:$0xff]  ;;  %v147_v4 = vld [vmem:[%s4794_s1 + $0x2e8] sm:$0xff]  ;;  %v2402_v5 = vld [vmem:[%s4794_s1 + $0x2e0] sm:$0xff] }
   0x3   :  { %330 = vmatpush.msra.mxu2 %v154_v1  ;;  %2279 = vmatpush.msra.mxu1 %v2391_v2  ;;  %v138_v6 = vld [vmem:[%s4794_s1 + $0x2a0] sm:$0xff]  ;;  %v140_v7 = vld [vmem:[%s4794_s1 + $0x2b0] sm:$0xff]  ;;  %v2414_v8 = vld [vmem:[%s4794_s1 + $0x2a8] sm:$0xff] }
   0x4   :  { %207 = vmatpush.msra.mxu0 %v145_v3  ;;  %2265 = vmatpush.msra.mxu3 %v145_v3  ;;  %v131_v9 = vld [vmem:[%s4794_s1 + $0x268] sm:$0xff]  ;;  %v133_v10 = vld [vmem:[%s4794_s1 + $0x278] sm:$0xff]  ;;  %v2426_v11 = vld [vmem:[%s4794_s1 + $0x270] sm:$0xff] }
   0x5   :  { %331 = vmatpush.msra.mxu2 %v147_v4  ;;  %2280 = vmatpush.msra.mxu1 %v2402_v5  ;;  %v124_v12 = vld [vmem:[%s4794_s1 + $0x230] sm:$0xff]  ;;  %v126_v13 = vld [vmem:[%s4794_s1 + $0x240] sm:$0xff]  ;;  %v2438_v14 = vld [vmem:[%s4794_s1 + $0x238] sm:$0xff] }
   0x6   :  { %208 = vmatpush.msra.mxu0 %v138_v6  ;;  %2266 = vmatpush.msra.mxu3 %v138_v6  ;;  %v117_v15 = vld [vmem:[%s4794_s1 + $0x1f8] sm:$0xff]  ;;  %v119_v16 = vld [vmem:[%s4794_s1 + $0x208] sm:$0xff]  ;;  %v2450_v17 = vld [vmem:[%s4794_s1 + $0x200] sm:$0xff] }
   0x7   :  { %332 = vmatpush.msra.mxu2 %v140_v7  ;;  %2281 = vmatpush.msra.mxu1 %v2414_v8  ;;  %v110_v18 = vld [vmem:[%s4794_s1 + $0x1c0] sm:$0xff]  ;;  %v112_v19 = vld [vmem:[%s4794_s1 + $0x1d0] sm:$0xff]  ;;  %v2462_v20 = vld [vmem:[%s4794_s1 + $0x1c8] sm:$0xff] }
   0x8   :  { %209 = vmatpush.msra.mxu0 %v131_v9  ;;  %2267 = vmatpush.msra.mxu3 %v131_v9  ;;  %v103_v21 = vld [vmem:[%s4794_s1 + $0x188] sm:$0xff]  ;;  %v105_v22 = vld [vmem:[%s4794_s1 + $0x198] sm:$0xff]  ;;  %v2474_v23 = vld [vmem:[%s4794_s1 + $0x190] sm:$0xff] }
   0x9   :  { %333 = vmatpush.msra.mxu2 %v133_v10  ;;  %2282 = vmatpush.msra.mxu1 %v2426_v11  ;;  %v96_v24 = vld [vmem:[%s4794_s1 + $0x150] sm:$0xff]  ;;  %v98_v25 = vld [vmem:[%s4794_s1 + $0x160] sm:$0xff]  ;;  %v2486_v26 = vld [vmem:[%s4794_s1 + $0x158] sm:$0xff] }
   0xa   :  { %210 = vmatpush.msra.mxu0 %v124_v12  ;;  %2268 = vmatpush.msra.mxu3 %v124_v12  ;;  %v89_v27 = vld [vmem:[%s4794_s1 + $0x118] sm:$0xff]  ;;  %v91_v28 = vld [vmem:[%s4794_s1 + $0x128] sm:$0xff]  ;;  %v2498_v29 = vld [vmem:[%s4794_s1 + $0x120] sm:$0xff] }
   0xb   :  { %334 = vmatpush.msra.mxu2 %v126_v13  ;;  %2283 = vmatpush.msra.mxu1 %v2438_v14  ;;  %v82_v30 = vld [vmem:[%s4794_s1 + $0xe0] sm:$0xff]  ;;  %v84_v31 = vld [vmem:[%s4794_s1 + $0xf0] sm:$0xff]  ;;  %v2510_v32 = vld [vmem:[%s4794_s1 + $0xe8] sm:$0xff] }
   0xc   :  { %211 = vmatpush.msra.mxu0 %v117_v15  ;;  %2269 = vmatpush.msra.mxu3 %v117_v15  ;;  %v75_v33 = vld [vmem:[%s4794_s1 + $0xa8] sm:$0xff]  ;;  %v77_v34 = vld [vmem:[%s4794_s1 + $0xb8] sm:$0xff]  ;;  %v2522_v35 = vld [vmem:[%s4794_s1 + $0xb0] sm:$0xff] }
   0xd   :  { %335 = vmatpush.msra.mxu2 %v119_v16  ;;  %2284 = vmatpush.msra.mxu1 %v2450_v17  ;;  %v68_v36 = vld [vmem:[%s4794_s1 + $0x70] sm:$0xff]  ;;  %v2531_v37 = vld [vmem:[%s4795_s0] ss:$0 sm:$0xff]  ;;  %v2539_v39 = vld [vmem:[%s4794_s1 + $0x78] sm:$0xff] }
   0xe   :  { %212 = vmatpush.msra.mxu0 %v110_v18  ;;  %2270 = vmatpush.msra.mxu3 %v110_v18  ;;  %v70_v38 = vld [vmem:[%s4794_s1 + $0x80] sm:$0xff]  ;;  %v61_v41 = vld [vmem:[%s4794_s1 + $0x38] sm:$0xff]  ;;  %v63_v43 = vld [vmem:[%s4794_s1 + $0x48] sm:$0xff] }
   0xf   :  { %336 = vmatpush.msra.mxu2 %v112_v19  ;;  %2285 = vmatpush.msra.mxu1 %v2462_v20  ;;  %v20_v40 = vld [vmem:[%s4796_s2] sm:$0xff]  ;;  %v23_v47 = vld [vmem:[%s4796_s2 + $0x18] sm:$0xff]  ;;  %v56_v48 = vld [vmem:[%s4794_s1 + $0x10] sm:$0xff] }
  0x10   :  { %213 = vmatpush.msra.mxu0 %v103_v21  ;;  %2271 = vmatpush.msra.mxu3 %v103_v21  ;;  %v24_v42 = vld [vmem:[%s4796_s2 + $0x20] sm:$0xff]  ;;  %v2564_v46 = vmul.f32 %v2531_v37, %v20_v40  ;;  %v2579_v50 = vld [vmem:[%s4794_s1 + $0x8] sm:$0xff]  ;;  %v2582_v51 = vmul.f32 %v2531_v37, %v23_v47  ;;  %v157_v54 = vld [vmem:[%s4794_s1 + $0x338] sm:$0xff] }
  0x11   :  { %337 = vmatpush.msra.mxu2 %v105_v22  ;;  %2286 = vmatpush.msra.mxu1 %v2474_v23  ;;  %v2557_v44 = vld [vmem:[%s4794_s1 + $0x40] sm:$0xff]  ;;  %v2573_v49 = vmul.f32 %v2531_v37, %v24_v42  ;;  %v155_v53 = vld [vmem:[%s4794_s1 + $0x328] sm:$0xff]  ;;  %v148_v58 = vld [vmem:[%s4794_s1 + $0x2f0] sm:$0xff] }
  0x12   :  { %214 = vmatpush.msra.mxu0 %v96_v24  ;;  %2272 = vmatpush.msra.mxu3 %v96_v24  ;;  %v54_v45 = vld [vmem:[%s4794_s1] sm:$0xff]  ;;  %v21_v55 = vld [vmem:[%s4796_s2 + $0x8] sm:$0xff]  ;;  %v2627_v60 = vld [vmem:[%s4794_s1 + $0x2d0] sm:$0xff] }
  0x13   :  { %338 = vmatpush.msra.mxu2 %v98_v25  ;;  %2287 = vmatpush.msra.mxu1 %v2486_v26  ;;  %v2589_v52 = vld [vmem:[%s4794_s1 + $0x340] sm:$0xff]  ;;  %v25_v56 = vld [vmem:[%s4796_s2 + $0x28] sm:$0xff]  ;;  %v2630_v61 = vmul.f32 %v2531_v37, %v21_v55  ;;  %v141_v63 = vld [vmem:[%s4794_s1 + $0x2b8] sm:$0xff] }
  0x14   :  { %215 = vmatpush.msra.mxu0 %v89_v27  ;;  %2273 = vmatpush.msra.mxu3 %v89_v27  ;;  %v2612_v57 = vld [vmem:[%s4794_s1 + $0x308] sm:$0xff]  ;;  %v150_v59 = vld [vmem:[%s4794_s1 + $0x300] sm:$0xff]  ;;  %v2633_v62 = vmul.f32 %v2531_v37, %v25_v56  ;;  %v22_v1 = vld [vmem:[%s4796_s2 + $0x10] sm:$0xff] }
  0x15   :  { %339 = vmatpush.msra.mxu2 %v91_v28  ;;  %2288 = vmatpush.msra.mxu1 %v2498_v29  ;;  %v134_v0 = vld [vmem:[%s4794_s1 + $0x280] sm:$0xff]  ;;  %v26_v3 = vld [vmem:[%s4796_s2 + $0x30] sm:$0xff]  ;;  %v2664_v4 = vld [vmem:[%s4794_s1 + $0x298] sm:$0xff]  ;;  %v2684_v9 = vmul.f32 %v2531_v37, %v22_v1 }
  0x16   :  { %216 = vmatpush.msra.mxu0 %v82_v30  ;;  %2274 = vmatpush.msra.mxu3 %v82_v30  ;;  %v136_v6 = vld [vmem:[%s4794_s1 + $0x290] sm:$0xff]  ;;  %v2678_v7 = vld [vmem:[%s4794_s1 + $0x260] sm:$0xff]  ;;  %v2687_v10 = vmul.f32 %v2531_v37, %v26_v3  ;;  %v113_v12 = vld [vmem:[%s4794_s1 + $0x1d8] sm:$0xff] }
  0x17   :  { %340 = vmatpush.msra.mxu2 %v84_v31  ;;  %2289 = vmatpush.msra.mxu1 %v2510_v32  ;;  %v122_v13 = vld [vmem:[%s4794_s1 + $0x220] sm:$0xff]  ;;  %v2715_v15 = vld [vmem:[%s4794_s1 + $0x228] sm:$0xff]  ;;  %v2729_v18 = vld [vmem:[%s4794_s1 + $0x1f0] sm:$0xff] }
  0x18   :  { %217 = vmatpush.msra.mxu0 %v75_v33  ;;  %2275 = vmatpush.msra.mxu3 %v75_v33  ;;  %v106_v16 = vld [vmem:[%s4794_s1 + $0x1a0] sm:$0xff]  ;;  %v99_v19 = vld [vmem:[%s4794_s1 + $0x168] sm:$0xff]  ;;  %v108_v21 = vld [vmem:[%s4794_s1 + $0x1b0] sm:$0xff] }
  0x19   :  { %341 = vmatpush.msra.mxu2 %v77_v34  ;;  %2290 = vmatpush.msra.mxu1 %v2522_v35  ;;  %v28_v22 = vld [vmem:[%s4796_s2 + $0x40] sm:$0xff]  ;;  %v2760_v24 = vld [vmem:[%s4794_s1 + $0x1b8] sm:$0xff]  ;;  %v135_v34 = vld [vmem:[%s4794_s1 + $0x288] sm:$0xff] }
  0x1a   :  { %218 = vmatpush.msra.mxu0 %v68_v36  ;;  %2276 = vmatpush.msra.mxu3 %v68_v36  ;;  %v101_v25 = vld [vmem:[%s4794_s1 + $0x178] sm:$0xff]  ;;  %v2776_v28 = vmul.f32 %v2531_v37, %v28_v22  ;;  %v32_v30 = vld [vmem:[%s4796_s2 + $0x60] sm:$0xff]  ;;  %v87_v40 = vld [vmem:[%s4794_s1 + $0x108] sm:$0xff] }
  0x1b   :  { %342 = vmatpush.msra.mxu2 %v70_v38  ;;  %2291 = vmatpush.msra.mxu1 %v2539_v39  ;;  %v85_v27 = vld [vmem:[%s4794_s1 + $0xf8] sm:$0xff]  ;;  %v142_v33 = vld [vmem:[%s4794_s1 + $0x2c0] sm:$0xff]  ;;  %v128_v38 = vld [vmem:[%s4794_s1 + $0x250] sm:$0xff] }
  0x1c   :  { %219 = vmatpush.msra.mxu0 %v61_v41  ;;  %2277 = vmatpush.msra.mxu3 %v61_v41  ;;  %v149_v31 = vld [vmem:[%s4794_s1 + $0x2f8] sm:$0xff]  ;;  %v2809_v36 = vld [vmem:[%s4794_s1 + $0x180] sm:$0xff]  ;;  %v33_v41 = vld [vmem:[%s4796_s2 + $0x68] sm:$0xff] }
  0x1d   :  { %343 = vmatpush.msra.mxu2 %v63_v43  ;;  %2292 = vmatpush.msra.mxu1 %v2557_v44  ;;  %v2830_v43 = vmul.f32 %v2531_v37, %v33_v41  ;;  %v107_v47 = vld [vmem:[%s4794_s1 + $0x1a8] sm:$0xff]  ;;  %v80_v55 = vld [vmem:[%s4794_s1 + $0xd0] sm:$0xff] }
  0x1e   :  { %220 = vmatpush.msra.mxu0 %v54_v45  ;;  %2278 = vmatpush.msra.mxu3 %v54_v45  ;;  %v114_v45 = vld [vmem:[%s4794_s1 + $0x1e0] sm:$0xff]  ;;  %v34_v56 = vld [vmem:[%s4796_s2 + $0x70] sm:$0xff]  ;;  %v79_v1 = vld [vmem:[%s4794_s1 + $0xc8] sm:$0xff] }
  0x1f   :  { %344 = vmatpush.msra.mxu2 %v56_v48  ;;  %2159 = vmatmul.msk.f32.vlgmr.msra.gmra.mxu0 %vm159_vm0, %v2564_v46  ;;  %v30_v48 = vld [vmem:[%s4796_s2 + $0x50] sm:$0xff] }
  0x20   :  { %2163 = vmatmul.msk.f32.vlgmr.msra.gmra.mxu3 %vm159_vm0, %v2573_v49  ;;  %268 = vmatpush.msrb.mxu0 %v2391_v2  ;;  %v143_v2 = vld [vmem:[%s4794_s1 + $0x2c8] sm:$0xff]  ;;  %v64_v3 = vld [vmem:[%s4794_s1 + $0x50] sm:$0xff] }
  0x21   :  { %2293 = vmatpush.msra.mxu1 %v2579_v50  ;;  %2189 = vmatmul.msk.f32.vlgmr.msra.gmra.mxu2 %vm159_vm0, %v2564_v46 }
  0x22   :  { %2294 = vmatpush.msrb.mxu2 %v2589_v52  ;;  %2177 = vmatmul.msk.f32.vlgmr.msra.gmra.mxu1 %vm159_vm0, %v2582_v51 }
  0x23   :  { %269 = vmatpush.msrb.mxu0 %v2402_v5  ;;  %392 = vmatpush.msrb.mxu3 %v155_v53  ;;  %v127_v5 = vld [vmem:[%s4794_s1 + $0x248] sm:$0xff] }
  0x24   :  { %516 = vmatpush.msrb.mxu1 %v157_v54  ;;  %2295 = vmatpush.msrb.mxu2 %v2612_v57  ;;  %v71_v53 = vld [vmem:[%s4794_s1 + $0x88] sm:$0xff]  ;;  %v100_v54 = vld [vmem:[%s4794_s1 + $0x170] sm:$0xff] }
  0x25   :  { %270 = vmatpush.msrb.mxu0 %v2414_v8  ;;  %393 = vmatpush.msrb.mxu3 %v148_v58  ;;  %v120_v8 = vld [vmem:[%s4794_s1 + $0x210] sm:$0xff]  ;;  %v2871_v58 = vmul.f32 %v2531_v37, %v30_v48 }
  0x26   :  { %517 = vmatpush.msrb.mxu1 %v150_v59  ;;  %2296 = vmatpush.msrb.mxu2 %v2627_v60  ;;  %v2874_v59 = vmul.f32 %v2531_v37, %v34_v56 }
  0x27   :  { %271 = vmatpush.msrb.mxu0 %v2426_v11  ;;  %394 = vmatpush.msrb.mxu3 %v141_v63  ;;  %v129_v11 = vld [vmem:[%s4794_s1 + $0x258] sm:$0xff] }
  0x28   :  { %2160 = vmatmul.msk.f32.gmra.mxu0 %vm159_vm0, %v2630_v61  ;;  %2164 = vmatmul.msk.f32.gmra.mxu3 %vm159_vm0, %v2633_v62  ;;  %v93_v63 = vld [vmem:[%s4794_s1 + $0x138] sm:$0xff] }
  0x29   :  { %272 = vmatpush.msrb.mxu0 %v2438_v14  ;;  %2190 = vmatmul.msk.f32.gmra.mxu2 %vm159_vm0, %v2630_v61  ;;  %v27_v14 = vld [vmem:[%s4796_s2 + $0x38] sm:$0xff] }
  0x2a   :  { %2178 = vmatmul.msk.f32.gmra.mxu1 %vm159_vm0, %v2573_v49  ;;  %395 = vmatpush.msrb.mxu3 %v134_v0  ;;  %v86_v0 = vld [vmem:[%s4794_s1 + $0x100] sm:$0xff] }
  0x2b   :  { %273 = vmatpush.msrb.mxu0 %v2450_v17  ;;  %518 = vmatpush.msrb.mxu1 %v143_v2  ;;  %v115_v17 = vld [vmem:[%s4794_s1 + $0x1e8] sm:$0xff]  ;;  %v31_v2 = vld [vmem:[%s4796_s2 + $0x58] sm:$0xff] }
  0x2c   :  { %2297 = vmatpush.msrb.mxu2 %v2664_v4  ;;  %396 = vmatpush.msrb.mxu3 %v127_v5  ;;  %v88_v5 = vld [vmem:[%s4794_s1 + $0x110] sm:$0xff] }
  0x2d   :  { %274 = vmatpush.msrb.mxu0 %v2462_v20  ;;  %519 = vmatpush.msrb.mxu1 %v136_v6  ;;  %v2735_v20 = vmul.f32 %v2531_v37, %v27_v14  ;;  %v72_v6 = vld [vmem:[%s4794_s1 + $0x90] sm:$0xff]  ;;  %v58_v14 = vld [vmem:[%s4794_s1 + $0x20] sm:$0xff] }
  0x2e   :  { %2298 = vmatpush.msrb.mxu2 %v2678_v7  ;;  %397 = vmatpush.msrb.mxu3 %v120_v8  ;;  %v73_v8 = vld [vmem:[%s4794_s1 + $0x98] sm:$0xff] }
  0x2f   :  { %275 = vmatpush.msrb.mxu0 %v2474_v23  ;;  %520 = vmatpush.msrb.mxu1 %v129_v11  ;;  %v92_v23 = vld [vmem:[%s4794_s1 + $0x130] sm:$0xff]  ;;  %v57_v11 = vld [vmem:[%s4794_s1 + $0x18] sm:$0xff] }
  0x30   :  { %2161 = vmatmul.msk.f32.gmra.mxu0 %vm159_vm0, %v2684_v9  ;;  %2165 = vmatmul.msk.f32.gmra.mxu3 %vm159_vm0, %v2687_v10 }
  0x31   :  { %276 = vmatpush.msrb.mxu0 %v2486_v26  ;;  %2191 = vmatmul.msk.f32.gmra.mxu2 %vm159_vm0, %v2684_v9  ;;  %v156_v26 = vld [vmem:[%s4794_s1 + $0x330] sm:$0xff] }
  0x32   :  { %2179 = vmatmul.msk.f32.gmra.mxu1 %vm159_vm0, %v2633_v62  ;;  %398 = vmatpush.msrb.mxu3 %v113_v12  ;;  %v2912_v12 = vmul.f32 %v2531_v37, %v31_v2 }
  0x33   :  { %277 = vmatpush.msrb.mxu0 %v2498_v29  ;;  %521 = vmatpush.msrb.mxu1 %v122_v13  ;;  %v94_v29 = vld [vmem:[%s4794_s1 + $0x140] sm:$0xff]  ;;  %v65_v13 = vld [vmem:[%s4794_s1 + $0x58] sm:$0xff] }
  0x34   :  { %2299 = vmatpush.msrb.mxu2 %v2715_v15  ;;  %399 = vmatpush.msrb.mxu3 %v106_v16  ;;  %v66_v16 = vld [vmem:[%s4794_s1 + $0x60] sm:$0xff] }
  0x35   :  { %278 = vmatpush.msrb.mxu0 %v2510_v32  ;;  %522 = vmatpush.msrb.mxu1 %v115_v17  ;;  %v2789_v32 = vmul.f32 %v2531_v37, %v32_v30  ;;  %v59_v17 = vld [vmem:[%s4794_s1 + $0x28] sm:$0xff] }
  0x36   :  { %2300 = vmatpush.msrb.mxu2 %v2729_v18  ;;  %400 = vmatpush.msrb.mxu3 %v99_v19  ;;  %v74_v19 = vld [vmem:[%s4794_s1 + $0xa0] sm:$0xff] }
  0x37   :  { %279 = vmatpush.msrb.mxu0 %v2522_v35  ;;  %523 = vmatpush.msrb.mxu1 %v108_v21  ;;  %v29_v35 = vld [vmem:[%s4796_s2 + $0x48] sm:$0xff] }
  0x38   :  { %2162 = vmatmul.msk.f32.gmra.mxu0 %vm159_vm0, %v2582_v51  ;;  %2166 = vmatmul.msk.f32.gmra.mxu3 %vm159_vm0, %v2735_v20  ;;  %v2827_v42 = vmul.f32 %v2531_v37, %v29_v35  ;;  %v81_v37 = vld [vmem:[%s4794_s1 + $0xd8] sm:$0xff] }
  0x39   :  { %280 = vmatpush.msrb.mxu0 %v2539_v39  ;;  %2192 = vmatmul.msk.f32.gmra.mxu2 %vm159_vm0, %v2582_v51  ;;  %v78_v39 = vld [vmem:[%s4794_s1 + $0xc0] sm:$0xff] }
  0x3a   :  { %2180 = vmatmul.msk.f32.gmra.mxu1 %vm159_vm0, %v2687_v10  ;;  %401 = vmatpush.msrb.mxu3 %v92_v23 }
  0x3b   :  { %281 = vmatpush.msrb.mxu0 %v2557_v44  ;;  %2301 = vmatpush.msrb.mxu2 %v2760_v24  ;;  %v121_v44 = vld [vmem:[%s4794_s1 + $0x218] sm:$0xff] }
  0x3c   :  { %524 = vmatpush.msrb.mxu1 %v101_v25  ;;  %402 = vmatpush.msrb.mxu3 %v85_v27 }
  0x3d   :  { %282 = vmatpush.msrb.mxu0 %v2579_v50  ;;  %2302 = vmatpush.msrb.mxu2 %v2809_v36  ;;  %v2853_v50 = vld [vmem:[%s4794_s1 + $0x148] sm:$0xff] }
  0x3e   :  { %525 = vmatpush.msrb.mxu1 %v94_v29  ;;  %403 = vmatpush.msrb.mxu3 %v78_v39 }
  0x3f   :  { %454 = vmatpush.msra.mxu0 %v156_v26  ;;  %2303 = vmatpush.msrb.mxu2 %v2853_v50 }
  0x40   :  { %2167 = vmatmul.msk.f32.gmra.mxu3 %vm159_vm0, %v2776_v28  ;;  %2174 = vmatmul.msk.f32.vlgmr.msrb.gmra.mxu0 %vm159_vm0, %v2564_v46 }
  0x41   :  { %455 = vmatpush.msra.mxu0 %v149_v31  ;;  %2193 = vmatmul.msk.f32.gmra.mxu2 %vm159_vm0, %v2573_v49 }
  0x42   :  { %2181 = vmatmul.msk.f32.gmra.mxu1 %vm159_vm0, %v2735_v20  ;;  %404 = vmatpush.msrb.mxu3 %v71_v53 }
  0x43   :  { %456 = vmatpush.msra.mxu0 %v142_v33  ;;  %526 = vmatpush.msrb.mxu1 %v87_v40 }
  0x44   :  { %405 = vmatpush.msrb.mxu3 %v64_v3  ;;  %2304 = vmatpush.msrb.mxu2 %v88_v5 }
  0x45   :  { %457 = vmatpush.msra.mxu0 %v135_v34  ;;  %527 = vmatpush.msrb.mxu1 %v80_v55 }
  0x46   :  { %406 = vmatpush.msrb.mxu3 %v57_v11  ;;  %2305 = vmatpush.msrb.mxu2 %v81_v37 }
  0x47   :  { %458 = vmatpush.msra.mxu0 %v128_v38  ;;  %528 = vmatpush.msrb.mxu1 %v73_v8 }
  0x48   :  { %2168 = vmatmul.msk.f32.gmra.mxu3 %vm159_vm0, %v2827_v42  ;;  %2175 = vmatmul.msk.f32.gmra.mxu0 %vm159_vm0, %v2630_v61 }
  0x49   :  { %459 = vmatpush.msra.mxu0 %v121_v44  ;;  %2194 = vmatmul.msk.f32.gmra.mxu2 %vm159_vm0, %v2633_v62 }
  0x4a   :  { %2182 = vmatmul.msk.f32.gmra.mxu1 %vm159_vm0, %v2776_v28  ;;  %2306 = vmatpush.msrb.mxu2 %v74_v19 }
  0x4b   :  { %460 = vmatpush.msra.mxu0 %v114_v45  ;;  %529 = vmatpush.msrb.mxu1 %v66_v16 }
  0x4d   :  { %461 = vmatpush.msra.mxu0 %v107_v47  ;;  %530 = vmatpush.msrb.mxu1 %v59_v17 }
  0x4f   :  { %462 = vmatpush.msra.mxu0 %v100_v54 }
  0x50   :  { %2169 = vmatmul.msk.f32.gmra.mxu3 %vm159_vm0, %v2871_v58  ;;  %2176 = vmatmul.msk.f32.gmra.mxu0 %vm159_vm0, %v2684_v9 }
  0x51   :  { %463 = vmatpush.msra.mxu0 %v93_v63  ;;  %2195 = vmatmul.msk.f32.gmra.mxu2 %vm159_vm0, %v2687_v10 }
  0x52   :  { %2183 = vmatmul.msk.f32.gmra.mxu1 %vm159_vm0, %v2827_v42 }
  0x53   :  { %464 = vmatpush.msra.mxu0 %v86_v0 }
  0x55   :  { %465 = vmatpush.msra.mxu0 %v79_v1 }
  0x57   :  { %466 = vmatpush.msra.mxu0 %v72_v6 }
  0x58   :  { %2170 = vmatmul.msk.f32.gmra.mxu3 %vm159_vm0, %v2912_v12 }
  0x59   :  { %467 = vmatpush.msra.mxu0 %v65_v13  ;;  %2196 = vmatmul.msk.f32.gmra.mxu2 %vm159_vm0, %v2735_v20 }
  0x5a   :  { %2184 = vmatmul.msk.f32.gmra.mxu1 %vm159_vm0, %v2871_v58 }
  0x5b   :  { %468 = vmatpush.msra.mxu0 %v58_v14 }
  0x5c   :  { %2219 = vmatmul.msk.f32.vlgmr.msra.gmra.mxu0 %vm159_vm0, %v2564_v46 }
  0x5d   :  { %578 = vmatpush.msrb.mxu0 %v2589_v52  ;;  %v67_v52 = vld [vmem:[%s4794_s1 + $0x68] sm:$0xff] }
  0x5e   :  { %2307 = vmatpush.msrb.mxu2 %v67_v52 }
  0x5f   :  { %579 = vmatpush.msrb.mxu0 %v2612_v57  ;;  %v60_v57 = vld [vmem:[%s4794_s1 + $0x30] sm:$0xff] }
  0x60   :  { %2171 = vmatmul.msk.f32.gmra.mxu3 %vm159_vm0, %v2789_v32  ;;  %2308 = vmatpush.msrb.mxu2 %v60_v57 }
  0x61   :  { %580 = vmatpush.msrb.mxu0 %v2627_v60  ;;  %2197 = vmatmul.msk.f32.gmra.mxu2 %vm159_vm0, %v2776_v28 }
  0x62   :  { %2185 = vmatmul.msk.f32.gmra.mxu1 %vm159_vm0, %v2912_v12 }
  0x63   :  { %581 = vmatpush.msrb.mxu0 %v2664_v4 }
  0x64   :  { %2220 = vmatmul.msk.f32.gmra.mxu0 %vm159_vm0, %v2630_v61 }
  0x65   :  { %582 = vmatpush.msrb.mxu0 %v2678_v7 }
  0x67   :  { %583 = vmatpush.msrb.mxu0 %v2715_v15 }
  0x68   :  { %2172 = vmatmul.msk.f32.gmra.mxu3 %vm159_vm0, %v2830_v43 }
  0x69   :  { %584 = vmatpush.msrb.mxu0 %v2729_v18  ;;  %2198 = vmatmul.msk.f32.gmra.mxu2 %vm159_vm0, %v2827_v42 }
  0x6a   :  { %2186 = vmatmul.msk.f32.gmra.mxu1 %vm159_vm0, %v2789_v32 }
  0x6b   :  { %585 = vmatpush.msrb.mxu0 %v2760_v24 }
  0x6c   :  { %2221 = vmatmul.msk.f32.gmra.mxu0 %vm159_vm0, %v2684_v9 }
  0x6d   :  { %586 = vmatpush.msrb.mxu0 %v2809_v36 }
  0x6f   :  { %587 = vmatpush.msrb.mxu0 %v2853_v50 }
  0x70   :  { %2173 = vmatmul.msk.f32.gmra.mxu3 %vm159_vm0, %v2874_v59 }
  0x71   :  { %2199 = vmatmul.msk.f32.gmra.mxu2 %vm159_vm0, %v2871_v58  ;;  %588 = vmatpush.msrb.mxu0 %v88_v5 }
  0x72   :  { %2187 = vmatmul.msk.f32.gmra.mxu1 %vm159_vm0, %v2830_v43 }
  0x73   :  { %589 = vmatpush.msrb.mxu0 %v81_v37 }
  0x74   :  { %2222 = vmatmul.msk.f32.gmra.mxu0 %vm159_vm0, %v2582_v51 }
  0x75   :  { %590 = vmatpush.msrb.mxu0 %v74_v19 }
  0x77   :  { %591 = vmatpush.msrb.mxu0 %v67_v52 }
  0x78   :  { %2204 = vmatmul.msk.f32.vlgmr.msrb.gmra.mxu3 %vm159_vm0, %v2564_v46 }
  0x79   :  { %2200 = vmatmul.msk.f32.gmra.mxu2 %vm159_vm0, %v2912_v12  ;;  %592 = vmatpush.msrb.mxu0 %v60_v57 }
  0x7a   :  { %2188 = vmatmul.msk.f32.gmra.mxu1 %vm159_vm0, %v2874_v59 }
  0x7c   :  { %2223 = vmatmul.msk.f32.gmra.mxu0 %vm159_vm0, %v2573_v49 }
  0x80   :  { %2205 = vmatmul.msk.f32.gmra.mxu3 %vm159_vm0, %v2630_v61 }
  0x81   :  { %2201 = vmatmul.msk.f32.gmra.mxu2 %vm159_vm0, %v2789_v32 }
  0x82   :  { %2234 = vmatmul.msk.f32.vlgmr.msrb.gmra.mxu1 %vm159_vm0, %v2564_v46 }
  0x84   :  { %2224 = vmatmul.msk.f32.gmra.mxu0 %vm159_vm0, %v2633_v62 }
  0x88   :  { %2206 = vmatmul.msk.f32.gmra.mxu3 %vm159_vm0, %v2684_v9 }
  0x89   :  { %2202 = vmatmul.msk.f32.gmra.mxu2 %vm159_vm0, %v2830_v43 }
  0x8a   :  { %2235 = vmatmul.msk.f32.gmra.mxu1 %vm159_vm0, %v2630_v61 }
  0x8c   :  { %2225 = vmatmul.msk.f32.gmra.mxu0 %vm159_vm0, %v2687_v10 }
  0x90   :  { %2207 = vmatmul.msk.f32.gmra.mxu3 %vm159_vm0, %v2582_v51 }
  0x91   :  { %2203 = vmatmul.msk.f32.gmra.mxu2 %vm159_vm0, %v2874_v59 }
  0x92   :  { %2236 = vmatmul.msk.f32.gmra.mxu1 %vm159_vm0, %v2684_v9 }
  0x94   :  { %2226 = vmatmul.msk.f32.gmra.mxu0 %vm159_vm0, %v2735_v20 }
  0x98   :  { %2208 = vmatmul.msk.f32.gmra.mxu3 %vm159_vm0, %v2573_v49 }
  0x99   :  { %2252 = vmatmul.msk.f32.vlgmr.msrb.gmra.mxu2 %vm159_vm0, %v2582_v51 }
  0x9a   :  { %2237 = vmatmul.msk.f32.gmra.mxu1 %vm159_vm0, %v2582_v51 }
  0x9c   :  { %2227 = vmatmul.msk.f32.gmra.mxu0 %vm159_vm0, %v2776_v28  ;;  %v3020_v60 = vpop.f32.mrf.mxu0 }
  0x9d   :  { %4896 = vst [vmem:[#allocation2_spill] sm:$0xff] %v3020_v60 }
  0x9f   :  { %v3022_v4 = vpop.f32.mrf.mxu1 }
  0xa0   :  { %4897 = vst [vmem:[#allocation3_spill] sm:$0xff] %v3022_v4  ;;  %2209 = vmatmul.msk.f32.gmra.mxu3 %vm159_vm0, %v2633_v62  ;;  %v797_v37 = vmul.f32 %v3022_v4, %v3022_v4 }
  0xa1   :  { %2253 = vmatmul.msk.f32.gmra.mxu2 %vm159_vm0, %v2573_v49 }
  0xa2   :  { %2238 = vmatmul.msk.f32.gmra.mxu1 %vm159_vm0, %v2573_v49 }
  0xa3   :  { %v3032_v51 = vpop.f32.mrf.mxu3 }
  0xa4   :  { %2228 = vmatmul.msk.f32.gmra.mxu0 %vm159_vm0, %v2827_v42  ;;  %4898 = vst [vmem:[#allocation4_spill] sm:$0xff] %v3032_v51  ;;  %v3034_v7 = vpop.f32.mrf.mxu2 }
  0xa5   :  { %4899 = vst [vmem:[#allocation5_spill] sm:$0xff] %v3034_v7  ;;  %v3036_v15 = vpop.f32.mrf.mxu0 }
  0xa6   :  { %4900 = vst [vmem:[#allocation6_spill] sm:$0xff] %v3036_v15 }
  0xa7   :  { %v3038_v18 = vpop.f32.mrf.mxu1 }
  0xa8   :  { %4901 = vst [vmem:[#allocation7_spill] sm:$0xff] %v3038_v18  ;;  %2210 = vmatmul.msk.f32.gmra.mxu3 %vm159_vm0, %v2687_v10 }
  0xa9   :  { %2254 = vmatmul.msk.f32.gmra.mxu2 %vm159_vm0, %v2633_v62 }
  0xaa   :  { %2239 = vmatmul.msk.f32.gmra.mxu1 %vm159_vm0, %v2633_v62 }
  0xab   :  { %v3048_v49 = vpop.f32.mrf.mxu3 }
  0xac   :  { %2229 = vmatmul.msk.f32.gmra.mxu0 %vm159_vm0, %v2871_v58  ;;  %4902 = vst [vmem:[#allocation8_spill] sm:$0xff] %v3048_v49  ;;  %v3050_v21 = vpop.f32.mrf.mxu2 }
  0xad   :  { %4903 = vst [vmem:[#allocation9_spill] sm:$0xff] %v3050_v21  ;;  %v3052_v22 = vpop.f32.mrf.mxu0 }
  0xaf   :  { %v3054_v23 = vpop.f32.mrf.mxu1 }
  0xb0   :  { %4904 = vst [vmem:[#allocation10_spill] sm:$0xff] %v3054_v23  ;;  %2211 = vmatmul.msk.f32.gmra.mxu3 %vm159_vm0, %v2735_v20 }
  0xb1   :  { %2255 = vmatmul.msk.f32.gmra.mxu2 %vm159_vm0, %v2687_v10 }
  0xb2   :  { %2240 = vmatmul.msk.f32.gmra.mxu1 %vm159_vm0, %v2687_v10 }
  0xb3   :  { %v3064_v62 = vpop.f32.mrf.mxu3 }
  0xb4   :  { %2230 = vmatmul.msk.f32.gmra.mxu0 %vm159_vm0, %v2912_v12  ;;  %4905 = vst [vmem:[#allocation11_spill] sm:$0xff] %v3064_v62  ;;  %v3066_v24 = vpop.f32.mrf.mxu2 }
  0xb5   :  { %v3068_v25 = vpop.f32.mrf.mxu0 }
  0xb6   :  { %4906 = vst [vmem:[#allocation12_spill] sm:$0xff] %v3068_v25  ;;  %v796_v13 = vmul.f32 %v3068_v25, %v3068_v25  ;;  %v667_v16 = vadd.f32 %v3022_v4, %v3068_v25  ;;  %v803_v4 = vmul.f32 %v3032_v51, %v3032_v51  ;;  %v804_v25 = vmul.f32 %v3038_v18, %v3038_v18 }
  0xb7   :  { %v3070_v26 = vpop.f32.mrf.mxu1 }
  0xb8   :  { %4907 = vst [vmem:[#allocation13_spill] sm:$0xff] %v3070_v26  ;;  %2212 = vmatmul.msk.f32.gmra.mxu3 %vm159_vm0, %v2776_v28  ;;  %v907_v52 = vadd.f32 %v797_v37, %v796_v13  ;;  %v676_v37 = vadd.f32 %v3038_v18, %v3032_v51 }
  0xb9   :  { %2256 = vmatmul.msk.f32.gmra.mxu2 %vm159_vm0, %v2735_v20 }
  0xba   :  { %2241 = vmatmul.msk.f32.gmra.mxu1 %vm159_vm0, %v2735_v20 }
  0xbb   :  { %v3080_v10 = vpop.f32.mrf.mxu3 }
  0xbc   :  { %2231 = vmatmul.msk.f32.gmra.mxu0 %vm159_vm0, %v2789_v32  ;;  %v3082_v27 = vpop.f32.mrf.mxu2 }
  0xbd   :  { %4908 = vst [vmem:[#allocation14_spill] sm:$0xff] %v3082_v27  ;;  %v3084_v29 = vpop.f32.mrf.mxu0  ;;  %v798_v17 = vmul.f32 %v3082_v27, %v3082_v27  ;;  %v668_v57 = vadd.f32 %v667_v16, %v3082_v27 }
  0xbe   :  { %4909 = vst [vmem:[#allocation15_spill] sm:$0xff] %v3084_v29 }
  0xbf   :  { %v3086_v30 = vpop.f32.mrf.mxu1 }
  0xc0   :  { %4910 = vst [vmem:[#allocation16_spill] sm:$0xff] %v3086_v30  ;;  %2213 = vmatmul.msk.f32.gmra.mxu3 %vm159_vm0, %v2827_v42 }
  0xc1   :  { %2257 = vmatmul.msk.f32.gmra.mxu2 %vm159_vm0, %v2776_v28 }
  0xc2   :  { %2242 = vmatmul.msk.f32.gmra.mxu1 %vm159_vm0, %v2776_v28 }
  0xc3   :  { %v3096_v20 = vpop.f32.mrf.mxu3 }
  0xc4   :  { %2232 = vmatmul.msk.f32.gmra.mxu0 %vm159_vm0, %v2830_v43  ;;  %4911 = vst [vmem:[#allocation17_spill] sm:$0xff] %v3096_v20  ;;  %v3098_v31 = vpop.f32.mrf.mxu2 }
  0xc5   :  { %4912 = vst [vmem:[#allocation18_spill] sm:$0xff] %v3098_v31  ;;  %v3100_v33 = vpop.f32.mrf.mxu0  ;;  %v805_v16 = vmul.f32 %v3098_v31, %v3098_v31  ;;  %v677_v27 = vadd.f32 %v676_v37, %v3098_v31 }
  0xc6   :  { %4913 = vst [vmem:[#allocation19_spill] sm:$0xff] %v3100_v33 }
  0xc7   :  { %v3102_v34 = vpop.f32.mrf.mxu1 }
  0xc8   :  { %4914 = vst [vmem:[#allocation20_spill] sm:$0xff] %v3102_v34  ;;  %2214 = vmatmul.msk.f32.gmra.mxu3 %vm159_vm0, %v2871_v58 }
  0xc9   :  { %2258 = vmatmul.msk.f32.gmra.mxu2 %vm159_vm0, %v2827_v42 }
  0xca   :  { %2243 = vmatmul.msk.f32.gmra.mxu1 %vm159_vm0, %v2827_v42 }
  0xcb   :  { %v3112_v28 = vpop.f32.mrf.mxu3 }
  0xcc   :  { %2233 = vmatmul.msk.f32.gmra.mxu0 %vm159_vm0, %v2874_v59  ;;  %4915 = vst [vmem:[#allocation21_spill] sm:$0xff] %v3112_v28  ;;  %v3114_v35 = vpop.f32.mrf.mxu2 }
  0xcd   :  { %4916 = vst [vmem:[#allocation22_spill] sm:$0xff] %v3114_v35  ;;  %v3118_v38 = vpop.f32.mrf.mxu0 }
  0xcf   :  { %v3116_v36 = vpop.f32.mrf.mxu1 }
  0xd0   :  { %4917 = vst [vmem:[#allocation23_spill] sm:$0xff] %v3116_v36  ;;  %2215 = vmatmul.msk.f32.gmra.mxu3 %vm159_vm0, %v2912_v12 }
  0xd1   :  { %2259 = vmatmul.msk.f32.gmra.mxu2 %vm159_vm0, %v2871_v58 }
  0xd2   :  { %2244 = vmatmul.msk.f32.gmra.mxu1 %vm159_vm0, %v2871_v58 }
  0xd3   :  { %v3128_v39 = vpop.f32.mrf.mxu3 }
  0xd4   :  { %2249 = vmatmul.msk.f32.vlgmr.msrb.gmra.mxu0 %vm159_vm0, %v2564_v46  ;;  %4918 = vst [vmem:[#allocation24_spill] sm:$0xff] %v3128_v39  ;;  %v3130_v40 = vpop.f32.mrf.mxu2 }
  0xd5   :  { %4919 = vst [vmem:[#allocation25_spill] sm:$0xff] %v3130_v40 }
  0xd7   :  { %v3132_v41 = vpop.f32.mrf.mxu1 }
  0xd8   :  { %4920 = vst [vmem:[#allocation26_spill] sm:$0xff] %v3132_v41  ;;  %2216 = vmatmul.msk.f32.gmra.mxu3 %vm159_vm0, %v2789_v32 }
  0xd9   :  { %v3134_v42 = vpop.f32.mrf.mxu0  ;;  %2260 = vmatmul.msk.f32.gmra.mxu2 %vm159_vm0, %v2912_v12 }
  0xda   :  { %2245 = vmatmul.msk.f32.gmra.mxu1 %vm159_vm0, %v2912_v12 }
  0xdb   :  { %v3144_v46 = vpop.f32.mrf.mxu3 }
  0xdc   :  { %2250 = vmatmul.msk.f32.gmra.mxu0 %vm159_vm0, %v2630_v61  ;;  %4921 = vst [vmem:[#allocation27_spill] sm:$0xff] %v3144_v46  ;;  %v3146_v44 = vpop.f32.mrf.mxu2 }
  0xdf   :  { %v3148_v45 = vpop.f32.mrf.mxu1 }
  0xe0   :  { %4922 = vst [vmem:[#allocation28_spill] sm:$0xff] %v3148_v45  ;;  %2217 = vmatmul.msk.f32.gmra.mxu3 %vm159_vm0, %v2830_v43 }
  0xe1   :  { %v3150_v47 = vpop.f32.mrf.mxu0  ;;  %2261 = vmatmul.msk.f32.gmra.mxu2 %vm159_vm0, %v2789_v32 }
  0xe2   :  { %4923 = vst [vmem:[#allocation29_spill] sm:$0xff] %v3150_v47  ;;  %2246 = vmatmul.msk.f32.gmra.mxu1 %vm159_vm0, %v2789_v32 }
  0xe3   :  { %v3160_v61 = vpop.f32.mrf.mxu3 }
  0xe4   :  { %2251 = vmatmul.msk.f32.gmra.mxu0 %vm159_vm0, %v2684_v9  ;;  %4924 = vst [vmem:[#allocation30_spill] sm:$0xff] %v3160_v61  ;;  %v3162_v48 = vpop.f32.mrf.mxu2 }
  0xe5   :  { %4925 = vst [vmem:[#allocation31_spill] sm:$0xff] %v3162_v48 }
  0xe7   :  { %v3164_v50 = vpop.f32.mrf.mxu1 }
  0xe8   :  { %4926 = vst [vmem:[#allocation32_spill] sm:$0xff] %v3164_v50  ;;  %2218 = vmatmul.msk.f32.gmra.mxu3 %vm159_vm0, %v2874_v59 }
  0xe9   :  { %v3166_v53 = vpop.f32.mrf.mxu0  ;;  %2262 = vmatmul.msk.f32.gmra.mxu2 %vm159_vm0, %v2830_v43 }
  0xea   :  { %4927 = vst [vmem:[#allocation33_spill] sm:$0xff] %v3166_v53  ;;  %2247 = vmatmul.msk.f32.gmra.mxu1 %vm159_vm0, %v2830_v43 }
  0xeb   :  { %v3174_v32 = vpop.f32.mrf.mxu3 }
  0xec   :  { %4928 = vst [vmem:[#allocation34_spill] sm:$0xff] %v3174_v32  ;;  %v3176_v9 = vpop.f32.mrf.mxu2 }
  0xed   :  { %4929 = vst [vmem:[#allocation35_spill] sm:$0xff] %v3176_v9 }
  0xef   :  { %v3178_v54 = vpop.f32.mrf.mxu1 }
  0xf0   :  { %4930 = vst [vmem:[#allocation36_spill] sm:$0xff] %v3178_v54 }
  0xf1   :  { %v3180_v55 = vpop.f32.mrf.mxu0  ;;  %2263 = vmatmul.msk.f32.gmra.mxu2 %vm159_vm0, %v2874_v59 }
  0xf2   :  { %2248 = vmatmul.msk.f32.gmra.mxu1 %vm159_vm0, %v2874_v59 }
  0xf3   :  { %v3186_v56 = vpop.f32.mrf.mxu3 }
  0xf4   :  { %4931 = vst [vmem:[#allocation37_spill] sm:$0xff] %v3186_v56  ;;  %v3188_v58 = vpop.f32.mrf.mxu2 }
  0xf7   :  { %v3190_v63 = vpop.f32.mrf.mxu1 }
  0xf8   :  { %4932 = vst [vmem:[#allocation38_spill] sm:$0xff] %v3190_v63 }
  0xf9   :  { %v3192_v43 = vpop.f32.mrf.mxu0 }
  0xfa   :  { %4933 = vst [vmem:[#allocation39_spill] sm:$0xff] %v3192_v43 }
  0xfb   :  { %v3194_v0 = vpop.f32.mrf.mxu3 }
  0xfc   :  { %v3196_v1 = vpop.f32.mrf.mxu2 }
  0xfd   :  { %4934 = vst [vmem:[#allocation40_spill] sm:$0xff] %v3196_v1 }
  0xff   :  { %v3198_v2 = vpop.f32.mrf.mxu1 }
 0x101   :  { %v3200_v3 = vpop.f32.mrf.mxu0 }
 0x103   :  { %v3202_v5 = vpop.f32.mrf.mxu3 }
 0x104   :  { %4935 = vst [vmem:[#allocation41_spill] sm:$0xff] %v3202_v5  ;;  %v3204_v6 = vpop.f32.mrf.mxu2 }
 0x105   :  { %4936 = vst [vmem:[#allocation42_spill] sm:$0xff] %v3204_v6 }
 0x107   :  { %v3206_v59 = vpop.f32.mrf.mxu1 }
 0x108   :  { %4937 = vst [vmem:[#allocation43_spill] sm:$0xff] %v3206_v59 }
 0x109   :  { %v3208_v8 = vpop.f32.mrf.mxu0 }
 0x10a   :  { %4938 = vst [vmem:[#allocation44_spill] sm:$0xff] %v3208_v8 }
 0x10b   :  { %v3210_v11 = vpop.f32.mrf.mxu3 }
 0x10c   :  { %4939 = vst [vmem:[#allocation45_spill] sm:$0xff] %v3210_v11  ;;  %v3212_v12 = vpop.f32.mrf.mxu2 }
 0x10d   :  { %4940 = vst [vmem:[#allocation46_spill] sm:$0xff] %v3212_v12  ;;  %v908_v12 = vadd.f32 %v907_v52, %v798_v17  ;;  %v800_v17 = vmul.f32 %v3180_v55, %v3180_v55 }
 0x10f   :  { %v3216_v14 = vpop.f32.mrf.mxu1 }
 0x110   :  { %4941 = vst [vmem:[#allocation47_spill] sm:$0xff] %v3216_v14 }
 0x111   :  { %v3224_v19 = vpop.f32.mrf.mxu0 }
 0x112   :  { %4942 = vst [vmem:[#allocation48_spill] sm:$0xff] %v3224_v19 }
 0x113   :  { %v3227_v6 = vpop.f32.mrf.mxu3 }
 0x114   :  { %4943 = vst [vmem:[#allocation49_spill] sm:$0xff] %v3227_v6  ;;  %v3229_v50 = vpop.f32.mrf.mxu2  ;;  %v669_v14 = vadd.f32 %v668_v57, %v3227_v6  ;;  %v799_v63 = vmul.f32 %v3227_v6, %v3227_v6  ;;  %v916_v6 = vadd.f32 %v804_v25, %v803_v4 }
 0x115   :  { %4944 = vst [vmem:[#allocation50_spill] sm:$0xff] %v3229_v50 }
 0x116   :  { %v909_v56 = vadd.f32 %v908_v12, %v799_v63  ;;  %v670_v57 = vadd.f32 %v669_v14, %v3180_v55  ;;  %v917_v18 = vadd.f32 %v916_v6, %v805_v16  ;;  %v685_v6 = vadd.f32 %v3054_v23, %v3048_v49 }
 0x117   :  { %v3238_v13 = vpop.f32.mrf.mxu1  ;;  %v807_v16 = vmul.f32 %v3192_v43, %v3192_v43 }
 0x118   :  { %4945 = vst [vmem:[#allocation51_spill] sm:$0xff] %v3238_v13  ;;  %v801_v63 = vmul.f32 %v3238_v13, %v3238_v13  ;;  %v910_v12 = vadd.f32 %v909_v56, %v800_v17  ;;  %v671_v14 = vadd.f32 %v670_v57, %v3238_v13 }
 0x119   :  { %v3246_v52 = vpop.f32.mrf.mxu0 }
 0x11a   :  { %4946 = vst [vmem:[#allocation52_spill] sm:$0xff] %v3246_v52  ;;  %v911_v17 = vadd.f32 %v910_v12, %v801_v63  ;;  %v810_v12 = vmul.f32 %v3048_v49, %v3048_v49 }
 0x11b   :  { %v3252_v50 = vpop.f32.mrf.mxu3 }
 0x11c   :  { %4947 = vst [vmem:[#allocation53_spill] sm:$0xff] %v3252_v50  ;;  %v678_v51 = vadd.f32 %v677_v27, %v3252_v50  ;;  %v806_v54 = vmul.f32 %v3252_v50, %v3252_v50  ;;  %v3257_v32 = vpop.f32.mrf.mxu2 }
 0x11d   :  { %v672_v4 = vsel %vm644_vm1, %v3257_v32, 0.0  ;;  %v802_v25 = vmul.f32 %v3257_v32, %v3257_v32 }
 0x11e   :  { %v918_v37 = vadd.f32 %v917_v18, %v806_v54  ;;  %v673_v56 = vadd.f32 %v672_v4, %v671_v14  ;;  %v679_v13 = vadd.f32 %v678_v51, %v3192_v43  ;;  %v686_v18 = vadd.f32 %v685_v6, %v3114_v35 }
 0x11f   :  { %v3264_v31 = vpop.f32.mrf.mxu1  ;;  %v912_v27 = vsel %vm644_vm1, %v802_v25, 0.0  ;;  %v811_v14 = vmul.f32 %v3054_v23, %v3054_v23  ;;  %v694_v23 = vadd.f32 %v3070_v26, %v3064_v62 }
 0x120   :  { %4948 = vst [vmem:[#allocation54_spill] sm:$0xff] %v3264_v31  ;;  %674 = vadd.xlane.f32.xlu1 %v673_v56  ;;  %v913_v50 = vadd.f32 %v912_v27, %v911_v17  ;;  %v808_v54 = vmul.f32 %v3264_v31, %v3264_v31  ;;  %v919_v63 = vadd.f32 %v918_v37, %v807_v16 }
 0x121   :  { %v3271_v57 = vpop.f32.mrf.mxu0  ;;  %v680_v51 = vadd.f32 %v679_v13, %v3264_v31  ;;  %v812_v37 = vmul.f32 %v3114_v35, %v3114_v35  ;;  %v925_v16 = vadd.f32 %v811_v14, %v810_v12  ;;  %v818_v12 = vmul.f32 %v3070_v26, %v3070_v26 }
 0x122   :  { %4949 = vst [vmem:[#allocation55_spill] sm:$0xff] %v3271_v57  ;;  %914 = vadd.xlane.f32.xlu0 %v913_v50  ;;  %v920_v6 = vadd.f32 %v919_v63, %v808_v54  ;;  %v695_v54 = vadd.f32 %v694_v23, %v3130_v40  ;;  %v817_v63 = vmul.f32 %v3064_v62, %v3064_v62 }
 0x123   :  { %v3281_v4 = vpop.f32.mrf.mxu3  ;;  %v926_v35 = vadd.f32 %v925_v16, %v812_v37  ;;  %v819_v23 = vmul.f32 %v3130_v40, %v3130_v40  ;;  %v825_v26 = vmul.f32 %v3086_v30, %v3086_v30 }
 0x124   :  { %v687_v25 = vadd.f32 %v686_v18, %v3281_v4  ;;  %v3284_v56 = vpop.f32.mrf.mxu2  ;;  %v813_v13 = vmul.f32 %v3281_v4, %v3281_v4 }
 0x125   :  { %4950 = vst [vmem:[#allocation56_spill] sm:$0xff] %v3284_v56  ;;  %v809_v17 = vmul.f32 %v3284_v56, %v3284_v56  ;;  %v681_v50 = vsel %vm644_vm1, %v3284_v56, 0.0 }
 0x126   :  { %v682_v27 = vadd.f32 %v681_v50, %v680_v51  ;;  %v688_v49 = vadd.f32 %v687_v25, %v3200_v3  ;;  %v927_v51 = vadd.f32 %v926_v35, %v813_v13  ;;  %v703_v35 = vadd.f32 %v3086_v30, %v3080_v10 }
 0x127   :  { %v3293_v43 = vpop.f32.mrf.mxu1  ;;  %v921_v18 = vsel %vm644_vm1, %v809_v17, 0.0 }
 0x128   :  { %4951 = vst [vmem:[#allocation57_spill] sm:$0xff] %v3293_v43  ;;  %683 = vadd.xlane.f32.xlu2 %v682_v27  ;;  %v922_v56 = vadd.f32 %v921_v18, %v920_v6  ;;  %v689_v27 = vadd.f32 %v688_v49, %v3293_v43  ;;  %v934_v6 = vadd.f32 %v818_v12, %v817_v63 }
 0x129   :  { %v3300_v31 = vpop.f32.mrf.mxu0  ;;  %v815_v49 = vmul.f32 %v3293_v43, %v3293_v43 }
 0x12a   :  { %923 = vadd.xlane.f32.xlu1 %v922_v56  ;;  %v814_v56 = vmul.f32 %v3200_v3, %v3200_v3  ;;  %v935_v12 = vadd.f32 %v934_v6, %v819_v23  ;;  %v821_v6 = vmul.f32 %v3208_v8, %v3208_v8 }
 0x12b   :  { %v3308_v14 = vpop.f32.mrf.mxu3 }
 0x12c   :  { %4952 = vst [vmem:[#allocation58_spill] sm:$0xff] %v3308_v14  ;;  %v696_v17 = vadd.f32 %v695_v54, %v3308_v14  ;;  %v3311_v50 = vpop.f32.mrf.mxu2  ;;  %v820_v13 = vmul.f32 %v3308_v14, %v3308_v14  ;;  %v928_v40 = vadd.f32 %v927_v51, %v814_v56  ;;  %v826_v56 = vmul.f32 %v3146_v44, %v3146_v44 }
 0x12d   :  { %4953 = vst [vmem:[#allocation59_spill] sm:$0xff] %v3311_v50  ;;  %v690_v25 = vsel %vm644_vm1, %v3311_v50, 0.0  ;;  %v816_v16 = vmul.f32 %v3311_v50, %v3311_v50 }
 0x12e   :  { %v691_v37 = vadd.f32 %v690_v25, %v689_v27  ;;  %v697_v63 = vadd.f32 %v696_v17, %v3208_v8  ;;  %v704_v27 = vadd.f32 %v703_v35, %v3146_v44  ;;  %v824_v25 = vmul.f32 %v3080_v10, %v3080_v10 }
 0x12f   :  { %v3324_v18 = vpop.f32.mrf.mxu1  ;;  %v930_v50 = vsel %vm644_vm1, %v816_v16, 0.0  ;;  %v936_v14 = vadd.f32 %v935_v12, %v820_v13  ;;  %v929_v51 = vadd.f32 %v928_v40, %v815_v49  ;;  %v712_v13 = vadd.f32 %v3102_v34, %v3096_v20 }
 0x130   :  { %4954 = vst [vmem:[#allocation60_spill] sm:$0xff] %v3324_v18  ;;  %692 = vadd.xlane.f32.xlu2 %v691_v37  ;;  %v698_v17 = vadd.f32 %v697_v63, %v3324_v18  ;;  %v943_v16 = vadd.f32 %v825_v26, %v824_v25  ;;  %v822_v40 = vmul.f32 %v3324_v18, %v3324_v18 }
 0x131   :  { %v3330_v54 = vpop.f32.mrf.mxu0  ;;  %v931_v35 = vadd.f32 %v930_v50, %v929_v51  ;;  %v937_v50 = vadd.f32 %v936_v14, %v821_v6  ;;  %v713_v51 = vadd.f32 %v712_v13, %v3162_v48  ;;  %v833_v6 = vmul.f32 %v3162_v48, %v3162_v48 }
 0x132   :  { %4955 = vst [vmem:[#allocation61_spill] sm:$0xff] %v3330_v54  ;;  %v944_v25 = vadd.f32 %v943_v16, %v826_v56  ;;  %v828_v16 = vmul.f32 %v3224_v19, %v3224_v19 }
 0x133   :  { %v3338_v62 = vpop.f32.mrf.mxu3  ;;  %v938_v14 = vadd.f32 %v937_v50, %v822_v40 }
 0x134   :  { %v705_v37 = vadd.f32 %v704_v27, %v3338_v62  ;;  %v3342_v43 = vpop.f32.mrf.mxu2  ;;  %v827_v12 = vmul.f32 %v3338_v62, %v3338_v62 }
 0x135   :  { %4956 = vst [vmem:[#allocation62_spill] sm:$0xff] %v3342_v43  ;;  %v699_v23 = vsel %vm644_vm1, %v3342_v43, 0.0  ;;  %v823_v49 = vmul.f32 %v3342_v43, %v3342_v43 }
 0x136   :  { %v700_v30 = vadd.f32 %v699_v23, %v698_v17  ;;  %v706_v26 = vadd.f32 %v705_v37, %v3224_v19  ;;  %v831_v17 = vmul.f32 %v3096_v20, %v3096_v20  ;;  %v832_v23 = vmul.f32 %v3102_v34, %v3102_v34 }
 0x137   :  { %v3357_v63 = vpop.f32.mrf.mxu1  ;;  %v939_v18 = vsel %vm644_vm1, %v823_v49, 0.0 }
 0x138   :  { %4957 = vst [vmem:[#allocation63_spill] sm:$0xff] %v3357_v63  ;;  %932 = vadd.xlane.f32.xlu2 %v931_v35  ;;  %701 = vadd.xlane.f32.xlu0 %v700_v30  ;;  %v945_v35 = vadd.f32 %v944_v25, %v827_v12  ;;  %v707_v37 = vadd.f32 %v706_v26, %v3357_v63 }
 0x139   :  { %v3361_v27 = vpop.f32.mrf.mxu0  ;;  %v940_v13 = vadd.f32 %v939_v18, %v938_v14  ;;  %v952_v49 = vadd.f32 %v832_v23, %v831_v17  ;;  %v721_v12 = vadd.f32 %v3116_v36, %v3112_v28  ;;  %v829_v40 = vmul.f32 %v3357_v63, %v3357_v63 }
 0x13a   :  { %4958 = vst [vmem:[#allocation64_spill] sm:$0xff] %v3361_v27  ;;  %v946_v18 = vadd.f32 %v945_v35, %v828_v16  ;;  %v739_v63 = vadd.f32 %v3148_v45, %v3144_v46 }
 0x13b   :  { %v3369_v43 = vpop.f32.mrf.mxu3  ;;  %v953_v23 = vadd.f32 %v952_v49, %v833_v6  ;;  %v722_v14 = vadd.f32 %v721_v12, %v3176_v9  ;;  %v835_v6 = vmul.f32 %v3246_v52, %v3246_v52  ;;  %v730_v49 = vadd.f32 %v3132_v41, %v3128_v39 }
 0x13c   :  { %4959 = vst [vmem:[#allocation65_spill] sm:$0xff] %v3369_v43  ;;  %v714_v30 = vadd.f32 %v713_v51, %v3369_v43  ;;  %v3373_v8 = vpop.f32.mrf.mxu2  ;;  %v834_v25 = vmul.f32 %v3369_v43, %v3369_v43  ;;  %v947_v43 = vadd.f32 %v946_v18, %v829_v40 }
 0x13d   :  { %4960 = vst [vmem:[#allocation66_spill] sm:$0xff] %v3373_v8  ;;  %v708_v56 = vsel %vm644_vm1, %v3373_v8, 0.0  ;;  %v830_v50 = vmul.f32 %v3373_v8, %v3373_v8 }
 0x13e   :  { %v709_v34 = vadd.f32 %v708_v56, %v707_v37  ;;  %v715_v17 = vadd.f32 %v714_v30, %v3246_v52  ;;  %v954_v48 = vadd.f32 %v953_v23, %v834_v25  ;;  %v639_v30 = vadd.f32 %v3084_v29, %v3020_v60 }
 0x13f   :  { %v3388_v26 = vpop.f32.mrf.mxu1  ;;  %v948_v56 = vsel %vm644_vm1, %v830_v50, 0.0  ;;  %v3424_v23 = vmul.f32 %v3034_v7, %v3034_v7 }
 0x140   :  { %4961 = vst [vmem:[#allocation67_spill] sm:$0xff] %v3388_v26  ;;  %941 = vadd.xlane.f32.xlu0 %v940_v13  ;;  %710 = vadd.xlane.f32.xlu1 %v709_v34  ;;  %v716_v34 = vadd.f32 %v715_v17, %v3388_v26  ;;  %v949_v16 = vadd.f32 %v948_v56, %v947_v43 }
 0x141   :  { %v3392_v51 = vpop.f32.mrf.mxu0  ;;  %v836_v50 = vmul.f32 %v3388_v26, %v3388_v26  ;;  %v955_v18 = vadd.f32 %v954_v48, %v835_v6  ;;  %v775_v43 = vmul.f32 %v3020_v60, %v3020_v60  ;;  %v784_v56 = vmul.f32 %v3050_v21, %v3050_v21 }
 0x142   :  { %4962 = vst [vmem:[#allocation68_spill] sm:$0xff] %v3392_v51  ;;  %v845_v48 = vmul.f32 %v3128_v39, %v3128_v39  ;;  %v846_v6 = vmul.f32 %v3132_v41, %v3132_v41  ;;  %v3448_v26 = vmul.f32 %v3052_v22, %v3052_v22  ;;  %v838_v41 = vmul.f32 %v3112_v28, %v3112_v28 }
 0x143   :  { %v3396_v37 = vpop.f32.mrf.mxu3  ;;  %v839_v39 = vmul.f32 %v3116_v36, %v3116_v36  ;;  %v840_v28 = vmul.f32 %v3176_v9, %v3176_v9 }
 0x144   :  { %4963 = vst [vmem:[#allocation69_spill] sm:$0xff] %v3396_v37  ;;  %v723_v20 = vadd.f32 %v722_v14, %v3396_v37  ;;  %v3400_v8 = vpop.f32.mrf.mxu2  ;;  %v782_v14 = vmul.f32 %v3036_v15, %v3036_v15  ;;  %v970_v52 = vadd.f32 %v846_v6, %v845_v48  ;;  %v853_v48 = vmul.f32 %v3148_v45, %v3148_v45 }
 0x145   :  { %4964 = vst [vmem:[#allocation70_spill] sm:$0xff] %v3400_v8  ;;  %v717_v35 = vsel %vm644_vm1, %v3400_v8, 0.0  ;;  %v837_v12 = vmul.f32 %v3400_v8, %v3400_v8  ;;  %v841_v6 = vmul.f32 %v3396_v37, %v3396_v37 }
 0x146   :  { %v718_v13 = vadd.f32 %v717_v35, %v716_v34  ;;  %v724_v17 = vadd.f32 %v723_v20, %v3271_v57  ;;  %v731_v34 = vadd.f32 %v730_v49, %v3188_v58  ;;  %v640_v35 = vadd.f32 %v639_v30, %v3034_v7 }
 0x147   :  { %v3413_v40 = vpop.f32.mrf.mxu1  ;;  %v783_v20 = vmul.f32 %v3100_v33, %v3100_v33  ;;  %v956_v30 = vadd.f32 %v955_v18, %v836_v50  ;;  %v847_v50 = vmul.f32 %v3188_v58, %v3188_v58 }
 0x148   :  { %4965 = vst [vmem:[#allocation71_spill] sm:$0xff] %v3413_v40  ;;  %950 = vadd.xlane.f32.xlu1 %v949_v16  ;;  %719 = vadd.xlane.f32.xlu2 %v718_v13  ;;  %v957_v13 = vsel %vm644_vm1, %v837_v12, 0.0  ;;  %v641_v60 = vadd.f32 %v640_v35, %v3194_v0  ;;  %v725_v7 = vadd.f32 %v724_v17, %v3413_v40 }
 0x149   :  { %v3417_v25 = vpop.f32.mrf.mxu0  ;;  %v958_v18 = vadd.f32 %v957_v13, %v956_v30  ;;  %v889_v35 = vadd.f32 %v783_v20, %v782_v14  ;;  %v961_v14 = vadd.f32 %v839_v39, %v838_v41  ;;  %v852_v20 = vmul.f32 %v3144_v46, %v3144_v46 }
 0x14a   :  { %4966 = vst [vmem:[#allocation72_spill] sm:$0xff] %v3417_v25  ;;  %v3480_v30 = vmul.f32 %v3066_v24, %v3066_v24 }
 0x14b   :  { %v3438_v16 = vpop.f32.mrf.mxu3  ;;  %v962_v39 = vadd.f32 %v961_v14, %v840_v28  ;;  %v890_v41 = vadd.f32 %v889_v35, %v784_v56 }
 0x14c   :  { %v732_v8 = vadd.f32 %v731_v34, %v3438_v16  ;;  %v3443_v49 = vpop.f32.mrf.mxu2  ;;  %v776_v34 = vmul.f32 %v3084_v29, %v3084_v29  ;;  %v848_v19 = vmul.f32 %v3438_v16, %v3438_v16 }
 0x14d   :  { %4967 = vst [vmem:[#allocation73_spill] sm:$0xff] %v3443_v49  ;;  %v726_v12 = vsel %vm644_vm1, %v3443_v49, 0.0  ;;  %v963_v28 = vadd.f32 %v962_v39, %v841_v6  ;;  %v778_v39 = vmul.f32 %v3194_v0, %v3194_v0 }
 0x14e   :  { %v727_v17 = vadd.f32 %v726_v12, %v725_v7  ;;  %v733_v13 = vadd.f32 %v732_v8, %v3300_v31  ;;  %v642_v7 = vadd.f32 %v641_v60, %v3134_v42  ;;  %v880_v12 = vadd.f32 %v776_v34, %v775_v43 }
 0x14f   :  { %v3464_v36 = vpop.f32.mrf.mxu1  ;;  %v740_v8 = vadd.f32 %v739_v63, %v3196_v1  ;;  %v790_v60 = vmul.f32 %v3118_v38, %v3118_v38  ;;  %v979_v63 = vadd.f32 %v853_v48, %v852_v20  ;;  %v854_v34 = vmul.f32 %v3196_v1, %v3196_v1 }
 0x150   :  { %959 = vadd.xlane.f32.xlu2 %v958_v18  ;;  %728 = vadd.xlane.f32.xlu0 %v727_v17  ;;  %v971_v18 = vadd.f32 %v970_v52, %v847_v50  ;;  %v734_v43 = vadd.f32 %v733_v13, %v3464_v36  ;;  %v643_v52 = vadd.f32 %v642_v7, %v3198_v2 }
 0x151   :  { %v3468_v29 = vpop.f32.mrf.mxu0  ;;  %v785_v50 = vmul.f32 %v3202_v5, %v3202_v5  ;;  %v842_v13 = vmul.f32 %v3271_v57, %v3271_v57  ;;  %v844_v7 = vmul.f32 %v3443_v49, %v3443_v49  ;;  %v850_v20 = vmul.f32 %v3464_v36, %v3464_v36 }
 0x152   :  { %v645_v45 = vsel %vm644_vm1, %v3468_v29, 0.0  ;;  %v972_v46 = vadd.f32 %v971_v18, %v848_v19  ;;  %v849_v19 = vmul.f32 %v3300_v31, %v3300_v31  ;;  %v649_v1 = vadd.f32 %v3100_v33, %v3036_v15 }
 0x153   :  { %v3485_v17 = vpop.f32.mrf.mxu3  ;;  %v646_v14 = vadd.f32 %v645_v45, %v643_v52  ;;  %v843_v52 = vmul.f32 %v3413_v40, %v3413_v40  ;;  %v856_v49 = vmul.f32 %v3330_v54, %v3330_v54 }
 0x154   :  { %4968 = vst [vmem:[#allocation74_spill] sm:$0xff] %v3485_v17  ;;  %v741_v37 = vadd.f32 %v740_v8, %v3485_v17  ;;  %v3490_v9 = vpop.f32.mrf.mxu2  ;;  %v855_v18 = vmul.f32 %v3485_v17, %v3485_v17  ;;  %v973_v45 = vadd.f32 %v972_v46, %v849_v19  ;;  %v658_v17 = vadd.f32 %v3118_v38, %v3052_v22 }
 0x155   :  { %v735_v56 = vsel %vm644_vm1, %v3490_v9, 0.0  ;;  %v851_v48 = vmul.f32 %v3490_v9, %v3490_v9  ;;  %v779_v19 = vmul.f32 %v3134_v42, %v3134_v42 }
 0x156   :  { %v736_v35 = vadd.f32 %v735_v56, %v734_v43  ;;  %v742_v8 = vadd.f32 %v741_v37, %v3330_v54  ;;  %v881_v43 = vadd.f32 %v880_v12, %v3424_v23  ;;  %v964_v56 = vadd.f32 %v963_v28, %v842_v13 }
 0x157   :  { %v3510_v6 = vpop.f32.mrf.mxu1  ;;  %v898_v37 = vadd.f32 %v790_v60, %v3448_v26  ;;  %v786_v23 = vmul.f32 %v3150_v47, %v3150_v47  ;;  %v975_v28 = vsel %vm644_vm1, %v851_v48, 0.0  ;;  %v974_v15 = vadd.f32 %v973_v45, %v850_v20 }
 0x158   :  { %4969 = vst [vmem:[#allocation75_spill] sm:$0xff] %v3510_v6  ;;  %737 = vadd.xlane.f32.xlu1 %v736_v35  ;;  %647 = vadd.xlane.f32.xlu0 %v646_v14  ;;  %v980_v35 = vadd.f32 %v979_v63, %v854_v34  ;;  %v891_v14 = vadd.f32 %v890_v41, %v785_v50  ;;  %v966_v63 = vsel %vm644_vm1, %v844_v7, 0.0 }
 0x159   :  { %v3524_v46 = vpop.f32.mrf.mxu0  ;;  %v743_v41 = vadd.f32 %v742_v8, %v3510_v6  ;;  %v882_v34 = vadd.f32 %v881_v43, %v778_v39  ;;  %v787_v26 = vmul.f32 %v3206_v59, %v3206_v59  ;;  %v965_v50 = vadd.f32 %v964_v56, %v843_v52 }
 0x15a   :  { %4970 = vst [vmem:[#allocation76_spill] sm:$0xff] %v3524_v46  ;;  %v981_v13 = vadd.f32 %v980_v35, %v855_v18  ;;  %v976_v48 = vadd.f32 %v975_v28, %v974_v15  ;;  %v892_v35 = vadd.f32 %v891_v14, %v786_v23  ;;  %v792_v20 = vmul.f32 %v3210_v11, %v3210_v11 }
 0x15b   :  { %v3531_v12 = vpop.f32.mrf.mxu3  ;;  %v788_v7 = vmul.f32 %v3524_v46, %v3524_v46  ;;  %v967_v39 = vadd.f32 %v966_v63, %v965_v50  ;;  %v781_v43 = vmul.f32 %v3468_v29, %v3468_v29  ;;  %v857_v15 = vmul.f32 %v3510_v6, %v3510_v6 }
 0x15c   :  { %4971 = vst [vmem:[#allocation77_spill] sm:$0xff] %v3531_v12  ;;  %v3534_v33 = vpop.f32.mrf.mxu2  ;;  %v982_v52 = vadd.f32 %v981_v13, %v856_v49  ;;  %v780_v56 = vmul.f32 %v3198_v2, %v3198_v2  ;;  %v659_v14 = vadd.f32 %v658_v17, %v3066_v24  ;;  %v883_v23 = vadd.f32 %v882_v34, %v779_v19 }
 0x15d   :  { %4972 = vst [vmem:[#allocation78_spill] sm:$0xff] %v3534_v33  ;;  %v744_v60 = vsel %vm644_vm1, %v3534_v33, 0.0  ;;  %v858_v45 = vmul.f32 %v3534_v33, %v3534_v33  ;;  %v899_v28 = vadd.f32 %v898_v37, %v3480_v30  ;;  %v885_v19 = vsel %vm644_vm1, %v781_v43, 0.0  ;;  %v4980_v43 = vld [vmem:[#allocation37_spill] sm:$0xff] }
 0x15e   :  { %v745_v18 = vadd.f32 %v744_v60, %v743_v41  ;;  %v650_v41 = vadd.f32 %v649_v1, %v3050_v21  ;;  %v660_v63 = vadd.f32 %v659_v14, %v3210_v11  ;;  %v983_v17 = vadd.f32 %v982_v52, %v857_v15  ;;  %v4978_v14 = vld [vmem:[#allocation36_spill] sm:$0xff] }
 0x15f   :  { %v3550_v8 = vpop.f32.mrf.mxu1  ;;  %v984_v50 = vsel %vm644_vm1, %v858_v45, 0.0  ;;  %v900_v49 = vadd.f32 %v899_v28, %v792_v20  ;;  %v893_v34 = vadd.f32 %v892_v35, %v787_v26  ;;  %v884_v1 = vadd.f32 %v883_v23, %v780_v56  ;;  %v4977_v20 = vld [vmem:[#allocation34_spill] sm:$0xff] }
 0x160   :  { %4973 = vst [vmem:[#allocation79_spill] sm:$0xff] %v3550_v8  ;;  %977 = vadd.xlane.f32.xlu1 %v976_v48  ;;  %746 = vadd.xlane.f32.xlu2 %v745_v18  ;;  %v894_v48 = vsel %vm644_vm1, %v788_v7, 0.0  ;;  %v651_v30 = vadd.f32 %v650_v41, %v3202_v5  ;;  %v859_v37 = vmul.f32 %v3160_v61, %v3160_v61  ;;  %v4981_v56 = vld [vmem:[#allocation38_spill] sm:$0xff]  ;;  %v4982_v41 = vld [vmem:[#allocation47_spill] sm:$0xff] }
 0x161   :  { %968 = vadd.xlane.f32.xlu0 %v967_v39  ;;  %v3566_v13 = vpop.f32.mrf.mxu0  ;;  %v793_v45 = vmul.f32 %v3166_v53, %v3166_v53  ;;  %v985_v39 = vadd.f32 %v984_v50, %v983_v17  ;;  %v895_v7 = vadd.f32 %v894_v48, %v893_v34  ;;  %v757_v28 = vadd.f32 %v4978_v14, %v4977_v20  ;;  %v4983_v48 = vld [vmem:[#allocation32_spill] sm:$0xff] }
 0x162   :  { %4975 = vst [vmem:[#allocation81_spill] sm:$0xff] %v3566_v13  ;;  %v795_v15 = vmul.f32 %v3566_v13, %v3566_v13  ;;  %v886_v26 = vadd.f32 %v885_v19, %v884_v1  ;;  %v661_v35 = vadd.f32 %v660_v63, %v3166_v53  ;;  %v766_v23 = vadd.f32 %v4981_v56, %v4980_v43 }
 0x163   :  { %v3562_v60 = vpop.f32.mrf.mxu3  ;;  %v794_v5 = vmul.f32 %v4982_v41, %v4982_v41  ;;  %v901_v50 = vadd.f32 %v900_v49, %v793_v45  ;;  %v748_v17 = vadd.f32 %v4983_v48, %v3160_v61  ;;  %v866_v34 = vmul.f32 %v4977_v20, %v4977_v20  ;;  %v4985_v45 = vld [vmem:[#allocation50_spill] sm:$0xff] }
 0x164   :  { %4974 = vst [vmem:[#allocation80_spill] sm:$0xff] %v3562_v60  ;;  %v3568_v18 = vpop.f32.mrf.mxu2  ;;  %v867_v19 = vmul.f32 %v4978_v14, %v4978_v14  ;;  %v652_v63 = vadd.f32 %v651_v30, %v3150_v47  ;;  %v873_v1 = vmul.f32 %v4980_v43, %v4980_v43  ;;  %v767_v21 = vadd.f32 %v766_v23, %v4985_v45  ;;  %v4986_v61 = vld [vmem:[#allocation42_spill] sm:$0xff] }
 0x165   :  { %4976 = vst [vmem:[#allocation82_spill] sm:$0xff] %v3568_v18  ;;  %v749_v33 = vadd.f32 %v748_v17, %v4986_v61  ;;  %v663_v20 = vsel %vm644_vm1, %v3566_v13, 0.0  ;;  %v662_v30 = vadd.f32 %v661_v35, %v4982_v41  ;;  %v902_v23 = vadd.f32 %v901_v50, %v794_v5 }
 0x166   :  { %v860_v17 = vmul.f32 %v4983_v48, %v4983_v48  ;;  %v997_v14 = vadd.f32 %v867_v19, %v866_v34  ;;  %v861_v5 = vmul.f32 %v4986_v61, %v4986_v61  ;;  %v869_v50 = vmul.f32 %v3562_v60, %v3562_v60 }
 0x167   :  { %v3580_v52 = vpop.f32.mrf.mxu1  ;;  %v750_v54 = vadd.f32 %v749_v33, %v3531_v12  ;;  %v664_v40 = vadd.f32 %v663_v20, %v662_v30  ;;  %v862_v20 = vmul.f32 %v3531_v12, %v3531_v12 }
 0x168   :  { %4979 = vst [vmem:[#allocation83_spill] sm:$0xff] %v3580_v52  ;;  %986 = vadd.xlane.f32.xlu2 %v985_v39  ;;  %896 = vadd.xlane.f32.xlu1 %v895_v7  ;;  %v874_v39 = vmul.f32 %v4981_v56, %v4981_v56  ;;  %v4984_v7 = vld [vmem:[#allocation46_spill] sm:$0xff]  ;;  %v988_v48 = vadd.f32 %v860_v17, %v859_v37 }
 0x169   :  { %887 = vadd.xlane.f32.xlu0 %v886_v26  ;;  %v758_v49 = vadd.f32 %v757_v28, %v4984_v7  ;;  %v903_v26 = vsel %vm644_vm1, %v795_v15, 0.0  ;;  %v654_v28 = vsel %vm644_vm1, %v3524_v46, 0.0  ;;  %v653_v15 = vadd.f32 %v652_v63, %v3206_v59 }
 0x16a   :  { %v868_v35 = vmul.f32 %v4984_v7, %v4984_v7  ;;  %v1006_v57 = vadd.f32 %v874_v39, %v873_v1  ;;  %v751_v39 = vadd.f32 %v750_v54, %v3361_v27 }
 0x16b   :  { %v3603_v6 = vpop.f32.mrf.mxu3  ;;  %v759_v47 = vadd.f32 %v758_v49, %v3562_v60  ;;  %v904_v49 = vadd.f32 %v903_v26, %v902_v23  ;;  %v655_v34 = vadd.f32 %v654_v28, %v653_v15  ;;  %v989_v28 = vadd.f32 %v988_v48, %v861_v5 }
 0x16c   :  { %4987 = vst [vmem:[#allocation84_spill] sm:$0xff] %v3603_v6  ;;  %v768_v43 = vadd.f32 %v767_v21, %v3603_v6  ;;  %v3609_v56 = vpop.f32.mrf.mxu2  ;;  %v875_v21 = vmul.f32 %v4985_v45, %v4985_v45  ;;  %v876_v33 = vmul.f32 %v3603_v6, %v3603_v6  ;;  %v998_v26 = vadd.f32 %v997_v14, %v868_v35 }
 0x16d   :  { %4988 = vst [vmem:[#allocation85_spill] sm:$0xff] %v3609_v56  ;;  %v760_v63 = vadd.f32 %v759_v47, %v3392_v51  ;;  %v863_v23 = vmul.f32 %v3361_v27, %v3361_v27  ;;  %v762_v47 = vsel %vm644_vm1, %v3609_v56, 0.0  ;;  %v990_v14 = vadd.f32 %v989_v28, %v862_v20 }
 0x16e   :  { %v769_v19 = vadd.f32 %v768_v43, %v3417_v25  ;;  %v1007_v30 = vadd.f32 %v1006_v57, %v875_v21  ;;  %v999_v37 = vadd.f32 %v998_v26, %v869_v50  ;;  %v870_v57 = vmul.f32 %v3392_v51, %v3392_v51 }
 0x16f   :  { %v3631_v1 = vpop.f32.mrf.mxu1  ;;  %v761_v54 = vadd.f32 %v760_v63, %v3580_v52  ;;  %v752_v35 = vadd.f32 %v751_v39, %v3550_v8  ;;  %v877_v21 = vmul.f32 %v3417_v25, %v3417_v25  ;;  %v991_v28 = vadd.f32 %v990_v14, %v863_v23 }
 0x170   :  { %905 = vadd.xlane.f32.xlu2 %v904_v49  ;;  %665 = vadd.xlane.f32.xlu1 %v664_v40  ;;  %4989 = vst [vmem:[#allocation86_spill] sm:$0xff] %v3631_v1  ;;  %v753_v40 = vsel %vm644_vm1, %v3568_v18, 0.0  ;;  %v1008_v43 = vadd.f32 %v1007_v30, %v876_v33  ;;  %v770_v17 = vadd.f32 %v769_v19, %v3631_v1 }
 0x171   :  { %656 = vadd.xlane.f32.xlu0 %v655_v34  ;;  %v865_v49 = vmul.f32 %v3568_v18, %v3568_v18  ;;  %v763_v50 = vadd.f32 %v762_v47, %v761_v54  ;;  %v871_v34 = vmul.f32 %v3580_v52, %v3580_v52  ;;  %v872_v33 = vmul.f32 %v3609_v56, %v3609_v56 }
 0x172   :  { %v754_v63 = vadd.f32 %v753_v40, %v752_v35  ;;  %v878_v20 = vmul.f32 %v3631_v1, %v3631_v1  ;;  %v1009_v39 = vadd.f32 %v1008_v43, %v877_v21  ;;  %v1000_v26 = vadd.f32 %v999_v37, %v870_v57 }
 0x173   :  { %v864_v30 = vmul.f32 %v3550_v8, %v3550_v8  ;;  %v993_v54 = vsel %vm644_vm1, %v865_v49, 0.0  ;;  %v2349_v37 = vmov 0  }
 0x174   :  { %v3641_v15 = vpop.f32.mrf.mxu2  ;;  %v1001_v40 = vadd.f32 %v1000_v26, %v871_v34  ;;  %2312 = vset.pattern.permute.xlu2 %v2349_v37  ;;  %2313 = vset.pattern.permute.xlu1 %v2349_v37 }
 0x175   :  { %4990 = vst [vmem:[#allocation87_spill] sm:$0xff] %v3641_v15  ;;  %v771_v48 = vsel %vm644_vm1, %v3641_v15, 0.0  ;;  %v879_v19 = vmul.f32 %v3641_v15, %v3641_v15  ;;  %v992_v35 = vadd.f32 %v991_v28, %v864_v30  ;;  %2314 = vset.pattern.permute.xlu0 %v2349_v37 }
 0x176   :  { %v772_v5 = vadd.f32 %v771_v48, %v770_v17  ;;  %v1002_v17 = vsel %vm644_vm1, %v872_v33, 0.0  ;;  %v1010_v48 = vadd.f32 %v1009_v39, %v878_v20 }
 0x177   :  { %v1011_v47 = vsel %vm644_vm1, %v879_v19, 0.0  ;;  %v1003_v27 = vadd.f32 %v1002_v17, %v1001_v40 }
 0x178   :  { %773 = vadd.xlane.f32.xlu2 %v772_v5  ;;  %764 = vadd.xlane.f32.xlu1 %v763_v50  ;;  %v1012_v18 = vadd.f32 %v1011_v47, %v1010_v48  ;;  %v994_v5 = vadd.f32 %v993_v54, %v992_v35 }
 0x179   :  { %755 = vadd.xlane.f32.xlu0 %v754_v63 }
 0x180   :  { %1013 = vadd.xlane.f32.xlu2 %v1012_v18  ;;  %1004 = vadd.xlane.f32.xlu1 %v1003_v27 }
 0x181   :  { %995 = vadd.xlane.f32.xlu0 %v994_v5 }
 0x193   :  { %v675_v43 = vpop.xlane.xlu1 %674 }
 0x194   :  { %v1018_v23 = vmul.f32 0.0012755102, %v675_v43 }
 0x195   :  { %v915_v57 = vpop.xlane.xlu0 %914 }
 0x196   :  { %v1048_v14 = vmul.f32 %v1018_v23, %v1018_v23  ;;  %v1033_v21 = vmul.f32 0.0012755102, %v915_v57 }
 0x198   :  { %v1063_v50 = vsub.f32 %v1033_v21, %v1048_v14  ;;  %v3673_v21 = vld [vmem:[%s4797_s3 + $0x18] sm:$0xff] }
 0x19a   :  { %v1078_v49 = vmax.f32 %v1063_v50, 0.0 }
 0x19b   :  { %v684_v33 = vpop.xlane.xlu2 %683 }
 0x19c   :  { %v1108_v34 = vadd.f32 1e-05, %v1078_v49  ;;  %v1019_v19 = vmul.f32 0.0012755102, %v684_v33 }
 0x19d   :  { %v924_v63 = vpop.xlane.xlu1 %923 }
 0x19e   :  { %2319 = vrsqrt.f32 %v1108_v34  ;;  %v1049_v20 = vmul.f32 %v1019_v19, %v1019_v19  ;;  %v1034_v18 = vmul.f32 0.0012755102, %v924_v63  ;;  %vm1156_vm3 = vweird.f32 %v1108_v34 }
 0x1a0   :  { %v1064_v27 = vsub.f32 %v1034_v18, %v1049_v20 }
 0x1a2   :  { %v1079_v39 = vmax.f32 %v1064_v27, 0.0 }
 0x1a3   :  { %v693_v26 = vpop.xlane.xlu2 %692 }
 0x1a4   :  { %v2320_v30 = vpop.eup %2319  ;;  %v1109_v28 = vadd.f32 1e-05, %v1079_v39  ;;  %v3666_v54 = vmul.f32 0.0012755102, %v693_v26 }
 0x1a5   :  { %v1151_v47 = vmul.f32 %v2320_v30, %v1108_v34  ;;  %vm1157_vm2 = vweird.f32 %v2320_v30 }
 0x1a6   :  { %2321 = vrsqrt.f32 %v1109_v28  ;;  %v1050_v43 = vmul.f32 %v3666_v54, %v3666_v54  ;;  %vm1158_vm4 = vmor %vm1156_vm3, %vm1157_vm2  ;;  %vm1166_vm6 = vweird.f32 %v1109_v28 }
 0x1a7   :  { %v1152_v17 = vmul.f32 %v2320_v30, %v1151_v47 }
 0x1a9   :  { %v1153_v48 = vmul.f32 0.5, %v1152_v17 }
 0x1ab   :  { %v1154_v40 = vsub.f32 1.5, %v1153_v48  ;;  %v933_v35 = vpop.xlane.xlu2 %932  ;;  %v702_v5 = vpop.xlane.xlu0 %701 }
 0x1ac   :  { %v2322_v37 = vpop.eup %2321  ;;  %v1035_v57 = vmul.f32 0.0012755102, %v933_v35  ;;  %v3675_v18 = vmul.f32 0.0012755102, %v702_v5 }
 0x1ad   :  { %v1161_v14 = vmul.f32 %v2322_v37, %v1109_v28  ;;  %v1155_v50 = vmul.f32 %v2320_v30, %v1154_v40  ;;  %vm1167_vm5 = vweird.f32 %v2322_v37 }
 0x1ae   :  { %v1065_v49 = vsub.f32 %v1035_v57, %v1050_v43  ;;  %v1051_v40 = vmul.f32 %v3675_v18, %v3675_v18  ;;  %vm1168_vm7 = vmor %vm1166_vm6, %vm1167_vm5 }
 0x1af   :  { %v1162_v33 = vmul.f32 %v2322_v37, %v1161_v14  ;;  %v1159_v63 = vsel %vm1158_vm4, %v2320_v30, %v1155_v50  ;;  %v3684_v30 = vld [vmem:[%s4797_s3 + $0x20] sm:$0xff] }
 0x1b0   :  { %v1080_v20 = vmax.f32 %v1065_v49, 0.0  ;;  %v1273_v27 = vmul.f32 %v1159_v63, %v3673_v21 }
 0x1b1   :  { %v1163_v39 = vmul.f32 0.5, %v1162_v33 }
 0x1b2   :  { %v1110_v26 = vadd.f32 1e-05, %v1080_v20  ;;  %1497 = vperm.xlu2 %2312, %v1273_v27   ;;  %v1288_v34 = vmul.f32 %v1273_v27, %v1018_v23 }
 0x1b3   :  { %v1164_v47 = vsub.f32 1.5, %v1163_v39  ;;  %v942_v17 = vpop.xlane.xlu0 %941  ;;  %v711_v48 = vpop.xlane.xlu1 %710 }
 0x1b4   :  { %2323 = vrsqrt.f32 %v1110_v26  ;;  %v1036_v35 = vmul.f32 0.0012755102, %v942_v17  ;;  %1321 = vrot.lane.b32.xlu0 %v1288_v34, %s2350_s28  ;;  %v3686_v14 = vmul.f32 0.0012755102, %v711_v48  ;;  %vm1176_vm9 = vweird.f32 %v1110_v26 }
 0x1b5   :  { %v1165_v5 = vmul.f32 %v2322_v37, %v1164_v47 }
 0x1b6   :  { %v1066_v23 = vsub.f32 %v1036_v35, %v1051_v40  ;;  %v1052_v39 = vmul.f32 %v3686_v14, %v3686_v14 }
 0x1b7   :  { %v1169_v43 = vsel %vm1168_vm7, %v2322_v37, %v1165_v5 }
 0x1b8   :  { %v1081_v57 = vmax.f32 %v1066_v23, 0.0  ;;  %v1274_v50 = vmul.f32 %v1169_v43, %v3684_v30 }
 0x1ba   :  { %v2324_v49 = vpop.eup %2323  ;;  %v1111_v33 = vadd.f32 1e-05, %v1081_v57  ;;  %1502 = vperm.xlu1 %2313, %v1274_v50   ;;  %v1289_v63 = vmul.f32 %v1274_v50, %v1019_v19  ;;  %v3697_v50 = vld [vmem:[%s4797_s3 + $0x28] sm:$0xff] }
 0x1bb   :  { %v1171_v20 = vmul.f32 %v2324_v49, %v1110_v26  ;;  %v951_v28 = vpop.xlane.xlu1 %950  ;;  %v720_v27 = vpop.xlane.xlu2 %719  ;;  %vm1177_vm8 = vweird.f32 %v2324_v49 }
 0x1bc   :  { %2325 = vrsqrt.f32 %v1111_v33  ;;  %v1037_v34 = vmul.f32 0.0012755102, %v951_v28  ;;  %1323 = vrot.lane.b32.xlu2 %v1289_v63, %s2350_s28  ;;  %v3692_v40 = vmul.f32 0.0012755102, %v720_v27  ;;  %vm1178_vm10 = vmor %vm1176_vm9, %vm1177_vm8  ;;  %vm1186_vm12 = vweird.f32 %v1111_v33 }
 0x1bd   :  { %v1172_v37 = vmul.f32 %v2324_v49, %v1171_v20 }
 0x1be   :  { %v1067_v47 = vsub.f32 %v1037_v34, %v1052_v39  ;;  %v1053_v20 = vmul.f32 %v3692_v40, %v3692_v40 }
 0x1bf   :  { %v1173_v17 = vmul.f32 0.5, %v1172_v37 }
 0x1c0   :  { %v1082_v48 = vmax.f32 %v1067_v47, 0.0 }
 0x1c1   :  { %v1174_v35 = vsub.f32 1.5, %v1173_v17 }
 0x1c2   :  { %v2326_v5 = vpop.eup %2325  ;;  %v1112_v19 = vadd.f32 1e-05, %v1082_v48 }
 0x1c3   :  { %v1181_v23 = vmul.f32 %v2326_v5, %v1111_v33  ;;  %v960_v43 = vpop.xlane.xlu2 %959  ;;  %v729_v57 = vpop.xlane.xlu0 %728  ;;  %v1175_v63 = vmul.f32 %v2324_v49, %v1174_v35  ;;  %vm1187_vm11 = vweird.f32 %v2326_v5 }
 0x1c4   :  { %2327 = vrsqrt.f32 %v1112_v19  ;;  %v1038_v28 = vmul.f32 0.0012755102, %v960_v43  ;;  %vm1188_vm13 = vmor %vm1186_vm12, %vm1187_vm11  ;;  %vm1196_vm15 = vweird.f32 %v1112_v19 }
 0x1c5   :  { %v1182_v27 = vmul.f32 %v2326_v5, %v1181_v23  ;;  %v1179_v39 = vsel %vm1178_vm10, %v2324_v49, %v1175_v63  ;;  %v3707_v49 = vld [vmem:[%s4797_s3 + $0x30] sm:$0xff] }
 0x1c6   :  { %v1068_v34 = vsub.f32 %v1038_v28, %v1053_v20  ;;  %v1275_v26 = vmul.f32 %v1179_v39, %v3697_v50 }
 0x1c7   :  { %v1183_v37 = vmul.f32 0.5, %v1182_v27 }
 0x1c8   :  { %v1083_v47 = vmax.f32 %v1068_v34, 0.0  ;;  %1507 = vperm.xlu0 %2314, %v1275_v26   ;;  %v1290_v17 = vmul.f32 %v1275_v26, %v3666_v54  ;;  %v3713_v34 = vmul.f32 0.0012755102, %v729_v57 }
 0x1c9   :  { %v1184_v48 = vsub.f32 1.5, %v1183_v37 }
 0x1ca   :  { %v2328_v8 = vpop.eup %2327  ;;  %v1113_v35 = vadd.f32 1e-05, %v1083_v47  ;;  %1325 = vrot.lane.b32.xlu1 %v1290_v17, %s2350_s28 }
 0x1cb   :  { %v1191_v12 = vmul.f32 %v2328_v8, %v1112_v19  ;;  %v738_v43 = vpop.xlane.xlu1 %737  ;;  %v648_v61 = vpop.xlane.xlu0 %647  ;;  %v1185_v23 = vmul.f32 %v2326_v5, %v1184_v48  ;;  %vm1197_vm14 = vweird.f32 %v2328_v8 }
 0x1cc   :  { %2329 = vrsqrt.f32 %v1113_v35  ;;  %v3710_v27 = vmul.f32 0.0012755102, %v738_v43  ;;  %vm1198_vm0 = vmor %vm1196_vm15, %vm1197_vm14  ;;  %v3729_v15 = vmul.f32 0.0012755102, %v648_v61  ;;  %vm1206_vm3 = vweird.f32 %v1113_v35 }
 0x1cd   :  { %v1192_v63 = vmul.f32 %v2328_v8, %v1191_v12  ;;  %v1189_v54 = vsel %vm1188_vm13, %v2326_v5, %v1185_v23  ;;  %v3719_v5 = vld [vmem:[%s4797_s3 + $0x38] sm:$0xff]  ;;  %v1054_v23 = vmul.f32 %v3713_v34, %v3713_v34 }
 0x1ce   :  { %v1276_v20 = vmul.f32 %v1189_v54, %v3707_v49 }
 0x1cf   :  { %v1193_v28 = vmul.f32 0.5, %v1192_v63 }
 0x1d0   :  { %1512 = vperm.xlu2 %2312, %v1276_v20   ;;  %v1291_v33 = vmul.f32 %v1276_v20, %v3675_v18  ;;  %v1055_v18 = vmul.f32 %v3710_v27, %v3710_v27 }
 0x1d1   :  { %v1194_v39 = vsub.f32 1.5, %v1193_v28 }
 0x1d2   :  { %v2330_v26 = vpop.eup %2329  ;;  %1327 = vrot.lane.b32.xlu0 %v1291_v33, %s2350_s28 }
 0x1d3   :  { %v1201_v37 = vmul.f32 %v2330_v26, %v1113_v35  ;;  %v978_v47 = vpop.xlane.xlu1 %977  ;;  %v747_v12 = vpop.xlane.xlu2 %746  ;;  %v1195_v17 = vmul.f32 %v2328_v8, %v1194_v39  ;;  %vm1207_vm2 = vweird.f32 %v2330_v26  ;;  %v1045_v35 = vmul.f32 %v3729_v15, %v3729_v15 }
 0x1d4   :  { %v1040_v48 = vmul.f32 0.0012755102, %v978_v47  ;;  %v969_v57 = vpop.xlane.xlu0 %968  ;;  %v3726_v59 = vmul.f32 0.0012755102, %v747_v12  ;;  %v3739_v12 = vld [vmem:[%s4797_s3 + $0x40] sm:$0xff]  ;;  %vm1208_vm4 = vmor %vm1206_vm3, %vm1207_vm2 }
 0x1d5   :  { %v1202_v43 = vmul.f32 %v2330_v26, %v1201_v37  ;;  %v1039_v19 = vmul.f32 0.0012755102, %v969_v57  ;;  %v1199_v63 = vsel %vm1198_vm0, %v2328_v8, %v1195_v17 }
 0x1d6   :  { %v1070_v54 = vsub.f32 %v1040_v48, %v1055_v18  ;;  %v1277_v20 = vmul.f32 %v1199_v63, %v3719_v5  ;;  %v1056_v61 = vmul.f32 %v3726_v59, %v3726_v59 }
 0x1d7   :  { %v1203_v28 = vmul.f32 0.5, %v1202_v43  ;;  %v1069_v33 = vsub.f32 %v1039_v19, %v1054_v23 }
 0x1d8   :  { %v1085_v46 = vmax.f32 %v1070_v54, 0.0  ;;  %1517 = vperm.xlu1 %2313, %v1277_v20   ;;  %v1292_v39 = vmul.f32 %v1277_v20, %v3686_v14 }
 0x1d9   :  { %v1204_v47 = vsub.f32 1.5, %v1203_v28  ;;  %v1084_v37 = vmax.f32 %v1069_v33, 0.0 }
 0x1da   :  { %v3731_v1 = vadd.f32 1e-05, %v1085_v46  ;;  %1329 = vrot.lane.b32.xlu2 %v1292_v39, %s2350_s28 }
 0x1db   :  { %v3734_v8 = vadd.f32 1e-05, %v1084_v37  ;;  %v987_v17 = vpop.xlane.xlu2 %986  ;;  %v897_v18 = vpop.xlane.xlu1 %896  ;;  %v1205_v14 = vmul.f32 %v2330_v26, %v1204_v47 }
 0x1dc   :  { %2331 = vrsqrt.f32 %v3731_v1  ;;  %v1041_v46 = vmul.f32 0.0012755102, %v987_v17  ;;  %v888_v48 = vpop.xlane.xlu0 %887  ;;  %vm1226_vm7 = vweird.f32 %v3731_v1 }
 0x1dd   :  { %2333 = vrsqrt.f32 %v3734_v8  ;;  %v1030_v57 = vmul.f32 0.0012755102, %v888_v48  ;;  %v1209_v43 = vsel %vm1208_vm4, %v2330_v26, %v1205_v14  ;;  %vm1216_vm8 = vweird.f32 %v3734_v8 }
 0x1de   :  { %v1071_v23 = vsub.f32 %v1041_v46, %v1056_v61  ;;  %v1278_v19 = vmul.f32 %v1209_v43, %v3739_v12 }
 0x1df   :  { %v1060_v63 = vsub.f32 %v1030_v57, %v1045_v35 }
 0x1e0   :  { %v1086_v54 = vmax.f32 %v1071_v23, 0.0  ;;  %1522 = vperm.xlu0 %2314, %v1278_v19   ;;  %v1293_v20 = vmul.f32 %v1278_v19, %v3692_v40  ;;  %v1031_v23 = vmul.f32 0.0012755102, %v897_v18 }
 0x1e1   :  { %v1075_v28 = vmax.f32 %v1060_v63, 0.0 }
 0x1e2   :  { %v2332_v33 = vpop.eup %2331  ;;  %v3749_v39 = vadd.f32 1e-05, %v1086_v54  ;;  %1331 = vrot.lane.b32.xlu1 %v1293_v20, %s2350_s28 }
 0x1e3   :  { %v2334_v47 = vpop.eup %2333  ;;  %v1221_v37 = vmul.f32 %v2332_v33, %v3731_v1  ;;  %v3753_v17 = vadd.f32 1e-05, %v1075_v28  ;;  %v906_v26 = vpop.xlane.xlu2 %905  ;;  %vm1227_vm6 = vweird.f32 %v2332_v33  ;;  %v3794_v1 = vld [vmem:[%s4797_s3 + $0x50] sm:$0xff] }
 0x1e4   :  { %v666_v14 = vpop.xlane.xlu1 %665  ;;  %v1211_v61 = vmul.f32 %v2334_v47, %v3734_v8  ;;  %v657_v46 = vpop.xlane.xlu0 %656  ;;  %v1032_v54 = vmul.f32 0.0012755102, %v906_v26  ;;  %vm1217_vm5 = vweird.f32 %v2334_v47  ;;  %vm1228_vm10 = vmor %vm1226_vm7, %vm1227_vm6  ;;  %vm1236_vm6 = vweird.f32 %v3749_v39 }
 0x1e5   :  { %v1222_v48 = vmul.f32 %v2332_v33, %v1221_v37  ;;  %2335 = vrsqrt.f32 %v3753_v17  ;;  %v3757_v40 = vmul.f32 0.0012755102, %v657_v46  ;;  %v3760_v57 = vmul.f32 0.0012755102, %v666_v14  ;;  %vm1218_vm9 = vmor %vm1216_vm8, %vm1217_vm5 }
 0x1e6   :  { %v1212_v35 = vmul.f32 %v2334_v47, %v1211_v61  ;;  %2337 = vrsqrt.f32 %v3749_v39  ;;  %vm1126_vm12 = vweird.f32 %v3753_v17 }
 0x1e7   :  { %v1223_v43 = vmul.f32 0.5, %v1222_v48  ;;  %v1046_v19 = vmul.f32 %v3757_v40, %v3757_v40  ;;  %v1047_v20 = vmul.f32 %v3760_v57, %v3760_v57 }
 0x1e8   :  { %v1213_v63 = vmul.f32 0.5, %v1212_v35 }
 0x1e9   :  { %v1224_v28 = vsub.f32 1.5, %v1223_v43  ;;  %v1061_v37 = vsub.f32 %v1031_v23, %v1046_v19  ;;  %v1062_v46 = vsub.f32 %v1032_v54, %v1047_v20 }
 0x1ea   :  { %v1214_v25 = vsub.f32 1.5, %v1213_v63  ;;  %v3782_v63 = vld [vmem:[%s4797_s3 + $0x48] sm:$0xff] }
 0x1eb   :  { %v3766_v6 = vpop.eup %2335  ;;  %v1076_v61 = vmax.f32 %v1061_v37, 0.0  ;;  %v774_v45 = vpop.xlane.xlu2 %773  ;;  %v1077_v48 = vmax.f32 %v1062_v46, 0.0  ;;  %v1225_v43 = vmul.f32 %v2332_v33, %v1224_v28 }
 0x1ec   :  { %v765_v14 = vpop.xlane.xlu1 %764  ;;  %v3768_v56 = vpop.eup %2337  ;;  %v1121_v18 = vmul.f32 %v3766_v6, %v3753_v17  ;;  %v1215_v52 = vmul.f32 %v2334_v47, %v1214_v25  ;;  %v3787_v25 = vmul.f32 0.0012755102, %v774_v45  ;;  %vm1127_vm11 = vweird.f32 %v3766_v6 }
 0x1ed   :  { %v756_v35 = vpop.xlane.xlu0 %755  ;;  %v3772_v26 = vadd.f32 1e-05, %v1076_v61  ;;  %v3777_v19 = vadd.f32 1e-05, %v1077_v48  ;;  %v1231_v54 = vmul.f32 %v3768_v56, %v3749_v39  ;;  %v3789_v20 = vmul.f32 0.0012755102, %v765_v14  ;;  %vm1128_vm13 = vmor %vm1126_vm12, %vm1127_vm11 }
 0x1ee   :  { %v1122_v23 = vmul.f32 %v3766_v6, %v1121_v18  ;;  %v1219_v28 = vsel %vm1218_vm9, %v2334_v47, %v1215_v52  ;;  %v3798_v37 = vmul.f32 0.0012755102, %v756_v35  ;;  %v1229_v45 = vsel %vm1228_vm10, %v2332_v33, %v1225_v43 }
 0x1ef   :  { %2339 = vrsqrt.f32 %v3772_v26  ;;  %v1279_v46 = vmul.f32 %v1219_v28, %v3782_v63  ;;  %v1280_v14 = vmul.f32 %v1229_v45, %v3794_v1  ;;  %v1232_v18 = vmul.f32 %v3768_v56, %v1231_v54 }
 0x1f0   :  { %v1123_v8 = vmul.f32 0.5, %v1122_v23  ;;  %2341 = vrsqrt.f32 %v3777_v19  ;;  %v1059_v48 = vmul.f32 %v3787_v25, %v3787_v25  ;;  %v1058_v23 = vmul.f32 %v3789_v20, %v3789_v20 }
 0x1f1   :  { %1527 = vperm.xlu2 %2312, %v1279_v46   ;;  %v1294_v52 = vmul.f32 %v1279_v46, %v3713_v34  ;;  %1532 = vperm.xlu1 %2313, %v1280_v14   ;;  %vm1136_vm15 = vweird.f32 %v3772_v26  ;;  %vm1146_vm3 = vweird.f32 %v3777_v19  ;;  %vm1237_vm4 = vweird.f32 %v3768_v56 }
 0x1f2   :  { %v1124_v61 = vsub.f32 1.5, %v1123_v8  ;;  %v1057_v8 = vmul.f32 %v3798_v37, %v3798_v37  ;;  %vm1238_vm7 = vmor %vm1236_vm6, %vm1237_vm4 }
 0x1f3   :  { %v1014_v47 = vpop.xlane.xlu2 %1013  ;;  %1333 = vrot.lane.b32.xlu0 %v1294_v52, %s2350_s28  ;;  %v3819_v52 = vld [vmem:[%s4797_s3] sm:$0xff] }
 0x1f4   :  { %v1005_v35 = vpop.xlane.xlu1 %1004  ;;  %v1044_v28 = vmul.f32 0.0012755102, %v1014_v47  ;;  %v1125_v43 = vmul.f32 %v3766_v6, %v1124_v61  ;;  %v1233_v47 = vmul.f32 0.5, %v1232_v18 }
 0x1f5   :  { %v996_v51 = vpop.xlane.xlu0 %995  ;;  %v1043_v33 = vmul.f32 0.0012755102, %v1005_v35  ;;  %v2340_v54 = vpop.eup %2339 }
 0x1f6   :  { %v1042_v45 = vmul.f32 0.0012755102, %v996_v51  ;;  %v2342_v60 = vpop.eup %2341  ;;  %v1131_v34 = vmul.f32 %v2340_v54, %v3772_v26  ;;  %v1074_v46 = vsub.f32 %v1044_v28, %v1059_v48  ;;  %v1129_v51 = vsel %vm1128_vm13, %v3766_v6, %v1125_v43  ;;  %v3845_v26 = vld [vmem:[%s4797_s3 + $0x10] sm:$0xff] }
 0x1f7   :  { %v1073_v7 = vsub.f32 %v1043_v33, %v1058_v23  ;;  %v1141_v35 = vmul.f32 %v2342_v60, %v3777_v19  ;;  %v1295_v48 = vmul.f32 %v1280_v14, %v3710_v27  ;;  %vm1137_vm14 = vweird.f32 %v2340_v54 }
 0x1f8   :  { %v1072_v61 = vsub.f32 %v1042_v45, %v1057_v8  ;;  %v1132_v13 = vmul.f32 %v2340_v54, %v1131_v34  ;;  %v1089_v41 = vmax.f32 %v1074_v46, 0.0  ;;  %v1234_v45 = vsub.f32 1.5, %v1233_v47  ;;  %vm1138_vm2 = vmor %vm1136_vm15, %vm1137_vm14 }
 0x1f9   :  { %v1088_v53 = vmax.f32 %v1073_v7, 0.0  ;;  %v1142_v17 = vmul.f32 %v2342_v60, %v1141_v35  ;;  %1335 = vrot.lane.b32.xlu2 %v1295_v48, %s2350_s28  ;;  %v1270_v7 = vmul.f32 %v1129_v51, %v3819_v52  ;;  %vm1147_vm0 = vweird.f32 %v2342_v60 }
 0x1fa   :  { %v1087_v11 = vmax.f32 %v1072_v61, 0.0  ;;  %v1133_v23 = vmul.f32 0.5, %v1132_v13  ;;  %v3823_v18 = vadd.f32 1e-05, %v1089_v41  ;;  %v3833_v13 = vld [vmem:[%s4797_s3 + $0x8] sm:$0xff]  ;;  %v1235_v27 = vmul.f32 %v3768_v56, %v1234_v45  ;;  %vm1148_vm5 = vmor %vm1146_vm3, %vm1147_vm0 }
 0x1fb   :  { %v3825_v28 = vadd.f32 1e-05, %v1088_v53  ;;  %v1143_v33 = vmul.f32 0.5, %v1142_v17  ;;  %1482 = vperm.xlu0 %2314, %v1270_v7   ;;  %v1285_v35 = vmul.f32 %v1270_v7, %v3729_v15 }
 0x1fc   :  { %v1117_v8 = vadd.f32 1e-05, %v1087_v11  ;;  %v1134_v34 = vsub.f32 1.5, %v1133_v23  ;;  %2343 = vrsqrt.f32 %v3823_v18  ;;  %v1239_v17 = vsel %vm1238_vm7, %v3768_v56, %v1235_v27 }
 0x1fd   :  { %v1144_v6 = vsub.f32 1.5, %v1143_v33  ;;  %vm1256_vm12 = vweird.f32 %v3825_v28  ;;  %vm1266_vm15 = vweird.f32 %v3823_v18 }
 0x1fe   :  { %2345 = vrsqrt.f32 %v1117_v8  ;;  %v1135_v53 = vmul.f32 %v2340_v54, %v1134_v34  ;;  %vm1246_vm9 = vweird.f32 %v1117_v8 }
 0x1ff   :  { %2347 = vrsqrt.f32 %v3825_v28  ;;  %v1145_v11 = vmul.f32 %v2342_v60, %v1144_v6 }
 0x200   :  { %v1139_v41 = vsel %vm1138_vm2, %v2340_v54, %v1135_v53 }
 0x201   :  { %v1271_v14 = vmul.f32 %v1139_v41, %v3833_v13  ;;  %v1149_v46 = vsel %vm1148_vm5, %v2342_v60, %v1145_v11  ;;  %v3858_v60 = vld [vmem:[%s4797_s3 + $0x58] sm:$0xff]  ;;  %v3867_v41 = vld [vmem:[%s4797_s3 + $0x60] sm:$0xff] }
 0x202   :  { %v2344_v43 = vpop.eup %2343  ;;  %v1272_v39 = vmul.f32 %v1149_v46, %v3845_v26  ;;  %v1281_v7 = vmul.f32 %v1239_v17, %v3858_v60 }
 0x203   :  { %v1286_v54 = vmul.f32 %v1271_v14, %v3757_v40  ;;  %v1261_v19 = vmul.f32 %v2344_v43, %v3823_v18  ;;  %1487 = vperm.xlu2 %2312, %v1271_v14   ;;  %1315 = vrot.lane.b32.xlu0 %v1285_v35, %s2350_s28  ;;  %vm1267_vm14 = vweird.f32 %v2344_v43 }
 0x204   :  { %v2346_v47 = vpop.eup %2345  ;;  %v1287_v56 = vmul.f32 %v1272_v39, %v3760_v57  ;;  %v1296_v11 = vmul.f32 %v1281_v7, %v3726_v59  ;;  %vm1268_vm0 = vmor %vm1266_vm15, %vm1267_vm14 }
 0x205   :  { %v2348_v61 = vpop.eup %2347  ;;  %v1241_v51 = vmul.f32 %v2346_v47, %v1117_v8  ;;  %v1262_v48 = vmul.f32 %v2344_v43, %v1261_v19  ;;  %1317 = vrot.lane.b32.xlu1 %v1286_v54, %s2350_s28  ;;  %vm1247_vm8 = vweird.f32 %v2346_v47  ;;  %v3876_v19 = vld [vmem:[%s4797_s3 + $0x68] sm:$0xff] }
 0x206   :  { %v1251_v23 = vmul.f32 %v2348_v61, %v3825_v28  ;;  %vm1248_vm10 = vmor %vm1246_vm9, %vm1247_vm8  ;;  %vm1257_vm11 = vweird.f32 %v2348_v61  ;;  %v3883_v28 = vld [vmem:[%s4797_s3 + $0x70] sm:$0xff] }
 0x207   :  { %v1242_v15 = vmul.f32 %v2346_v47, %v1241_v51  ;;  %v1263_v45 = vmul.f32 0.5, %v1262_v48  ;;  %vm1258_vm13 = vmor %vm1256_vm12, %vm1257_vm11  ;;  %v2351_v48 = vmov 1  }
 0x208   :  { %v1252_v40 = vmul.f32 %v2348_v61, %v1251_v23 }
 0x209   :  { %v1243_v33 = vmul.f32 0.5, %v1242_v15  ;;  %v1264_v14 = vsub.f32 1.5, %v1263_v45 }
 0x20a   :  { %v1253_v34 = vmul.f32 0.5, %v1252_v40 }
 0x20b   :  { %v1244_v6 = vsub.f32 1.5, %v1243_v33  ;;  %1319 = vrot.lane.b32.xlu2 %v1287_v56, %s2350_s28  ;;  %1537 = vperm.xlu0 %2314, %v1281_v7   ;;  %v1265_v8 = vmul.f32 %v2344_v43, %v1264_v14 }
 0x20c   :  { %v1254_v53 = vsub.f32 1.5, %v1253_v34  ;;  %v3889_v18 = vpop.permute.xlu2 %1497 }
 0x20d   :  { %v1245_v27 = vmul.f32 %v2346_v47, %v1244_v6  ;;  %1337 = vrot.lane.b32.xlu1 %v1296_v11, %s2350_s28 }
 0x20e   :  { %v1255_v54 = vmul.f32 %v2348_v61, %v1254_v53 }
 0x20f   :  { %v1249_v57 = vsel %vm1248_vm10, %v2346_v47, %v1245_v27 }
 0x210   :  { %v1282_v46 = vmul.f32 %v1249_v57, %v3867_v41  ;;  %v1259_v35 = vsel %vm1258_vm13, %v2348_v61, %v1255_v54 }
 0x211   :  { %v1283_v47 = vmul.f32 %v1259_v35, %v3876_v19 }
 0x212   :  { %v1297_v59 = vmul.f32 %v1282_v46, %v3798_v37  ;;  %v1269_v37 = vsel %vm1268_vm0, %v2344_v43, %v1265_v8 }
 0x213   :  { %1542 = vperm.xlu2 %2312, %v1282_v46   ;;  %v1284_v51 = vmul.f32 %v1269_v37, %v3883_v28  ;;  %v1298_v17 = vmul.f32 %v1283_v47, %v3789_v20 }
 0x214   :  { %1339 = vrot.lane.b32.xlu0 %v1297_v59, %s2350_s28 }
 0x215   :  { %1492 = vperm.xlu1 %2313, %v1272_v39   ;;  %v1299_v61 = vmul.f32 %v1284_v51, %v3787_v25 }
 0x216   :  { %v1324_v23 = vpop.permute.xlu2 %1323 }
 0x217   :  { %v1364_v20 = vsub.f32 %v3684_v30, %v1324_v23  ;;  %v4994_v23 = vld [vmem:[#allocation14_spill] sm:$0xff] }
 0x21b   :  { %1341 = vrot.lane.b32.xlu2 %v1298_v17, %s2350_s28 }
 0x21c   :  { %2315 = vset.pattern.permute.xlu2 %v2351_v48  ;;  %1552 = vperm.xlu0 %2314, %v1284_v51  }
 0x21d   :  { %1343 = vrot.lane.b32.xlu1 %v1299_v61, %s2350_s28  ;;  %v4993_v61 = vld [vmem:[#allocation3_spill] sm:$0xff] }
 0x224   :  { %2317 = vset.pattern.permute.xlu0 %v2351_v48 }
 0x225   :  { %1547 = vperm.xlu1 %2313, %v1283_v47  }
 0x226   :  { %v1322_v43 = vpop.permute.xlu0 %1321 }
 0x227   :  { %v1363_v39 = vsub.f32 %v3673_v21, %v1322_v43  ;;  %v1578_v43 = vmul.f32 %v3889_v18, %v4994_v23 }
 0x229   :  { %1782 = vperm.xlu2 %2315, %v1363_v39   ;;  %v4995_v39 = vld [vmem:[#allocation49_spill] sm:$0xff] }
 0x22a   :  { %v3894_v15 = vpop.permute.xlu2 %1512 }
 0x22c   :  { %v3897_v40 = vpop.permute.xlu1 %1502 }
 0x22d   :  { %2316 = vset.pattern.permute.xlu1 %v2351_v48  ;;  %v1577_v48 = vmul.f32 %v3889_v18, %v4993_v61 }
 0x22e   :  { %1787 = vperm.xlu1 %2316, %v1364_v20   ;;  %v4996_v20 = vld [vmem:[#allocation51_spill] sm:$0xff] }
 0x234   :  { %v1330_v25 = vpop.permute.xlu2 %1329 }
 0x235   :  { %v1367_v33 = vsub.f32 %v3719_v5, %v1330_v25  ;;  %v1581_v25 = vmul.f32 %v3889_v18, %v4996_v20 }
 0x237   :  { %1802 = vperm.xlu0 %2317, %v1367_v33   ;;  %v1582_v33 = vmul.f32 %v3889_v18, %v3257_v32  ;;  %v1401_v32 = vld [vmem:[%s4798_s4 + $0xd0] sm:$0xff] }
 0x23a   :  { %v3900_v7 = vpop.permute.xlu0 %1507 }
 0x23c   :  { %v1326_v56 = vpop.permute.xlu1 %1325 }
 0x23d   :  { %v1365_v45 = vsub.f32 %v3697_v50, %v1326_v56 }
 0x23f   :  { %1792 = vperm.xlu2 %2315, %v1365_v45   ;;  %v1397_v45 = vld [vmem:[%s4798_s4 + $0xb0] sm:$0xff] }
 0x244   :  { %v1328_v21 = vpop.permute.xlu0 %1327 }
 0x245   :  { %v1366_v34 = vsub.f32 %v3707_v49, %v1328_v21  ;;  %v1398_v21 = vld [vmem:[%s4798_s4 + $0xb8] sm:$0xff] }
 0x247   :  { %1797 = vperm.xlu1 %2316, %v1366_v34  }
 0x24a   :  { %v3904_v6 = vpop.permute.xlu1 %1517 }
 0x24b   :  { %v3906_v30 = vpop.permute.xlu2 %1527 }
 0x252   :  { %v3912_v50 = vpop.permute.xlu0 %1522 }
 0x253   :  { %v1336_v11 = vpop.permute.xlu2 %1335 }
 0x254   :  { %v1332_v53 = vpop.permute.xlu1 %1331  ;;  %v1370_v5 = vsub.f32 %v3794_v1, %v1336_v11 }
 0x255   :  { %v1368_v27 = vsub.f32 %v3739_v12, %v1332_v53  ;;  %v1400_v53 = vld [vmem:[%s4798_s4 + $0xc8] sm:$0xff] }
 0x256   :  { %1817 = vperm.xlu0 %2317, %v1370_v5   ;;  %v1682_v5 = vadd.f32 %v1577_v48, %v1397_v45  ;;  %v4998_v45 = vld [vmem:[#allocation10_spill] sm:$0xff] }
 0x257   :  { %1807 = vperm.xlu2 %2315, %v1368_v27  }
 0x25d   :  { %v3910_v14 = vpop.permute.xlu2 %1487 }
 0x263   :  { %v3918_v8 = vpop.permute.xlu1 %1532 }
 0x265   :  { %v1320_v57 = vpop.permute.xlu2 %1319  ;;  %v1334_v46 = vpop.permute.xlu0 %1333 }
 0x266   :  { %v1362_v49 = vsub.f32 %v3845_v26, %v1320_v57  ;;  %v1369_v54 = vsub.f32 %v3782_v63, %v1334_v46  ;;  %v4992_v63 = vld [vmem:[#allocation12_spill] sm:$0xff]  ;;  %v1683_v57 = vadd.f32 %v1578_v43, %v1398_v21  ;;  %v1591_v21 = vmul.f32 %v3900_v7, %v4998_v45 }
 0x267   :  { %v1576_v17 = vmul.f32 %v3889_v18, %v4992_v63 }
 0x268   :  { %1777 = vperm.xlu0 %2317, %v1362_v49   ;;  %1812 = vperm.xlu1 %2316, %v1369_v54   ;;  %v1686_v54 = vadd.f32 %v1581_v25, %v1401_v32  ;;  %v4997_v25 = vld [vmem:[#allocation8_spill] sm:$0xff]  ;;  %v1594_v32 = vmul.f32 %v3900_v7, %v3200_v3 }
 0x269   :  { %v1413_v3 = vld [vmem:[%s4798_s4 + $0x130] sm:$0xff] }
 0x26d   :  { %v3916_v59 = vpop.permute.xlu2 %1542  ;;  %v3920_v12 = vpop.permute.xlu0 %1482 }
 0x26e   :  { %4991 = vst [vmem:[#allocation88_spill] sm:$0xff] %v3916_v59 }
 0x275   :  { %v1342_v1 = vpop.permute.xlu2 %1341  ;;  %v1316_v37 = vpop.permute.xlu0 %1315 }
 0x276   :  { %v1373_v35 = vsub.f32 %v3876_v19, %v1342_v1  ;;  %v1360_v51 = vsub.f32 %v3819_v52, %v1316_v37  ;;  %v1579_v19 = vmul.f32 %v3889_v18, %v4995_v39  ;;  %v1396_v52 = vld [vmem:[%s4798_s4 + $0xa8] sm:$0xff] }
 0x277   :  { %v1318_v47 = vpop.permute.xlu1 %1317  ;;  %v1681_v27 = vadd.f32 %v1576_v17, %v1396_v52 }
 0x278   :  { %v1361_v26 = vsub.f32 %v3833_v13, %v1318_v47  ;;  %1832 = vperm.xlu0 %2317, %v1373_v35   ;;  %1767 = vperm.xlu2 %2315, %v1360_v51   ;;  %v1580_v13 = vmul.f32 %v3889_v18, %v3180_v55  ;;  %v1399_v55 = vld [vmem:[%s4798_s4 + $0xc0] sm:$0xff]  ;;  %v1402_v18 = vld [vmem:[%s4798_s4 + $0xd8] sm:$0xff] }
 0x279   :  { %v1684_v49 = vadd.f32 %v1579_v19, %v1399_v55  ;;  %v1687_v1 = vadd.f32 %v1582_v33, %v1402_v18  ;;  %v1590_v33 = vmul.f32 %v3900_v7, %v4997_v25  ;;  %v4999_v55 = vld [vmem:[#allocation22_spill] sm:$0xff] }
 0x27a   :  { %1772 = vperm.xlu1 %2316, %v1361_v26   ;;  %v1685_v46 = vadd.f32 %v1580_v13, %v1400_v53  ;;  %v1593_v53 = vmul.f32 %v3900_v7, %v3281_v4  ;;  %v1411_v18 = vld [vmem:[%s4798_s4 + $0x120] sm:$0xff]  ;;  %v1412_v4 = vld [vmem:[%s4798_s4 + $0x128] sm:$0xff] }
 0x27d   :  { %v3942_v56 = vpop.permute.xlu0 %1537 }
 0x27f   :  { %v1338_v34 = vpop.permute.xlu1 %1337 }
 0x280   :  { %v1371_v11 = vsub.f32 %v3858_v60, %v1338_v34  ;;  %v1592_v34 = vmul.f32 %v3900_v7, %v4999_v55 }
 0x282   :  { %1822 = vperm.xlu2 %2315, %v1371_v11   ;;  %v5000_v11 = vld [vmem:[#allocation57_spill] sm:$0xff] }
 0x283   :  { %v1783_v35 = vpop.permute.xlu2 %1782 }
 0x284   :  { %v1861_v37 = vadd.f32 %v1783_v35, %v1681_v27  ;;  %v1862_v47 = vadd.f32 %v1783_v35, %v1682_v5  ;;  %v1863_v51 = vadd.f32 %v1783_v35, %v1683_v57  ;;  %v1864_v26 = vadd.f32 %v1783_v35, %v1684_v49  ;;  %v5001_v5 = vld [vmem:[#allocation59_spill] sm:$0xff]  ;;  %v1414_v49 = vld [vmem:[%s4798_s4 + $0x138] sm:$0xff] }
 0x285   :  { %v1865_v63 = vadd.f32 %v1783_v35, %v1685_v46  ;;  %v1866_v61 = vadd.f32 %v1783_v35, %v1686_v54  ;;  %v1867_v23 = vadd.f32 %v1783_v35, %v1687_v1  ;;  %v1595_v27 = vmul.f32 %v3900_v7, %v5000_v11  ;;  %v5002_v46 = vld [vmem:[#allocation4_spill] sm:$0xff]  ;;  %v1415_v1 = vld [vmem:[%s4798_s4 + $0x140] sm:$0xff]  ;;  %v5003_v35 = vld [vmem:[#allocation7_spill] sm:$0xff] }
 0x286   :  { %v1966_v39 = vmax.f32 %v1861_v37, 0.0  ;;  %v1967_v20 = vmax.f32 %v1862_v47, 0.0  ;;  %v1968_v59 = vmax.f32 %v1863_v51, 0.0  ;;  %v1969_v60 = vmax.f32 %v1864_v26, 0.0  ;;  %v1340_v17 = vpop.permute.xlu0 %1339  ;;  %v5004_v47 = vld [vmem:[#allocation18_spill] sm:$0xff]  ;;  %v5005_v26 = vld [vmem:[#allocation53_spill] sm:$0xff] }
 0x287   :  { %v1970_v48 = vmax.f32 %v1865_v63, 0.0  ;;  %v1372_v43 = vsub.f32 %v3867_v41, %v1340_v17  ;;  %v3967_v19 = vpop.permute.xlu1 %1492  ;;  %v1971_v52 = vmax.f32 %v1866_v61, 0.0  ;;  %v1972_v13 = vmax.f32 %v1867_v23, 0.0 }
 0x288   :  { %2071 = vst [vmem:[%s4799_s5 + $0xa8] sm:$0xff] %v1966_v39  ;;  %v1596_v57 = vmul.f32 %v3900_v7, %v5001_v5  ;;  %v1583_v54 = vmul.f32 %v3897_v40, %v5002_v46  ;;  %v1416_v7 = vld [vmem:[%s4798_s4 + $0x148] sm:$0xff]  ;;  %v1584_v37 = vmul.f32 %v3897_v40, %v5003_v35  ;;  %v1585_v51 = vmul.f32 %v3897_v40, %v5004_v47  ;;  %v5007_v5 = vld [vmem:[#allocation54_spill] sm:$0xff] }
 0x289   :  { %2072 = vst [vmem:[%s4799_s5 + $0xb0] sm:$0xff] %v1967_v20  ;;  %1827 = vperm.xlu1 %2316, %v1372_v43   ;;  %v1586_v63 = vmul.f32 %v3897_v40, %v5005_v26  ;;  %v1696_v39 = vadd.f32 %v1591_v21, %v1411_v18  ;;  %v1697_v20 = vadd.f32 %v1592_v34, %v1412_v4  ;;  %v5006_v43 = vld [vmem:[#allocation39_spill] sm:$0xff]  ;;  %v1403_v34 = vld [vmem:[%s4798_s4 + $0xe0] sm:$0xff] }
 0x28a   :  { %2073 = vst [vmem:[%s4799_s5 + $0xb8] sm:$0xff] %v1968_v59  ;;  %v1699_v17 = vadd.f32 %v1594_v32, %v1414_v49  ;;  %v1588_v46 = vmul.f32 %v3897_v40, %v5007_v5  ;;  %v1405_v32 = vld [vmem:[%s4798_s4 + $0xf0] sm:$0xff]  ;;  %v1407_v49 = vld [vmem:[%s4798_s4 + $0x100] sm:$0xff]  ;;  %v1688_v26 = vadd.f32 %v1583_v54, %v1403_v34 }
 0x28b   :  { %2074 = vst [vmem:[%s4799_s5 + $0xc0] sm:$0xff] %v1969_v60  ;;  %v1698_v60 = vadd.f32 %v1593_v53, %v1413_v3  ;;  %v1404_v53 = vld [vmem:[%s4798_s4 + $0xe8] sm:$0xff]  ;;  %v1406_v3 = vld [vmem:[%s4798_s4 + $0xf8] sm:$0xff]  ;;  %v1425_v34 = vld [vmem:[%s4798_s4 + $0x190] sm:$0xff] }
 0x28c   :  { %2075 = vst [vmem:[%s4799_s5 + $0xc8] sm:$0xff] %v1970_v48 }
 0x28d   :  { %2076 = vst [vmem:[%s4799_s5 + $0xd0] sm:$0xff] %v1971_v52  ;;  %v1587_v52 = vmul.f32 %v3897_v40, %v5006_v43  ;;  %v1604_v43 = vmul.f32 %v3904_v6, %v3080_v10 }
 0x28e   :  { %2077 = vst.msk [vmem:[%s4799_s5 + $0xd8] sm:$0xff] %vm644_vm1, %v1972_v13  ;;  %v1700_v13 = vadd.f32 %v1595_v27, %v1415_v1  ;;  %v1408_v1 = vld [vmem:[%s4798_s4 + $0x108] sm:$0xff]  ;;  %v4076_v54 = vpop.permute.xlu0 %1552 }
 0x28f   :  { %v1344_v41 = vpop.permute.xlu1 %1343 }
 0x290   :  { %v1374_v59 = vsub.f32 %v3883_v28, %v1344_v41  ;;  %v1410_v28 = vld [vmem:[%s4798_s4 + $0x118] sm:$0xff]  ;;  %v1701_v41 = vadd.f32 %v1596_v57, %v1416_v7 }
 0x291   :  { %v1695_v23 = vadd.f32 %v1590_v33, %v1410_v28  ;;  %v5008_v28 = vld [vmem:[#allocation56_spill] sm:$0xff] }
 0x292   :  { %1837 = vperm.xlu2 %2315, %v1374_v59   ;;  %v1589_v18 = vmul.f32 %v3897_v40, %v5008_v28  ;;  %v1409_v40 = vld [vmem:[%s4798_s4 + $0x110] sm:$0xff]  ;;  %v5012_v28 = vld [vmem:[#allocation66_spill] sm:$0xff] }
 0x297   :  { %v4032_v61 = vpop.permute.xlu1 %1547 }
 0x299   :  { %v1793_v48 = vpop.permute.xlu2 %1792 }
 0x29a   :  { %v1875_v59 = vadd.f32 %v1793_v48, %v1695_v23  ;;  %v1876_v25 = vadd.f32 %v1793_v48, %v1696_v39  ;;  %v1877_v45 = vadd.f32 %v1793_v48, %v1697_v20  ;;  %v1878_v55 = vadd.f32 %v1793_v48, %v1698_v60 }
 0x29b   :  { %v1879_v11 = vadd.f32 %v1793_v48, %v1699_v17  ;;  %v1880_v35 = vadd.f32 %v1793_v48, %v1700_v13  ;;  %v1881_v33 = vadd.f32 %v1793_v48, %v1701_v41  ;;  %v1689_v23 = vadd.f32 %v1584_v37, %v1404_v53  ;;  %v5009_v13 = vld [vmem:[#allocation16_spill] sm:$0xff]  ;;  %v5011_v53 = vld [vmem:[#allocation63_spill] sm:$0xff] }
 0x29c   :  { %v1980_v21 = vmax.f32 %v1875_v59, 0.0  ;;  %v1981_v27 = vmax.f32 %v1876_v25, 0.0  ;;  %v1982_v57 = vmax.f32 %v1877_v45, 0.0  ;;  %v1983_v4 = vmax.f32 %v1878_v55, 0.0 }
 0x29d   :  { %v1984_v7 = vmax.f32 %v1879_v11, 0.0  ;;  %v1985_v47 = vmax.f32 %v1880_v35, 0.0  ;;  %v1690_v39 = vadd.f32 %v1585_v51, %v1405_v32  ;;  %v1986_v20 = vmax.f32 %v1881_v33, 0.0 }
 0x29e   :  { %2085 = vst [vmem:[%s4799_s5 + $0x118] sm:$0xff] %v1980_v21  ;;  %v1691_v60 = vadd.f32 %v1586_v63, %v1406_v3  ;;  %v1692_v17 = vadd.f32 %v1587_v52, %v1407_v49  ;;  %v1693_v48 = vadd.f32 %v1588_v46, %v1408_v1  ;;  %v1605_v41 = vmul.f32 %v3904_v6, %v5009_v13  ;;  %v1428_v3 = vld [vmem:[%s4798_s4 + $0x1a8] sm:$0xff]  ;;  %v1430_v1 = vld [vmem:[%s4798_s4 + $0x1b8] sm:$0xff] }
 0x29f   :  { %2086 = vst [vmem:[%s4799_s5 + $0x120] sm:$0xff] %v1981_v27  ;;  %v1606_v59 = vmul.f32 %v3904_v6, %v3146_v44  ;;  %v1694_v37 = vadd.f32 %v1589_v18, %v1409_v40  ;;  %v1607_v45 = vmul.f32 %v3904_v6, %v3338_v62  ;;  %v5010_v44 = vld [vmem:[#allocation48_spill] sm:$0xff]  ;;  %v1424_v62 = vld [vmem:[%s4798_s4 + $0x188] sm:$0xff]  ;;  %v1609_v32 = vmul.f32 %v3904_v6, %v5011_v53 }
 0x2a0   :  { %2087 = vst [vmem:[%s4799_s5 + $0x128] sm:$0xff] %v1982_v57  ;;  %v1788_v51 = vpop.permute.xlu1 %1787  ;;  %v1608_v55 = vmul.f32 %v3904_v6, %v5010_v44  ;;  %v1610_v18 = vmul.f32 %v3904_v6, %v5012_v28  ;;  %v1426_v57 = vld [vmem:[%s4798_s4 + $0x198] sm:$0xff]  ;;  %v1429_v6 = vld [vmem:[%s4798_s4 + $0x1b0] sm:$0xff]  ;;  %v1709_v40 = vadd.f32 %v1604_v43, %v1424_v62  ;;  %v5018_v53 = vld [vmem:[#allocation67_spill] sm:$0xff] }
 0x2a1   :  { %2088 = vst [vmem:[%s4799_s5 + $0x130] sm:$0xff] %v1983_v4  ;;  %v1868_v63 = vadd.f32 %v1788_v51, %v1688_v26  ;;  %v1869_v10 = vadd.f32 %v1788_v51, %v1689_v23  ;;  %v1870_v52 = vadd.f32 %v1788_v51, %v1690_v39  ;;  %v1871_v25 = vadd.f32 %v1788_v51, %v1691_v60  ;;  %v1427_v4 = vld [vmem:[%s4798_s4 + $0x1a0] sm:$0xff]  ;;  %v5013_v60 = vld [vmem:[#allocation17_spill] sm:$0xff]  ;;  %v5017_v62 = vld [vmem:[#allocation52_spill] sm:$0xff] }
 0x2a2   :  { %2089 = vst [vmem:[%s4799_s5 + $0x138] sm:$0xff] %v1984_v7  ;;  %v1872_v11 = vadd.f32 %v1788_v51, %v1692_v17  ;;  %v1873_v5 = vadd.f32 %v1788_v51, %v1693_v48  ;;  %v1874_v46 = vadd.f32 %v1788_v51, %v1694_v37  ;;  %v1711_v23 = vadd.f32 %v1606_v59, %v1426_v57  ;;  %v5014_v48 = vld [vmem:[#allocation20_spill] sm:$0xff]  ;;  %v5019_v28 = vld [vmem:[#allocation70_spill] sm:$0xff]  ;;  %v1432_v57 = vld [vmem:[%s4798_s4 + $0x1c8] sm:$0xff] }
 0x2a3   :  { %2090 = vst [vmem:[%s4799_s5 + $0x140] sm:$0xff] %v1985_v47  ;;  %v1973_v35 = vmax.f32 %v1868_v63, 0.0  ;;  %v1974_v33 = vmax.f32 %v1869_v10, 0.0  ;;  %v1975_v21 = vmax.f32 %v1870_v52, 0.0  ;;  %v1976_v27 = vmax.f32 %v1871_v25, 0.0  ;;  %v5015_v52 = vld [vmem:[#allocation31_spill] sm:$0xff] }
 0x2a4   :  { %2091 = vst.msk [vmem:[%s4799_s5 + $0x148] sm:$0xff] %vm644_vm1, %v1986_v20  ;;  %v1977_v49 = vmax.f32 %v1872_v11, 0.0  ;;  %v1978_v7 = vmax.f32 %v1873_v5, 0.0  ;;  %v1710_v47 = vadd.f32 %v1605_v41, %v1425_v34  ;;  %v1979_v26 = vmax.f32 %v1874_v46, 0.0 }
 0x2a5   :  { %2078 = vst [vmem:[%s4799_s5 + $0xe0] sm:$0xff] %v1973_v35  ;;  %v1712_v39 = vadd.f32 %v1607_v45, %v1427_v4  ;;  %v1713_v20 = vadd.f32 %v1608_v55, %v1428_v3  ;;  %v1611_v17 = vmul.f32 %v3912_v50, %v5013_v60  ;;  %v1612_v13 = vmul.f32 %v3912_v50, %v5014_v48  ;;  %v5016_v45 = vld [vmem:[#allocation65_spill] sm:$0xff]  ;;  %v1433_v4 = vld [vmem:[%s4798_s4 + $0x1d0] sm:$0xff] }
 0x2a6   :  { %2079 = vst [vmem:[%s4799_s5 + $0xe8] sm:$0xff] %v1974_v33  ;;  %v1714_v41 = vadd.f32 %v1609_v32, %v1429_v6  ;;  %v1715_v37 = vadd.f32 %v1610_v18, %v1430_v1  ;;  %v1613_v25 = vmul.f32 %v3912_v50, %v5015_v52  ;;  %v1614_v44 = vmul.f32 %v3912_v50, %v5016_v45  ;;  %v1434_v3 = vld [vmem:[%s4798_s4 + $0x1d8] sm:$0xff]  ;;  %v1436_v6 = vld [vmem:[%s4798_s4 + $0x1e8] sm:$0xff]  ;;  %v1437_v1 = vld [vmem:[%s4798_s4 + $0x1f0] sm:$0xff] }
 0x2a7   :  { %2080 = vst [vmem:[%s4799_s5 + $0xf0] sm:$0xff] %v1975_v21  ;;  %v1431_v21 = vld [vmem:[%s4798_s4 + $0x1c0] sm:$0xff]  ;;  %v1615_v34 = vmul.f32 %v3912_v50, %v5017_v62  ;;  %v1616_v32 = vmul.f32 %v3912_v50, %v5018_v53  ;;  %v1617_v18 = vmul.f32 %v3912_v50, %v5019_v28  ;;  %v5021_v48 = vld [vmem:[#allocation13_spill] sm:$0xff]  ;;  %v5024_v62 = vld [vmem:[#allocation44_spill] sm:$0xff] }
 0x2a8   :  { %2081 = vst [vmem:[%s4799_s5 + $0xf8] sm:$0xff] %v1976_v27  ;;  %v1435_v50 = vld [vmem:[%s4798_s4 + $0x1e0] sm:$0xff]  ;;  %v1719_v60 = vadd.f32 %v1614_v44, %v1434_v3  ;;  %v5022_v52 = vld [vmem:[#allocation25_spill] sm:$0xff]  ;;  %v5025_v53 = vld [vmem:[#allocation60_spill] sm:$0xff] }
 0x2a9   :  { %v1803_v43 = vpop.permute.xlu0 %1802  ;;  %2082 = vst [vmem:[%s4799_s5 + $0x100] sm:$0xff] %v1977_v49  ;;  %v5023_v45 = vld [vmem:[#allocation58_spill] sm:$0xff]  ;;  %v1420_v3 = vld [vmem:[%s4798_s4 + $0x168] sm:$0xff] }
 0x2aa   :  { %v1889_v59 = vadd.f32 %v1803_v43, %v1709_v40  ;;  %v1890_v51 = vadd.f32 %v1803_v43, %v1710_v47  ;;  %v1891_v63 = vadd.f32 %v1803_v43, %v1711_v23  ;;  %v1892_v10 = vadd.f32 %v1803_v43, %v1712_v39  ;;  %2083 = vst [vmem:[%s4799_s5 + $0x108] sm:$0xff] %v1978_v7  ;;  %v5020_v7 = vld [vmem:[#allocation11_spill] sm:$0xff]  ;;  %v5026_v28 = vld [vmem:[#allocation62_spill] sm:$0xff] }
 0x2ab   :  { %v1893_v55 = vadd.f32 %v1803_v43, %v1713_v20  ;;  %v1894_v11 = vadd.f32 %v1803_v43, %v1714_v41  ;;  %2084 = vst.msk [vmem:[%s4799_s5 + $0x110] sm:$0xff] %vm644_vm1, %v1979_v26  ;;  %v1895_v5 = vadd.f32 %v1803_v43, %v1715_v37  ;;  %v1597_v40 = vmul.f32 %v3894_v15, %v5020_v7 }
 0x2ac   :  { %v1994_v46 = vmax.f32 %v1889_v59, 0.0  ;;  %v1995_v35 = vmax.f32 %v1890_v51, 0.0  ;;  %v1996_v33 = vmax.f32 %v1891_v63, 0.0  ;;  %v1997_v27 = vmax.f32 %v1892_v10, 0.0 }
 0x2ad   :  { %v1998_v49 = vmax.f32 %v1893_v55, 0.0  ;;  %v1999_v47 = vmax.f32 %v1894_v11, 0.0  ;;  %v1716_v26 = vadd.f32 %v1611_v17, %v1431_v21  ;;  %v2000_v23 = vmax.f32 %v1895_v5, 0.0  ;;  %v1417_v21 = vld [vmem:[%s4798_s4 + $0x150] sm:$0xff] }
 0x2ae   :  { %2099 = vst [vmem:[%s4799_s5 + $0x188] sm:$0xff] %v1994_v46  ;;  %v1717_v39 = vadd.f32 %v1612_v13, %v1432_v57  ;;  %v1718_v20 = vadd.f32 %v1613_v25, %v1433_v4  ;;  %v1598_v43 = vmul.f32 %v3894_v15, %v5021_v48  ;;  %v1720_v41 = vadd.f32 %v1615_v34, %v1435_v50  ;;  %v1418_v57 = vld [vmem:[%s4798_s4 + $0x158] sm:$0xff]  ;;  %v1419_v4 = vld [vmem:[%s4798_s4 + $0x160] sm:$0xff] }
 0x2af   :  { %2100 = vst [vmem:[%s4799_s5 + $0x190] sm:$0xff] %v1995_v35  ;;  %v1721_v37 = vadd.f32 %v1616_v32, %v1436_v6  ;;  %v1722_v59 = vadd.f32 %v1617_v18, %v1437_v1  ;;  %v1599_v25 = vmul.f32 %v3894_v15, %v5022_v52  ;;  %v1600_v44 = vmul.f32 %v3894_v15, %v5023_v45  ;;  %v1422_v50 = vld [vmem:[%s4798_s4 + $0x178] sm:$0xff]  ;;  %v1423_v6 = vld [vmem:[%s4798_s4 + $0x180] sm:$0xff] }
 0x2b0   :  { %2101 = vst [vmem:[%s4799_s5 + $0x198] sm:$0xff] %v1996_v33  ;;  %v1601_v34 = vmul.f32 %v3894_v15, %v5024_v62  ;;  %v1602_v32 = vmul.f32 %v3894_v15, %v5025_v53  ;;  %v1603_v18 = vmul.f32 %v3894_v15, %v5026_v28  ;;  %v1421_v15 = vld [vmem:[%s4798_s4 + $0x170] sm:$0xff]  ;;  %v1702_v7 = vadd.f32 %v1597_v40, %v1417_v21  ;;  %v1448_v28 = vld [vmem:[%s4798_s4 + $0x248] sm:$0xff] }
 0x2b1   :  { %2102 = vst [vmem:[%s4799_s5 + $0x1a0] sm:$0xff] %v1997_v27  ;;  %v1808_v51 = vpop.permute.xlu2 %1807  ;;  %v1628_v21 = vmul.f32 %v3918_v8, %v3438_v16  ;;  %v1445_v62 = vld [vmem:[%s4798_s4 + $0x230] sm:$0xff]  ;;  %v1630_v53 = vmul.f32 %v3918_v8, %v3464_v36  ;;  %v1447_v16 = vld [vmem:[%s4798_s4 + $0x240] sm:$0xff]  ;;  %v1450_v36 = vld [vmem:[%s4798_s4 + $0x258] sm:$0xff] }
 0x2b2   :  { %2103 = vst [vmem:[%s4799_s5 + $0x1a8] sm:$0xff] %v1998_v49  ;;  %v1896_v17 = vadd.f32 %v1808_v51, %v1716_v26  ;;  %v1897_v63 = vadd.f32 %v1808_v51, %v1717_v39  ;;  %v1898_v13 = vadd.f32 %v1808_v51, %v1718_v20  ;;  %v1899_v10 = vadd.f32 %v1808_v51, %v1719_v60 }
 0x2b3   :  { %2104 = vst [vmem:[%s4799_s5 + $0x1b0] sm:$0xff] %v1999_v47  ;;  %v1900_v55 = vadd.f32 %v1808_v51, %v1720_v41  ;;  %v1901_v11 = vadd.f32 %v1808_v51, %v1721_v37  ;;  %v1902_v5 = vadd.f32 %v1808_v51, %v1722_v59  ;;  %v1703_v26 = vadd.f32 %v1598_v43, %v1418_v57 }
 0x2b4   :  { %2105 = vst.msk [vmem:[%s4799_s5 + $0x1b8] sm:$0xff] %vm644_vm1, %v2000_v23  ;;  %v2001_v46 = vmax.f32 %v1896_v17, 0.0  ;;  %v2002_v35 = vmax.f32 %v1897_v63, 0.0  ;;  %v2003_v33 = vmax.f32 %v1898_v13, 0.0  ;;  %v2004_v27 = vmax.f32 %v1899_v10, 0.0 }
 0x2b5   :  { %v2005_v49 = vmax.f32 %v1900_v55, 0.0  ;;  %v2006_v1 = vmax.f32 %v1901_v11, 0.0  ;;  %v2007_v47 = vmax.f32 %v1902_v5, 0.0  ;;  %v1704_v23 = vadd.f32 %v1599_v25, %v1419_v4  ;;  %v5027_v11 = vld [vmem:[#allocation24_spill] sm:$0xff] }
 0x2b6   :  { %2106 = vst [vmem:[%s4799_s5 + $0x1c0] sm:$0xff] %v2001_v46  ;;  %v1705_v39 = vadd.f32 %v1600_v44, %v1420_v3  ;;  %v1706_v20 = vadd.f32 %v1601_v34, %v1421_v15  ;;  %v1707_v60 = vadd.f32 %v1602_v32, %v1422_v50  ;;  %v1708_v48 = vadd.f32 %v1603_v18, %v1423_v6  ;;  %v5028_v46 = vld [vmem:[#allocation26_spill] sm:$0xff] }
 0x2b7   :  { %2107 = vst [vmem:[%s4799_s5 + $0x1c8] sm:$0xff] %v2002_v35  ;;  %v1625_v5 = vmul.f32 %v3918_v8, %v5027_v11  ;;  %v1626_v35 = vmul.f32 %v3918_v8, %v5028_v46  ;;  %v1629_v34 = vmul.f32 %v3918_v8, %v3300_v31  ;;  %v1631_v32 = vmul.f32 %v3918_v8, %v3490_v9  ;;  %v1449_v31 = vld [vmem:[%s4798_s4 + $0x250] sm:$0xff]  ;;  %v1451_v9 = vld [vmem:[%s4798_s4 + $0x260] sm:$0xff] }
 0x2b8   :  { %2108 = vst [vmem:[%s4799_s5 + $0x1d0] sm:$0xff] %v2003_v33  ;;  %v1627_v33 = vmul.f32 %v3918_v8, %v3188_v58  ;;  %v1446_v58 = vld [vmem:[%s4798_s4 + $0x238] sm:$0xff]  ;;  %v1733_v57 = vadd.f32 %v1628_v21, %v1448_v28 }
 0x2b9   :  { %2109 = vst [vmem:[%s4799_s5 + $0x1d8] sm:$0xff] %v2004_v27  ;;  %v1798_v41 = vpop.permute.xlu1 %1797  ;;  %v1730_v8 = vadd.f32 %v1625_v5, %v1445_v62  ;;  %v1731_v18 = vadd.f32 %v1626_v35, %v1446_v58  ;;  %v1734_v3 = vadd.f32 %v1629_v34, %v1449_v31  ;;  %v1736_v15 = vadd.f32 %v1631_v32, %v1451_v9  ;;  %v5033_v28 = vld [vmem:[#allocation45_spill] sm:$0xff] }
 0x2ba   :  { %2110 = vst [vmem:[%s4799_s5 + $0x1e0] sm:$0xff] %v2005_v49  ;;  %v1882_v40 = vadd.f32 %v1798_v41, %v1702_v7  ;;  %v1883_v37 = vadd.f32 %v1798_v41, %v1703_v26  ;;  %v1884_v59 = vadd.f32 %v1798_v41, %v1704_v23  ;;  %v1885_v51 = vadd.f32 %v1798_v41, %v1705_v39 }
 0x2bb   :  { %2111 = vst [vmem:[%s4799_s5 + $0x1e8] sm:$0xff] %v2006_v1  ;;  %v1886_v43 = vadd.f32 %v1798_v41, %v1706_v20  ;;  %v1887_v17 = vadd.f32 %v1798_v41, %v1707_v60  ;;  %v1888_v63 = vadd.f32 %v1798_v41, %v1708_v48  ;;  %v1732_v27 = vadd.f32 %v1627_v33, %v1447_v16 }
 0x2bc   :  { %2112 = vst.msk [vmem:[%s4799_s5 + $0x1f0] sm:$0xff] %vm644_vm1, %v2007_v47  ;;  %v1987_v13 = vmax.f32 %v1882_v40, 0.0  ;;  %v1988_v10 = vmax.f32 %v1883_v37, 0.0  ;;  %v1989_v52 = vmax.f32 %v1884_v59, 0.0  ;;  %v1990_v25 = vmax.f32 %v1885_v51, 0.0  ;;  %v5029_v47 = vld [vmem:[#allocation2_spill] sm:$0xff] }
 0x2bd   :  { %v1991_v45 = vmax.f32 %v1886_v43, 0.0  ;;  %v1992_v44 = vmax.f32 %v1887_v17, 0.0  ;;  %v1993_v55 = vmax.f32 %v1888_v63, 0.0  ;;  %v1735_v49 = vadd.f32 %v1630_v53, %v1450_v36  ;;  %v5030_v40 = vld [vmem:[#allocation15_spill] sm:$0xff]  ;;  %v5031_v59 = vld [vmem:[#allocation5_spill] sm:$0xff]  ;;  %v1375_v63 = vld [vmem:[%s4798_s4] sm:$0xff] }
 0x2be   :  { %2092 = vst [vmem:[%s4799_s5 + $0x150] sm:$0xff] %v1987_v13  ;;  %v1555_v26 = vmul.f32 %v3920_v12, %v5029_v47  ;;  %v1556_v37 = vmul.f32 %v3920_v12, %v5030_v40  ;;  %v1557_v51 = vmul.f32 %v3920_v12, %v5031_v59  ;;  %v1558_v43 = vmul.f32 %v3920_v12, %v3194_v0  ;;  %v1376_v0 = vld [vmem:[%s4798_s4 + $0x8] sm:$0xff]  ;;  %v5034_v36 = vld [vmem:[#allocation33_spill] sm:$0xff] }
 0x2bf   :  { %2093 = vst [vmem:[%s4799_s5 + $0x158] sm:$0xff] %v1988_v10  ;;  %v1559_v13 = vmul.f32 %v3920_v12, %v3134_v42  ;;  %v1560_v10 = vmul.f32 %v3920_v12, %v3198_v2  ;;  %v1378_v42 = vld [vmem:[%s4798_s4 + $0x18] sm:$0xff]  ;;  %v1569_v62 = vmul.f32 %v3967_v19, %v3052_v22  ;;  %v1570_v58 = vmul.f32 %v3967_v19, %v3118_v38 }
 0x2c0   :  { %2094 = vst [vmem:[%s4799_s5 + $0x160] sm:$0xff] %v1989_v52  ;;  %v1561_v52 = vmul.f32 %v3920_v12, %v3468_v29  ;;  %v1379_v29 = vld [vmem:[%s4798_s4 + $0x20] sm:$0xff]  ;;  %v1380_v12 = vld [vmem:[%s4798_s4 + $0x28] sm:$0xff]  ;;  %v1660_v46 = vadd.f32 %v1555_v26, %v1375_v63  ;;  %v1661_v35 = vadd.f32 %v1556_v37, %v1376_v0  ;;  %v1663_v21 = vadd.f32 %v1558_v43, %v1378_v42  ;;  %v5038_v40 = vld [vmem:[#allocation81_spill] sm:$0xff] }
 0x2c1   :  { %2095 = vst [vmem:[%s4799_s5 + $0x168] sm:$0xff] %v1990_v25  ;;  %v1664_v34 = vadd.f32 %v1559_v13, %v1379_v29  ;;  %v1665_v53 = vadd.f32 %v1560_v10, %v1380_v12  ;;  %v1571_v16 = vmul.f32 %v3967_v19, %v3066_v24  ;;  %v1572_v31 = vmul.f32 %v3967_v19, %v5033_v28  ;;  %v1438_v42 = vld [vmem:[%s4798_s4 + $0x1f8] sm:$0xff]  ;;  %v1441_v28 = vld [vmem:[%s4798_s4 + $0x210] sm:$0xff] }
 0x2c2   :  { %2096 = vst [vmem:[%s4799_s5 + $0x170] sm:$0xff] %v1991_v45  ;;  %v1377_v45 = vld [vmem:[%s4798_s4 + $0x10] sm:$0xff]  ;;  %v1573_v9 = vmul.f32 %v3967_v19, %v5034_v36  ;;  %v1575_v37 = vmul.f32 %v3967_v19, %v5038_v40  ;;  %v5041_v36 = vld [vmem:[#allocation71_spill] sm:$0xff] }
 0x2c3   :  { %2097 = vst [vmem:[%s4799_s5 + $0x178] sm:$0xff] %v1992_v44  ;;  %v1381_v44 = vld [vmem:[%s4798_s4 + $0x30] sm:$0xff]  ;;  %v1662_v33 = vadd.f32 %v1557_v51, %v1377_v45 }
 0x2c4   :  { %2098 = vst.msk [vmem:[%s4799_s5 + $0x180] sm:$0xff] %vm644_vm1, %v1993_v55  ;;  %v5032_v55 = vld [vmem:[#allocation21_spill] sm:$0xff]  ;;  %v1666_v32 = vadd.f32 %v1561_v52, %v1381_v44 }
 0x2c5   :  { %v4356_v11 = vmul.f32 %v3906_v30, %v5032_v55  ;;  %v1439_v55 = vld [vmem:[%s4798_s4 + $0x200] sm:$0xff] }
 0x2c8   :  { %v1818_v4 = vpop.permute.xlu0 %1817 }
 0x2c9   :  { %v1910_v50 = vadd.f32 %v1818_v4, %v1730_v8  ;;  %v1911_v6 = vadd.f32 %v1818_v4, %v1731_v18  ;;  %v1912_v1 = vadd.f32 %v1818_v4, %v1732_v27  ;;  %v1913_v7 = vadd.f32 %v1818_v4, %v1733_v57  ;;  %v1389_v27 = vld [vmem:[%s4798_s4 + $0x70] sm:$0xff]  ;;  %v5035_v57 = vld [vmem:[#allocation47_spill] sm:$0xff] }
 0x2ca   :  { %v1914_v23 = vadd.f32 %v1818_v4, %v1734_v3  ;;  %v1915_v39 = vadd.f32 %v1818_v4, %v1735_v49  ;;  %v1916_v20 = vadd.f32 %v1818_v4, %v1736_v15  ;;  %v1574_v4 = vmul.f32 %v3967_v19, %v5035_v57  ;;  %v1443_v57 = vld [vmem:[%s4798_s4 + $0x220] sm:$0xff] }
 0x2cb   :  { %v2015_v60 = vmax.f32 %v1910_v50, 0.0  ;;  %v2016_v48 = vmax.f32 %v1911_v6, 0.0  ;;  %v2017_v41 = vmax.f32 %v1912_v1, 0.0  ;;  %v2018_v17 = vmax.f32 %v1913_v7, 0.0  ;;  %v1390_v50 = vld [vmem:[%s4798_s4 + $0x78] sm:$0xff]  ;;  %v1391_v6 = vld [vmem:[%s4798_s4 + $0x80] sm:$0xff] }
 0x2cc   :  { %v2019_v25 = vmax.f32 %v1914_v23, 0.0  ;;  %v2020_v2 = vmax.f32 %v1915_v39, 0.0  ;;  %v2021_v5 = vmax.f32 %v1916_v20, 0.0  ;;  %v1392_v1 = vld [vmem:[%s4798_s4 + $0x88] sm:$0xff]  ;;  %v1393_v20 = vld [vmem:[%s4798_s4 + $0x90] sm:$0xff]  ;;  %v1674_v51 = vadd.f32 %v1569_v62, %v1389_v27 }
 0x2cd   :  { %2120 = vst [vmem:[%s4799_s5 + $0x230] sm:$0xff] %v2015_v60  ;;  %v5036_v7 = vld [vmem:[#allocation23_spill] sm:$0xff]  ;;  %v1394_v60 = vld [vmem:[%s4798_s4 + $0x98] sm:$0xff]  ;;  %v1675_v63 = vadd.f32 %v1570_v58, %v1390_v50  ;;  %v1676_v13 = vadd.f32 %v1571_v16, %v1391_v6  ;;  %v1677_v10 = vadd.f32 %v1572_v31, %v1392_v1  ;;  %v1678_v0 = vadd.f32 %v1573_v9, %v1393_v20 }
 0x2ce   :  { %2121 = vst [vmem:[%s4799_s5 + $0x238] sm:$0xff] %v2016_v48  ;;  %v1619_v47 = vmul.f32 %v3906_v30, %v5036_v7  ;;  %v5037_v48 = vld [vmem:[#allocation35_spill] sm:$0xff]  ;;  %v1679_v45 = vadd.f32 %v1574_v4, %v1394_v60  ;;  %v1723_v31 = vadd.f32 %v4356_v11, %v1438_v42  ;;  %v1623_v9 = vmul.f32 %v3906_v30, %v5041_v36  ;;  %v5044_v7 = vld [vmem:[#allocation28_spill] sm:$0xff]  ;;  %v1455_v42 = vld [vmem:[%s4798_s4 + $0x280] sm:$0xff] }
 0x2cf   :  { %2122 = vst [vmem:[%s4799_s5 + $0x240] sm:$0xff] %v2017_v41  ;;  %v1620_v41 = vmul.f32 %v3906_v30, %v5037_v48  ;;  %v1452_v20 = vld [vmem:[%s4798_s4 + $0x268] sm:$0xff]  ;;  %v5045_v60 = vld [vmem:[#allocation40_spill] sm:$0xff] }
 0x2d0   :  { %2123 = vst [vmem:[%s4799_s5 + $0x248] sm:$0xff] %v2018_v17  ;;  %v1395_v17 = vld [vmem:[%s4798_s4 + $0xa0] sm:$0xff]  ;;  %v1634_v48 = vmul.f32 %v3942_v56, %v5045_v60  ;;  %v1728_v40 = vadd.f32 %v1623_v9, %v1443_v57  ;;  %v5051_v36 = vld [vmem:[#allocation36_spill] sm:$0xff] }
 0x2d1   :  { %2124 = vst [vmem:[%s4799_s5 + $0x250] sm:$0xff] %v2019_v25  ;;  %v1647_v9 = vmul.f32 %v4032_v61, %v5051_v36  ;;  %v5061_v36 = vld [vmem:[#allocation72_spill] sm:$0xff] }
 0x2d2   :  { %2125 = vst [vmem:[%s4799_s5 + $0x258] sm:$0xff] %v2020_v2  ;;  %v1768_v22 = vpop.permute.xlu2 %1767 }
 0x2d3   :  { %2126 = vst.msk [vmem:[%s4799_s5 + $0x260] sm:$0xff] %vm644_vm1, %v2021_v5  ;;  %v1840_v38 = vadd.f32 %v1768_v22, %v1660_v46  ;;  %v1841_v8 = vadd.f32 %v1768_v22, %v1661_v35  ;;  %v1842_v18 = vadd.f32 %v1768_v22, %v1662_v33  ;;  %v1843_v24 = vadd.f32 %v1768_v22, %v1663_v21  ;;  %v5039_v5 = vld [vmem:[#allocation69_spill] sm:$0xff]  ;;  %v5040_v35 = vld [vmem:[#allocation55_spill] sm:$0xff] }
 0x2d4   :  { %v1844_v3 = vadd.f32 %v1768_v22, %v1664_v34  ;;  %v1845_v49 = vadd.f32 %v1768_v22, %v1665_v53  ;;  %v1846_v15 = vadd.f32 %v1768_v22, %v1666_v32  ;;  %v1621_v46 = vmul.f32 %v3906_v30, %v5039_v5  ;;  %v1440_v34 = vld [vmem:[%s4798_s4 + $0x208] sm:$0xff] }
 0x2d5   :  { %v1945_v26 = vmax.f32 %v1840_v38, 0.0  ;;  %v1946_v23 = vmax.f32 %v1841_v8, 0.0  ;;  %v1947_v39 = vmax.f32 %v1842_v18, 0.0  ;;  %v1948_v59 = vmax.f32 %v1843_v24, 0.0  ;;  %v1442_v8 = vld [vmem:[%s4798_s4 + $0x218] sm:$0xff]  ;;  %v1456_v5 = vld [vmem:[%s4798_s4 + $0x288] sm:$0xff] }
 0x2d6   :  { %v1949_v43 = vmax.f32 %v1844_v3, 0.0  ;;  %v1950_v52 = vmax.f32 %v1845_v49, 0.0  ;;  %v1951_v25 = vmax.f32 %v1846_v15, 0.0  ;;  %v1622_v33 = vmul.f32 %v3906_v30, %v5040_v35  ;;  %v5042_v24 = vld [vmem:[#allocation73_spill] sm:$0xff]  ;;  %v5043_v49 = vld [vmem:[#allocation27_spill] sm:$0xff]  ;;  %v5049_v35 = vld [vmem:[#allocation78_spill] sm:$0xff] }
 0x2d7   :  { %2050 = vst [vmem:[%s4799_s5] sm:$0xff] %v1945_v26  ;;  %v1680_v21 = vadd.f32 %v1575_v37, %v1395_v17  ;;  %v1724_v18 = vadd.f32 %v1619_v47, %v1439_v55  ;;  %v1624_v27 = vmul.f32 %v3906_v30, %v5042_v24  ;;  %v1725_v4 = vadd.f32 %v1620_v41, %v1440_v34  ;;  %v1444_v30 = vld [vmem:[%s4798_s4 + $0x228] sm:$0xff]  ;;  %v5052_v24 = vld [vmem:[#allocation46_spill] sm:$0xff] }
 0x2d8   :  { %2051 = vst [vmem:[%s4799_s5 + $0x8] sm:$0xff] %v1946_v23  ;;  %v1632_v15 = vmul.f32 %v3942_v56, %v5043_v49  ;;  %v1726_v6 = vadd.f32 %v1621_v46, %v1441_v28  ;;  %v1633_v47 = vmul.f32 %v3942_v56, %v5044_v7  ;;  %v1727_v23 = vadd.f32 %v1622_v33, %v1442_v8  ;;  %v5053_v49 = vld [vmem:[#allocation80_spill] sm:$0xff] }
 0x2d9   :  { %2052 = vst [vmem:[%s4799_s5 + $0x10] sm:$0xff] %v1947_v39  ;;  %v1729_v17 = vadd.f32 %v1624_v27, %v1444_v30  ;;  %v1638_v33 = vmul.f32 %v3942_v56, %v5049_v35  ;;  %v1648_v27 = vmul.f32 %v4032_v61, %v5052_v24  ;;  %v5062_v24 = vld [vmem:[#allocation86_spill] sm:$0xff] }
 0x2da   :  { %v1778_v19 = vpop.permute.xlu0 %1777  ;;  %2053 = vst [vmem:[%s4799_s5 + $0x18] sm:$0xff] %v1948_v59  ;;  %v1813_v53 = vpop.permute.xlu1 %1812  ;;  %v1453_v59 = vld [vmem:[%s4798_s4 + $0x270] sm:$0xff] }
 0x2db   :  { %v1854_v2 = vadd.f32 %v1778_v19, %v1674_v51  ;;  %v1855_v29 = vadd.f32 %v1778_v19, %v1675_v63  ;;  %v1856_v12 = vadd.f32 %v1778_v19, %v1676_v13  ;;  %v1857_v44 = vadd.f32 %v1778_v19, %v1677_v10  ;;  %2054 = vst [vmem:[%s4799_s5 + $0x20] sm:$0xff] %v1949_v43  ;;  %v5046_v51 = vld [vmem:[#allocation74_spill] sm:$0xff]  ;;  %v1454_v10 = vld [vmem:[%s4798_s4 + $0x278] sm:$0xff] }
 0x2dc   :  { %v1858_v62 = vadd.f32 %v1778_v19, %v1678_v0  ;;  %v1859_v32 = vadd.f32 %v1778_v19, %v1679_v45  ;;  %2055 = vst [vmem:[%s4799_s5 + $0x28] sm:$0xff] %v1950_v52  ;;  %v1860_v22 = vadd.f32 %v1778_v19, %v1680_v21  ;;  %v1903_v3 = vadd.f32 %v1813_v53, %v1723_v31  ;;  %v1823_v52 = vpop.permute.xlu2 %1822 }
 0x2dd   :  { %v1959_v58 = vmax.f32 %v1854_v2, 0.0  ;;  %v1960_v16 = vmax.f32 %v1855_v29, 0.0  ;;  %v1961_v38 = vmax.f32 %v1856_v12, 0.0  ;;  %2056 = vst.msk [vmem:[%s4799_s5 + $0x30] sm:$0xff] %vm644_vm1, %v1951_v25  ;;  %v1962_v11 = vmax.f32 %v1857_v44, 0.0  ;;  %v5047_v25 = vld [vmem:[#allocation61_spill] sm:$0xff] }
 0x2de   :  { %v1963_v50 = vmax.f32 %v1858_v62, 0.0  ;;  %v1904_v1 = vadd.f32 %v1813_v53, %v1724_v18  ;;  %v1964_v26 = vmax.f32 %v1859_v32, 0.0  ;;  %v1905_v39 = vadd.f32 %v1813_v53, %v1725_v4  ;;  %v5048_v29 = vld [vmem:[#allocation75_spill] sm:$0xff]  ;;  %v1457_v62 = vld [vmem:[%s4798_s4 + $0x290] sm:$0xff]  ;;  %v5050_v32 = vld [vmem:[#allocation34_spill] sm:$0xff] }
 0x2df   :  { %2064 = vst [vmem:[%s4799_s5 + $0x70] sm:$0xff] %v1959_v58  ;;  %v1965_v41 = vmax.f32 %v1860_v22, 0.0  ;;  %v1906_v37 = vadd.f32 %v1813_v53, %v1726_v6  ;;  %v1635_v43 = vmul.f32 %v3942_v56, %v5046_v51  ;;  %v1907_v63 = vadd.f32 %v1813_v53, %v1727_v23  ;;  %v1466_v18 = vld [vmem:[%s4798_s4 + $0x2d8] sm:$0xff] }
 0x2e0   :  { %2065 = vst [vmem:[%s4799_s5 + $0x78] sm:$0xff] %v1960_v16  ;;  %v2008_v13 = vmax.f32 %v1903_v3, 0.0  ;;  %v1636_v19 = vmul.f32 %v3942_v56, %v5047_v25  ;;  %v1908_v0 = vadd.f32 %v1813_v53, %v1728_v40  ;;  %v2009_v45 = vmax.f32 %v1904_v1, 0.0  ;;  %v1467_v3 = vld [vmem:[%s4798_s4 + $0x2e0] sm:$0xff]  ;;  %v1468_v1 = vld [vmem:[%s4798_s4 + $0x2e8] sm:$0xff]  ;;  %v5057_v25 = vld [vmem:[#allocation37_spill] sm:$0xff] }
 0x2e1   :  { %2066 = vst [vmem:[%s4799_s5 + $0x80] sm:$0xff] %v1961_v38  ;;  %v1737_v2 = vadd.f32 %v1632_v15, %v1452_v20  ;;  %v1637_v12 = vmul.f32 %v3942_v56, %v5048_v29  ;;  %v1909_v44 = vadd.f32 %v1813_v53, %v1729_v17  ;;  %v2010_v55 = vmax.f32 %v1905_v39, 0.0  ;;  %v1458_v56 = vld [vmem:[%s4798_s4 + $0x298] sm:$0xff]  ;;  %v1469_v20 = vld [vmem:[%s4798_s4 + $0x2f0] sm:$0xff] }
 0x2e2   :  { %2067 = vst [vmem:[%s4799_s5 + $0x88] sm:$0xff] %v1962_v11  ;;  %v1738_v46 = vadd.f32 %v1633_v47, %v1453_v59  ;;  %v2011_v21 = vmax.f32 %v1906_v37, 0.0  ;;  %v1739_v34 = vadd.f32 %v1634_v48, %v1454_v10  ;;  %v1646_v58 = vmul.f32 %v4032_v61, %v5050_v32  ;;  %v5054_v47 = vld [vmem:[#allocation68_spill] sm:$0xff]  ;;  %v5055_v48 = vld [vmem:[#allocation83_spill] sm:$0xff]  ;;  %v1470_v59 = vld [vmem:[%s4798_s4 + $0x2f8] sm:$0xff] }
 0x2e3   :  { %2068 = vst [vmem:[%s4799_s5 + $0x90] sm:$0xff] %v1963_v50  ;;  %v1917_v53 = vadd.f32 %v1823_v52, %v1737_v2  ;;  %v2012_v16 = vmax.f32 %v1907_v63, 0.0  ;;  %v1740_v28 = vadd.f32 %v1635_v43, %v1455_v42  ;;  %v2013_v22 = vmax.f32 %v1908_v0, 0.0  ;;  %v5056_v43 = vld [vmem:[#allocation85_spill] sm:$0xff]  ;;  %v5058_v2 = vld [vmem:[#allocation38_spill] sm:$0xff] }
 0x2e4   :  { %2069 = vst [vmem:[%s4799_s5 + $0x98] sm:$0xff] %v1964_v26  ;;  %v1918_v31 = vadd.f32 %v1823_v52, %v1738_v46  ;;  %v1741_v38 = vadd.f32 %v1636_v19, %v1456_v5  ;;  %v1919_v8 = vadd.f32 %v1823_v52, %v1739_v34  ;;  %v2014_v11 = vmax.f32 %v1909_v44, 0.0  ;;  %v1473_v5 = vld [vmem:[%s4798_s4 + $0x310] sm:$0xff]  ;;  %v5059_v46 = vld [vmem:[#allocation50_spill] sm:$0xff]  ;;  %v1474_v34 = vld [vmem:[%s4798_s4 + $0x318] sm:$0xff] }
 0x2e5   :  { %2070 = vst.msk [vmem:[%s4799_s5 + $0xa0] sm:$0xff] %vm644_vm1, %v1965_v41  ;;  %v1742_v57 = vadd.f32 %v1637_v12, %v1457_v62  ;;  %v1920_v4 = vadd.f32 %v1823_v52, %v1740_v28  ;;  %v1649_v15 = vmul.f32 %v4032_v61, %v5053_v49  ;;  %v1743_v50 = vadd.f32 %v1638_v33, %v1458_v56  ;;  %v1475_v28 = vld [vmem:[%s4798_s4 + $0x320] sm:$0xff]  ;;  %v5063_v49 = vld [vmem:[#allocation87_spill] sm:$0xff] }
 0x2e6   :  { %2113 = vst [vmem:[%s4799_s5 + $0x1f8] sm:$0xff] %v2008_v13  ;;  %v1921_v30 = vadd.f32 %v1823_v52, %v1741_v38  ;;  %v2022_v6 = vmax.f32 %v1917_v53, 0.0  ;;  %v1650_v26 = vmul.f32 %v4032_v61, %v5054_v47  ;;  %v2023_v39 = vmax.f32 %v1918_v31, 0.0  ;;  %v1471_v13 = vld [vmem:[%s4798_s4 + $0x300] sm:$0xff]  ;;  %v5060_v53 = vld [vmem:[#allocation84_spill] sm:$0xff] }
 0x2e7   :  { %2114 = vst [vmem:[%s4799_s5 + $0x200] sm:$0xff] %v2009_v45  ;;  %v1922_v23 = vadd.f32 %v1823_v52, %v1742_v57  ;;  %v1751_v60 = vadd.f32 %v1646_v58, %v1466_v18  ;;  %v1651_v41 = vmul.f32 %v4032_v61, %v5055_v48  ;;  %v1923_v40 = vadd.f32 %v1823_v52, %v1743_v50 }
 0x2e8   :  { %2115 = vst [vmem:[%s4799_s5 + $0x208] sm:$0xff] %v2010_v55  ;;  %v2024_v37 = vmax.f32 %v1919_v8, 0.0  ;;  %v1752_v51 = vadd.f32 %v1647_v9, %v1467_v3  ;;  %v1652_v17 = vmul.f32 %v4032_v61, %v5056_v43  ;;  %v2025_v63 = vmax.f32 %v1920_v4, 0.0  ;;  %v1472_v61 = vld [vmem:[%s4798_s4 + $0x308] sm:$0xff]  ;;  %v1477_v4 = vld [vmem:[%s4798_s4 + $0x330] sm:$0xff] }
 0x2e9   :  { %2116 = vst [vmem:[%s4799_s5 + $0x210] sm:$0xff] %v2011_v21  ;;  %v1753_v10 = vadd.f32 %v1648_v27, %v1468_v1  ;;  %v1653_v19 = vmul.f32 %v4076_v54, %v5057_v25  ;;  %v2026_v0 = vmax.f32 %v1921_v30, 0.0  ;;  %v1754_v45 = vadd.f32 %v1649_v15, %v1469_v20  ;;  %v1476_v8 = vld [vmem:[%s4798_s4 + $0x328] sm:$0xff]  ;;  %v1478_v30 = vld [vmem:[%s4798_s4 + $0x338] sm:$0xff] }
 0x2ea   :  { %v1833_v7 = vpop.permute.xlu0 %1832  ;;  %2117 = vst [vmem:[%s4799_s5 + $0x218] sm:$0xff] %v2012_v16  ;;  %v1654_v29 = vmul.f32 %v4076_v54, %v5058_v2  ;;  %v2027_v12 = vmax.f32 %v1922_v23, 0.0  ;;  %v1755_v44 = vadd.f32 %v1650_v26, %v1470_v59  ;;  %v1655_v35 = vmul.f32 %v4076_v54, %v5059_v46  ;;  %v5065_v20 = vld [vmem:[#allocation19_spill] sm:$0xff]  ;;  %v5066_v59 = vld [vmem:[#allocation9_spill] sm:$0xff] }
 0x2eb   :  { %2118 = vst [vmem:[%s4799_s5 + $0x220] sm:$0xff] %v2013_v22  ;;  %v1931_v52 = vadd.f32 %v1833_v7, %v1751_v60  ;;  %v1932_v42 = vadd.f32 %v1833_v7, %v1752_v51  ;;  %v1933_v55 = vadd.f32 %v1833_v7, %v1753_v10  ;;  %v2028_v33 = vmax.f32 %v1923_v40, 0.0 }
 0x2ec   :  { %2119 = vst.msk [vmem:[%s4799_s5 + $0x228] sm:$0xff] %vm644_vm1, %v2014_v11  ;;  %v1756_v21 = vadd.f32 %v1651_v41, %v1471_v13  ;;  %v1934_v62 = vadd.f32 %v1833_v7, %v1754_v45  ;;  %v1656_v32 = vmul.f32 %v4076_v54, %v5060_v53  ;;  %v1757_v58 = vadd.f32 %v1652_v17, %v1472_v61  ;;  %v1838_v31 = vpop.permute.xlu2 %1837  ;;  %v1383_v13 = vld [vmem:[%s4798_s4 + $0x40] sm:$0xff]  ;;  %v1773_v10 = vpop.permute.xlu1 %1772  ;;  %v1384_v45 = vld [vmem:[%s4798_s4 + $0x48] sm:$0xff] }
 0x2ed   :  { %2127 = vst [vmem:[%s4799_s5 + $0x268] sm:$0xff] %v2022_v6  ;;  %v1935_v16 = vadd.f32 %v1833_v7, %v1755_v44  ;;  %v2036_v56 = vmax.f32 %v1931_v52, 0.0  ;;  %v1657_v9 = vmul.f32 %v4076_v54, %v5061_v36  ;;  %v2037_v38 = vmax.f32 %v1932_v42, 0.0  ;;  %v5067_v52 = vld [vmem:[#allocation41_spill] sm:$0xff]  ;;  %v1385_v44 = vld [vmem:[%s4798_s4 + $0x50] sm:$0xff] }
 0x2ee   :  { %2128 = vst [vmem:[%s4799_s5 + $0x270] sm:$0xff] %v2023_v39  ;;  %v1936_v22 = vadd.f32 %v1833_v7, %v1756_v21  ;;  %v1758_v18 = vadd.f32 %v1653_v19, %v1473_v5  ;;  %v1658_v27 = vmul.f32 %v4076_v54, %v5062_v24  ;;  %v1937_v11 = vadd.f32 %v1833_v7, %v1757_v58  ;;  %v5064_v7 = vld [vmem:[#allocation6_spill] sm:$0xff]  ;;  %v5068_v42 = vld [vmem:[#allocation29_spill] sm:$0xff]  ;;  %v5069_v5 = vld [vmem:[#allocation43_spill] sm:$0xff] }
 0x2ef   :  { %2129 = vst [vmem:[%s4799_s5 + $0x278] sm:$0xff] %v2024_v37  ;;  %v2038_v57 = vmax.f32 %v1933_v55, 0.0  ;;  %v1759_v3 = vadd.f32 %v1654_v29, %v1474_v34  ;;  %v1659_v15 = vmul.f32 %v4076_v54, %v5063_v49  ;;  %v2039_v50 = vmax.f32 %v1934_v62, 0.0  ;;  %v1479_v54 = vld [vmem:[%s4798_s4 + $0x340] sm:$0xff]  ;;  %v1382_v37 = vld [vmem:[%s4798_s4 + $0x38] sm:$0xff]  ;;  %v5070_v34 = vld [vmem:[#allocation76_spill] sm:$0xff] }
 0x2f0   :  { %2130 = vst [vmem:[%s4799_s5 + $0x280] sm:$0xff] %v2025_v63  ;;  %v1760_v6 = vadd.f32 %v1655_v35, %v1475_v28  ;;  %v1938_v1 = vadd.f32 %v1838_v31, %v1758_v18  ;;  %v1562_v47 = vmul.f32 %v3910_v14, %v5064_v7  ;;  %v2040_v26 = vmax.f32 %v1935_v16, 0.0  ;;  %v1386_v21 = vld [vmem:[%s4798_s4 + $0x58] sm:$0xff]  ;;  %v1387_v58 = vld [vmem:[%s4798_s4 + $0x60] sm:$0xff] }
 0x2f1   :  { %2131 = vst [vmem:[%s4799_s5 + $0x288] sm:$0xff] %v2026_v0  ;;  %v1761_v23 = vadd.f32 %v1656_v32, %v1476_v8  ;;  %v1939_v39 = vadd.f32 %v1838_v31, %v1759_v3  ;;  %v1563_v60 = vmul.f32 %v3910_v14, %v5065_v20  ;;  %v2041_v48 = vmax.f32 %v1936_v22, 0.0  ;;  %v5071_v28 = vld [vmem:[#allocation30_spill] sm:$0xff]  ;;  %v5073_v8 = vld [vmem:[#allocation32_spill] sm:$0xff] }
 0x2f2   :  { %2132 = vst [vmem:[%s4799_s5 + $0x290] sm:$0xff] %v2027_v12  ;;  %v1762_v41 = vadd.f32 %v1657_v9, %v1477_v4  ;;  %v1940_v40 = vadd.f32 %v1838_v31, %v1760_v6  ;;  %v1564_v51 = vmul.f32 %v3910_v14, %v5066_v59  ;;  %v2042_v43 = vmax.f32 %v1937_v11, 0.0  ;;  %v5074_v4 = vld [vmem:[#allocation42_spill] sm:$0xff]  ;;  %v5075_v6 = vld [vmem:[#allocation77_spill] sm:$0xff] }
 0x2f3   :  { %2133 = vst.msk [vmem:[%s4799_s5 + $0x298] sm:$0xff] %vm644_vm1, %v2028_v33  ;;  %v1763_v17 = vadd.f32 %v1658_v27, %v1478_v30  ;;  %v1941_v63 = vadd.f32 %v1838_v31, %v1761_v23  ;;  %v1565_v25 = vmul.f32 %v3910_v14, %v5067_v52  ;;  %v1764_v19 = vadd.f32 %v1659_v15, %v1479_v54  ;;  %v1460_v30 = vld [vmem:[%s4798_s4 + $0x2a8] sm:$0xff]  ;;  %v1461_v54 = vld [vmem:[%s4798_s4 + $0x2b0] sm:$0xff] }
 0x2f4   :  { %2141 = vst [vmem:[%s4799_s5 + $0x2d8] sm:$0xff] %v2036_v56  ;;  %v1942_v0 = vadd.f32 %v1838_v31, %v1762_v41  ;;  %v2043_v61 = vmax.f32 %v1938_v1, 0.0  ;;  %v1566_v2 = vmul.f32 %v3910_v14, %v5068_v42  ;;  %v2044_v12 = vmax.f32 %v1939_v39, 0.0  ;;  %v5076_v39 = vld [vmem:[#allocation64_spill] sm:$0xff]  ;;  %v1462_v41 = vld [vmem:[%s4798_s4 + $0x2b8] sm:$0xff] }
 0x2f5   :  { %2142 = vst [vmem:[%s4799_s5 + $0x2e0] sm:$0xff] %v2037_v38  ;;  %v1943_v29 = vadd.f32 %v1838_v31, %v1763_v17  ;;  %v1667_v55 = vadd.f32 %v1562_v47, %v1382_v37  ;;  %v1567_v46 = vmul.f32 %v3910_v14, %v5069_v5  ;;  %v1944_v35 = vadd.f32 %v1838_v31, %v1764_v19  ;;  %v5072_v31 = vld [vmem:[#allocation88_spill] sm:$0xff]  ;;  %v5077_v37 = vld [vmem:[#allocation79_spill] sm:$0xff]  ;;  %v1463_v17 = vld [vmem:[%s4798_s4 + $0x2c0] sm:$0xff] }
 0x2f6   :  { %2143 = vst [vmem:[%s4799_s5 + $0x2e8] sm:$0xff] %v2038_v57  ;;  %v2045_v33 = vmax.f32 %v1940_v40, 0.0  ;;  %v1668_v62 = vadd.f32 %v1563_v60, %v1383_v13  ;;  %v1568_v53 = vmul.f32 %v3910_v14, %v5070_v34  ;;  %v2046_v32 = vmax.f32 %v1941_v63, 0.0  ;;  %v1388_v14 = vld [vmem:[%s4798_s4 + $0x68] sm:$0xff]  ;;  %v1459_v57 = vld [vmem:[%s4798_s4 + $0x2a0] sm:$0xff] }
 0x2f7   :  { %2144 = vst [vmem:[%s4799_s5 + $0x2f0] sm:$0xff] %v2039_v50  ;;  %v1669_v16 = vadd.f32 %v1564_v51, %v1384_v45  ;;  %v1847_v56 = vadd.f32 %v1773_v10, %v1667_v55  ;;  %v1639_v36 = vmul.f32 %v5072_v31, %v5071_v28  ;;  %v2047_v9 = vmax.f32 %v1942_v0, 0.0  ;;  %v5078_v13 = vld [vmem:[#allocation82_spill] sm:$0xff]  ;;  %v1464_v19 = vld [vmem:[%s4798_s4 + $0x2c8] sm:$0xff]  ;;  %v1465_v45 = vld [vmem:[%s4798_s4 + $0x2d0] sm:$0xff] }
 0x2f8   :  { %2145 = vst [vmem:[%s4799_s5 + $0x2f8] sm:$0xff] %v2040_v26  ;;  %v1670_v22 = vadd.f32 %v1565_v25, %v1385_v44  ;;  %v1848_v38 = vadd.f32 %v1773_v10, %v1668_v62  ;;  %v1640_v18 = vmul.f32 %v5072_v31, %v5073_v8  ;;  %v2048_v24 = vmax.f32 %v1943_v29, 0.0 }
 0x2f9   :  { %2146 = vst [vmem:[%s4799_s5 + $0x300] sm:$0xff] %v2041_v48  ;;  %v1671_v27 = vadd.f32 %v1566_v2, %v1386_v21  ;;  %v1849_v11 = vadd.f32 %v1773_v10, %v1669_v16  ;;  %v1641_v3 = vmul.f32 %v5072_v31, %v5074_v4  ;;  %v2049_v49 = vmax.f32 %v1944_v35, 0.0 }
 0x2fa   :  { %2147 = vst.msk [vmem:[%s4799_s5 + $0x308] sm:$0xff] %vm644_vm1, %v2042_v43  ;;  %v1672_v15 = vadd.f32 %v1567_v46, %v1387_v58  ;;  %v1850_v50 = vadd.f32 %v1773_v10, %v1670_v22  ;;  %v1642_v1 = vmul.f32 %v5072_v31, %v5075_v6  ;;  %v1673_v7 = vadd.f32 %v1568_v53, %v1388_v14 }
 0x2fb   :  { %2148 = vst [vmem:[%s4799_s5 + $0x310] sm:$0xff] %v2043_v61  ;;  %v1851_v47 = vadd.f32 %v1773_v10, %v1671_v27  ;;  %v1952_v26 = vmax.f32 %v1847_v56, 0.0  ;;  %v1828_v23 = vpop.permute.xlu1 %1827  ;;  %v1643_v20 = vmul.f32 %v5072_v31, %v5076_v39  ;;  %v1953_v48 = vmax.f32 %v1848_v38, 0.0 }
 0x2fc   :  { %2149 = vst [vmem:[%s4799_s5 + $0x318] sm:$0xff] %v2044_v12  ;;  %v1852_v60 = vadd.f32 %v1773_v10, %v1672_v15  ;;  %v1744_v40 = vadd.f32 %v1639_v36, %v1459_v57  ;;  %v1644_v59 = vmul.f32 %v5072_v31, %v5077_v37  ;;  %v1853_v51 = vadd.f32 %v1773_v10, %v1673_v7 }
 0x2fd   :  { %2150 = vst [vmem:[%s4799_s5 + $0x320] sm:$0xff] %v2045_v33  ;;  %v1954_v43 = vmax.f32 %v1849_v11, 0.0  ;;  %v1745_v63 = vadd.f32 %v1640_v18, %v1460_v30  ;;  %v1645_v52 = vmul.f32 %v5072_v31, %v5078_v13  ;;  %v1955_v25 = vmax.f32 %v1850_v50, 0.0 }
 0x2fe   :  { %2151 = vst [vmem:[%s4799_s5 + $0x328] sm:$0xff] %v2046_v32  ;;  %v1746_v10 = vadd.f32 %v1641_v3, %v1461_v54  ;;  %v1924_v0 = vadd.f32 %v1828_v23, %v1744_v40  ;;  %v1956_v61 = vmax.f32 %v1851_v47, 0.0  ;;  %v1747_v42 = vadd.f32 %v1642_v1, %v1462_v41 }
 0x2ff   :  { %2152 = vst [vmem:[%s4799_s5 + $0x330] sm:$0xff] %v2047_v9  ;;  %v1925_v2 = vadd.f32 %v1828_v23, %v1745_v63  ;;  %v1957_v29 = vmax.f32 %v1852_v60, 0.0  ;;  %v1748_v12 = vadd.f32 %v1643_v20, %v1463_v17  ;;  %v1958_v55 = vmax.f32 %v1853_v51, 0.0 }
 0x300   :  { %2153 = vst [vmem:[%s4799_s5 + $0x338] sm:$0xff] %v2048_v24  ;;  %v1926_v44 = vadd.f32 %v1828_v23, %v1746_v10  ;;  %v1749_v5 = vadd.f32 %v1644_v59, %v1464_v19  ;;  %v1927_v46 = vadd.f32 %v1828_v23, %v1747_v42  ;;  %v1750_v35 = vadd.f32 %v1645_v52, %v1465_v45 }
 0x301   :  { %2154 = vst.msk [vmem:[%s4799_s5 + $0x340] sm:$0xff] %vm644_vm1, %v2049_v49  ;;  %v1928_v33 = vadd.f32 %v1828_v23, %v1748_v12  ;;  %v2029_v21 = vmax.f32 %v1924_v0, 0.0  ;;  %v2030_v34 = vmax.f32 %v1925_v2, 0.0 }
 0x302   :  { %2057 = vst [vmem:[%s4799_s5 + $0x38] sm:$0xff] %v1952_v26  ;;  %v1929_v62 = vadd.f32 %v1828_v23, %v1749_v5  ;;  %v1930_v53 = vadd.f32 %v1828_v23, %v1750_v35  ;;  %v2031_v32 = vmax.f32 %v1926_v44, 0.0  ;;  %v2032_v58 = vmax.f32 %v1927_v46, 0.0 }
 0x303   :  { %2058 = vst [vmem:[%s4799_s5 + $0x40] sm:$0xff] %v1953_v48  ;;  %v2033_v16 = vmax.f32 %v1928_v33, 0.0 }
 0x304   :  { %2059 = vst [vmem:[%s4799_s5 + $0x48] sm:$0xff] %v1954_v43  ;;  %v2034_v56 = vmax.f32 %v1929_v62, 0.0  ;;  %v2035_v28 = vmax.f32 %v1930_v53, 0.0 }
 0x305   :  { %2060 = vst [vmem:[%s4799_s5 + $0x50] sm:$0xff] %v1955_v25 }
 0x306   :  { %2061 = vst [vmem:[%s4799_s5 + $0x58] sm:$0xff] %v1956_v61 }
 0x307   :  { %2062 = vst [vmem:[%s4799_s5 + $0x60] sm:$0xff] %v1957_v29 }
 0x308   :  { %2063 = vst.msk [vmem:[%s4799_s5 + $0x68] sm:$0xff] %vm644_vm1, %v1958_v55 }
 0x309   :  { %2134 = vst [vmem:[%s4799_s5 + $0x2a0] sm:$0xff] %v2029_v21 }
 0x30a   :  { %2135 = vst [vmem:[%s4799_s5 + $0x2a8] sm:$0xff] %v2030_v34 }
 0x30b   :  { %2136 = vst [vmem:[%s4799_s5 + $0x2b0] sm:$0xff] %v2031_v32 }
 0x30c   :  { %2137 = vst [vmem:[%s4799_s5 + $0x2b8] sm:$0xff] %v2032_v58 }
 0x30d   :  { %2138 = vst [vmem:[%s4799_s5 + $0x2c0] sm:$0xff] %v2033_v16 }
 0x30e   :  { %2139 = vst [vmem:[%s4799_s5 + $0x2c8] sm:$0xff] %v2034_v56 }
 0x30f   :  { %2140 = vst.msk [vmem:[%s4799_s5 + $0x2d0] sm:$0xff] %vm644_vm1, %v2035_v28 }

</bundles_post_ra>
